<compile_context>
chip_gen: v7x
topology: tpu7x:2x2x1
jax: 0.10.0
libtpu: 0.0.40
codegen_flags: <defaults>
</compile_context>

<pallas_src>
import numpy as np
import jax
import jax.numpy as jnp
from jax.experimental import pallas as pl
from jax.experimental.pallas import tpu as pltpu

EPS = 1e-6


def _alignment_kernel(x_ref, y_ref, q_ref, cost_ref, drows_ref, cbar_a, cbar_b):
    M, D = x_ref.shape
    N = y_ref.shape[0]
    Np1 = N + 1
    f32 = jnp.float32

    x = x_ref[...].astype(f32)          # (M, D)
    y = y_ref[...].astype(f32)          # (N, D)
    q = q_ref[...].astype(f32)          # (N+1, N)

    # ---------------- pairwise distances via the MXU (transposed layout) -----------------
    # dists_T[n, m] = ||x_m - y_n||_2 ;  d^2 = ||y_n||^2 + ||x_m||^2 - 2 <y_n, x_m>
    dn = (((1,), (1,)), ((), ()))  # contract last dims of both operands
    yx = jax.lax.dot_general(y, x, dn, preferred_element_type=f32)              # (N, M)
    xx_row = jax.lax.dot_general(jnp.ones((1, D), f32), x * x, dn,
                                 preferred_element_type=f32)                    # (1, M)
    yy_col = jnp.sum(y * y, axis=1, keepdims=True)                              # (N, 1)
    dists_T = jnp.sqrt(jnp.maximum(yy_col + xx_row - 2.0 * yx, 0.0))            # (N, M)

    # ---------------- iotas ---------------------------------------------------------------
    row_np1 = jax.lax.broadcasted_iota(jnp.int32, (Np1, 1), 0)
    row_q = jax.lax.broadcasted_iota(jnp.int32, (Np1, N), 0)
    col_q = jax.lax.broadcasted_iota(jnp.int32, (Np1, N), 1)
    lane_1n = jax.lax.broadcasted_iota(jnp.int32, (1, N), 1)
    lane_nm = jax.lax.broadcasted_iota(jnp.int32, (N, M), 1)

    # ---------------- reachability: p (N+1,1), p_back (N+1,N)  (run once, unrolled) -------
    p = jnp.where(row_np1 == 0, 1.0, 0.0).astype(f32)                           # p[0] = 1
    for n_bar in range(N):  # static trip count -> constant masks
        p_nb = jnp.sum(jnp.where(row_np1 == n_bar, p, 0.0))                     # scalar p[n_bar]
        q_col = jnp.sum(jnp.where(col_q == n_bar, q, 0.0),
                        axis=1, keepdims=True)                                  # (N+1,1) q[:,n_bar]
        p = p + p_nb * q_col

    eye = (row_q == col_q).astype(f32)                                          # (N+1, N)
    p_front_row = jnp.sum(p * eye, axis=0, keepdims=True)                       # (1, N) = p[:N]
    inv_p = pl.reciprocal(p + EPS, approx=False)                                # EUP reciprocal
    p_back = p_front_row * q * inv_p                                            # (N+1, N)

    # ancestor weights: W[n, n_bar] = p_back if (n_bar < n and p_back > 0) else 0
    W = jnp.where(jnp.logical_and(col_q < row_q, p_back > 0.0), p_back, 0.0)    # (N+1, N)
    # hoist the m-invariant per-n weight rows out of the DP loops (n = 1 .. N-1)
    w_rows = [jnp.sum(jnp.where(row_q == n, W, 0.0), axis=0, keepdims=True)     # (1, N)
              for n in range(1, N)]
    pb_end = jnp.sum(jnp.where(row_q == N, p_back, 0.0), axis=0, keepdims=True)  # (1, N)

    # ---------------- expected-cost DP (fully unrolled, serial in m and n) ----------------
    C_cur = jnp.zeros((1, N), f32)
    C_prev = jnp.zeros((1, N), f32)
    for m in range(M):
        # ping-pong C_bar buffers (compile-time slot selection)
        cbar_cur_ref, cbar_prev_ref = (cbar_a, cbar_b) if m % 2 == 0 else (cbar_b, cbar_a)

        # drows[n, :] = dists[m, n] broadcast over lanes (one masked reduce + store per m)
        d_col = jnp.sum(jnp.where(lane_nm == m, dists_T, 0.0),
                        axis=1, keepdims=True)                                  # (N, 1)
        drows_ref[...] = jnp.broadcast_to(d_col, (N, N))

        d_row0 = drows_ref[pl.ds(0, 1), :]                                      # (1,N) = dists[m,0]
        if m == 0:
            C_cur = jnp.where(lane_1n == 0, d_row0, 0.0)                        # C[0,0] = d[0,0]
        else:
            c_prev0 = jnp.sum(jnp.where(lane_1n == 0, C_prev, 0.0),
                              axis=1, keepdims=True)                            # (1,1) = C[m-1,0]
            C_cur = jnp.where(lane_1n == 0, d_row0 + c_prev0, 0.0)

        for n in range(1, N):  # serial recurrence over n (static unroll)
            d_row = drows_ref[pl.ds(n, 1), :]                                   # (1,N) dists[m,n]
            if m > 0:
                cbar_prev_row = cbar_prev_ref[pl.ds(n, 1), :]                   # C_bar[m-1, n, :]
                c_min = jnp.minimum(jnp.minimum(C_cur, C_prev), cbar_prev_row)
            else:
                c_min = C_cur
            cbar_row = d_row + c_min                                            # C_bar[m, n, :]
            cbar_cur_ref[pl.ds(n, 1), :] = cbar_row
            c_n = jnp.sum(w_rows[n - 1] * cbar_row, axis=1, keepdims=True)      # (1,1) = C[m,n]
            C_cur = jnp.where(lane_1n == n, c_n, C_cur)

        C_prev = C_cur

    # ---------------- final expected matching cost ----------------------------------------
    cost = jnp.sum(pb_end * C_cur, keepdims=True)                               # (1, 1)
    cost_ref[...] = cost.astype(cost_ref.dtype)


def probabilistic_alignment_loss_batched(x, y, q):
    """Batched Pallas TPU ProbabilisticAlignmentLoss forward.

    x: (B, M, D), y: (B, N, D), q: (B, N+1, N) -> (B,) expected matching costs.
    The batch axis is a 'parallel' grid axis (sharded across TensorCores on v7x).
    """
    B, M, D = x.shape
    Bn, N, Dy = y.shape
    assert Bn == B and Dy == D
    assert q.shape == (B, N + 1, N)
    out = pl.pallas_call(
        _alignment_kernel,
        out_shape=jax.ShapeDtypeStruct((B, 1, 1), jnp.float32),
        grid=(B,),
        in_specs=[
            pl.BlockSpec((None, M, D), lambda b: (b, 0, 0)),
            pl.BlockSpec((None, N, D), lambda b: (b, 0, 0)),
            pl.BlockSpec((None, N + 1, N), lambda b: (b, 0, 0)),
        ],
        out_specs=pl.BlockSpec((None, 1, 1), lambda b: (b, 0, 0)),
        scratch_shapes=[
            pltpu.VMEM((N, N), jnp.float32),   # per-m broadcast distance rows
            pltpu.VMEM((N, N), jnp.float32),   # C_bar ping buffer
            pltpu.VMEM((N, N), jnp.float32),   # C_bar pong buffer
        ],
        compiler_params=pltpu.CompilerParams(dimension_semantics=("parallel",)),
    )(x.astype(jnp.float32), y.astype(jnp.float32), q.astype(jnp.float32))
    return out[:, 0, 0]


def probabilistic_alignment_loss(x, y, q):
    """Single-problem ProbabilisticAlignmentLoss(p=2, dist_fn=None).forward."""
    return probabilistic_alignment_loss_batched(x[None], y[None], q[None])[0]


def _reference_numpy(x, y, q, eps=1e-6):
    """Pure-numpy mirror of the PyTorch forward pass (float64)."""
    x = np.asarray(x, np.float64)
    y = np.asarray(y, np.float64)
    q = np.asarray(q, np.float64)
    M, _ = x.shape
    N = y.shape[0]
    diff = x[:, None, :] - y[None, :, :]
    dists = np.sqrt(np.sum(diff * diff, axis=-1))

    p = np.zeros(N + 1)
    p[0] = 1.0
    for n_bar in range(N):
        p = p + p[n_bar] * q[:, n_bar]
    p_back = p[:N][None, :] * q / (p[:, None] + eps)

    is_edge = p_back > 0
    C = np.zeros((M, N))
    C_bar = np.zeros((M, N, N))
    for m in range(M):
        C[m, 0] = dists[m, 0] + (C[m - 1, 0] if m > 0 else 0.0)
    for m in range(M):
        for n in range(1, N):
            for n_bar in range(n):
                if is_edge[n, n_bar]:
                    c_min = C[m, n_bar]
                    if m > 0 and C[m - 1, n_bar] < c_min:
                        c_min = C[m - 1, n_bar]
                    if m > 0 and C_bar[m - 1, n, n_bar] < c_min:
                        c_min = C_bar[m - 1, n, n_bar]
                    C_bar[m, n, n_bar] = dists[m, n] + c_min
                    C[m, n] += p_back[n, n_bar] * C_bar[m, n, n_bar]
    return float(np.sum(p_back[-1, :] * C[-1, :]))


if __name__ == "__main__":
    M, N, D = 8, 8, 32
    key = jax.random.PRNGKey(0)
    kx, ky, kq = jax.random.split(key, 3)
    x = jax.random.normal(kx, (M, D), dtype=jnp.float32)
    y = jax.random.normal(ky, (N, D), dtype=jnp.float32)
    q_logits = jax.random.normal(kq, (N + 1, N), dtype=jnp.float32)
    q = jax.nn.softmax(q_logits, axis=0)  # each column is a jump distribution from state n_bar

    cost = jax.block_until_ready(probabilistic_alignment_loss(x, y, q))
    ref = _reference_numpy(np.asarray(x), np.asarray(y), np.asarray(q))
    assert np.allclose(float(cost), ref, rtol=1e-3, atol=1e-3), (float(cost), ref)

    # batched path: B independent alignment problems on the parallel grid axis
    B = 4
    keys = jax.random.split(jax.random.PRNGKey(1), 3 * B)
    xs = jnp.stack([jax.random.normal(keys[i], (M, D), dtype=jnp.float32) for i in range(B)])
    ys = jnp.stack([jax.random.normal(keys[B + i], (N, D), dtype=jnp.float32) for i in range(B)])
    qs = jnp.stack([jax.nn.softmax(jax.random.normal(keys[2 * B + i], (N + 1, N),
                                                     dtype=jnp.float32), axis=0)
                    for i in range(B)])
    costs = jax.block_until_ready(probabilistic_alignment_loss_batched(xs, ys, qs))
    for i in range(B):
        ref_i = _reference_numpy(np.asarray(xs[i]), np.asarray(ys[i]), np.asarray(qs[i]))
        assert np.allclose(float(costs[i]), ref_i, rtol=1e-3, atol=1e-3), (i, float(costs[i]), ref_i)

    # TODO(synk): `sample()` (torch.distributions categorical sampling + data-dependent Python
    # while loop) and `recover_alignment()` (host-side backtracking over match_argmin) are
    # inference utilities outside forward(); not implemented as kernels.
    print("KERNEL_OK")
</pallas_src>

<mosaic_0001>
module attributes {stable_mosaic.version = 11 : i64} {
  func.func @_alignment_kernel(%arg0: i32, %arg1: memref<1x8x32xf32, #tpu.memory_space<vmem>>, %arg2: memref<1x8x32xf32, #tpu.memory_space<vmem>>, %arg3: memref<1x9x8xf32, #tpu.memory_space<vmem>>, %arg4: memref<1x1x1xf32, #tpu.memory_space<vmem>>, %arg5: memref<8x8xf32, #tpu.memory_space<vmem>>, %arg6: memref<8x8xf32, #tpu.memory_space<vmem>>, %arg7: memref<8x8xf32, #tpu.memory_space<vmem>>) attributes {dimension_semantics = [#tpu.dimension_semantics<parallel>], iteration_bounds = array<i64: 1>, scalar_prefetch = 0 : i64, scratch_operands = 3 : i64, tpu.core_type = #tpu.core_type<tc>, window_params = [{transform_indices = @transform_0, window_bounds = array<i64: 1, 8, 32>}, {transform_indices = @transform_1, window_bounds = array<i64: 1, 8, 32>}, {transform_indices = @transform_2, window_bounds = array<i64: 1, 9, 8>}, {transform_indices = @transform_3, window_bounds = array<i64: 1, 1, 1>}]} {
    %c0 = arith.constant 0 : index
    %c0_0 = arith.constant 0 : index
    %c0_1 = arith.constant 0 : index
    %0 = vector.load %arg1[%c0, %c0_0, %c0_1] : memref<1x8x32xf32, #tpu.memory_space<vmem>>, vector<1x8x32xf32>
    %1 = vector.shape_cast %0 : vector<1x8x32xf32> to vector<8x32xf32>
    %c0_2 = arith.constant 0 : index
    %c0_3 = arith.constant 0 : index
    %c0_4 = arith.constant 0 : index
    %2 = vector.load %arg2[%c0_2, %c0_3, %c0_4] : memref<1x8x32xf32, #tpu.memory_space<vmem>>, vector<1x8x32xf32>
    %3 = vector.shape_cast %2 : vector<1x8x32xf32> to vector<8x32xf32>
    %c0_5 = arith.constant 0 : index
    %c0_6 = arith.constant 0 : index
    %c0_7 = arith.constant 0 : index
    %4 = vector.load %arg3[%c0_5, %c0_6, %c0_7] : memref<1x9x8xf32, #tpu.memory_space<vmem>>, vector<1x9x8xf32>
    %5 = vector.shape_cast %4 : vector<1x9x8xf32> to vector<9x8xf32>
    %cst = arith.constant dense<0.000000e+00> : vector<8x8xf32>
    %6 = tpu.matmul %3, %1, %cst {dimension_numbers = #tpu.dot_dimension_numbers<[1], [1], [0], [0], [0, 0, 1, 0], [], []>} : vector<8x32xf32>, vector<8x32xf32>, vector<8x8xf32> -> vector<8x8xf32>
    %cst_8 = arith.constant 1.000000e+00 : f32
    %7 = vector.broadcast %cst_8 : f32 to vector<1x32xf32>
    %8 = arith.mulf %1, %1 : vector<8x32xf32>
    %cst_9 = arith.constant dense<0.000000e+00> : vector<1x8xf32>
    %9 = tpu.matmul %7, %8, %cst_9 {dimension_numbers = #tpu.dot_dimension_numbers<[1], [1], [0], [0], [0, 0, 1, 0], [], []>} : vector<1x32xf32>, vector<8x32xf32>, vector<1x8xf32> -> vector<1x8xf32>
    %10 = arith.mulf %3, %3 : vector<8x32xf32>
    %cst_10 = arith.constant dense<0.000000e+00> : vector<8xf32>
    %11 = vector.multi_reduction <add>, %10, %cst_10 [1] : vector<8x32xf32> to vector<8xf32>
    %12 = vector.shape_cast %11 : vector<8xf32> to vector<8x1xf32>
    %13 = vector.broadcast %12 : vector<8x1xf32> to vector<8x8xf32>
    %14 = vector.broadcast %9 : vector<1x8xf32> to vector<8x8xf32>
    %15 = arith.addf %13, %14 : vector<8x8xf32>
    %cst_11 = arith.constant 2.000000e+00 : f32
    %16 = vector.broadcast %cst_11 : f32 to vector<8x8xf32>
    %17 = arith.mulf %16, %6 : vector<8x8xf32>
    %18 = arith.subf %15, %17 : vector<8x8xf32>
    %cst_12 = arith.constant 0.000000e+00 : f32
    %19 = vector.broadcast %cst_12 : f32 to vector<8x8xf32>
    %20 = arith.maximumf %18, %19 : vector<8x8xf32>
    %21 = math.sqrt %20 : vector<8x8xf32>
    %22 = tpu.iota {dimensions = array<i32: 0>} : vector<9x1xi32>
    %23 = tpu.iota {dimensions = array<i32: 0>} : vector<9x8xi32>
    %24 = tpu.iota {dimensions = array<i32: 1>} : vector<9x8xi32>
    %25 = tpu.iota {dimensions = array<i32: 1>} : vector<1x8xi32>
    %26 = tpu.iota {dimensions = array<i32: 1>} : vector<8x8xi32>
    %c0_i32 = arith.constant 0 : i32
    %27 = vector.broadcast %c0_i32 : i32 to vector<9x1xi32>
    %28 = arith.cmpi eq, %22, %27 : vector<9x1xi32>
    %cst_13 = arith.constant 1.000000e+00 : f32
    %cst_14 = arith.constant 0.000000e+00 : f32
    %29 = vector.broadcast %cst_13 : f32 to vector<9x1xf32>
    %30 = vector.broadcast %cst_14 : f32 to vector<9x1xf32>
    %31 = arith.select %28, %29, %30 : vector<9x1xi1>, vector<9x1xf32>
    %c0_i32_15 = arith.constant 0 : i32
    %32 = vector.broadcast %c0_i32_15 : i32 to vector<9x1xi32>
    %33 = arith.cmpi eq, %22, %32 : vector<9x1xi32>
    %cst_16 = arith.constant 0.000000e+00 : f32
    %34 = vector.broadcast %cst_16 : f32 to vector<9x1xf32>
    %35 = arith.select %33, %31, %34 : vector<9x1xi1>, vector<9x1xf32>
    %36 = vector.shape_cast %35 : vector<9x1xf32> to vector<1x9x1xf32>
    %cst_17 = arith.constant dense<0.000000e+00> : vector<1xf32>
    %37 = vector.multi_reduction <add>, %36, %cst_17 [1, 2] : vector<1x9x1xf32> to vector<1xf32>
    %38 = vector.shape_cast %37 : vector<1xf32> to vector<1x1x1xf32>
    %39 = vector.extract %38[0, 0, 0] : f32 from vector<1x1x1xf32>
    %c0_i32_18 = arith.constant 0 : i32
    %40 = vector.broadcast %c0_i32_18 : i32 to vector<9x8xi32>
    %41 = arith.cmpi eq, %24, %40 : vector<9x8xi32>
    %cst_19 = arith.constant 0.000000e+00 : f32
    %42 = vector.broadcast %cst_19 : f32 to vector<9x8xf32>
    %43 = arith.select %41, %5, %42 : vector<9x8xi1>, vector<9x8xf32>
    %cst_20 = arith.constant dense<0.000000e+00> : vector<9xf32>
    %44 = vector.multi_reduction <add>, %43, %cst_20 [1] : vector<9x8xf32> to vector<9xf32>
    %45 = vector.shape_cast %44 : vector<9xf32> to vector<9x1xf32>
    %46 = vector.broadcast %39 : f32 to vector<9x1xf32>
    %47 = arith.mulf %46, %45 : vector<9x1xf32>
    %48 = arith.addf %31, %47 : vector<9x1xf32>
    %c1_i32 = arith.constant 1 : i32
    %49 = vector.broadcast %c1_i32 : i32 to vector<9x1xi32>
    %50 = arith.cmpi eq, %22, %49 : vector<9x1xi32>
    %cst_21 = arith.constant 0.000000e+00 : f32
    %51 = vector.broadcast %cst_21 : f32 to vector<9x1xf32>
    %52 = arith.select %50, %48, %51 : vector<9x1xi1>, vector<9x1xf32>
    %53 = vector.shape_cast %52 : vector<9x1xf32> to vector<1x9x1xf32>
    %cst_22 = arith.constant dense<0.000000e+00> : vector<1xf32>
    %54 = vector.multi_reduction <add>, %53, %cst_22 [1, 2] : vector<1x9x1xf32> to vector<1xf32>
    %55 = vector.shape_cast %54 : vector<1xf32> to vector<1x1x1xf32>
    %56 = vector.extract %55[0, 0, 0] : f32 from vector<1x1x1xf32>
    %c1_i32_23 = arith.constant 1 : i32
    %57 = vector.broadcast %c1_i32_23 : i32 to vector<9x8xi32>
    %58 = arith.cmpi eq, %24, %57 : vector<9x8xi32>
    %cst_24 = arith.constant 0.000000e+00 : f32
    %59 = vector.broadcast %cst_24 : f32 to vector<9x8xf32>
    %60 = arith.select %58, %5, %59 : vector<9x8xi1>, vector<9x8xf32>
    %cst_25 = arith.constant dense<0.000000e+00> : vector<9xf32>
    %61 = vector.multi_reduction <add>, %60, %cst_25 [1] : vector<9x8xf32> to vector<9xf32>
    %62 = vector.shape_cast %61 : vector<9xf32> to vector<9x1xf32>
    %63 = vector.broadcast %56 : f32 to vector<9x1xf32>
    %64 = arith.mulf %63, %62 : vector<9x1xf32>
    %65 = arith.addf %48, %64 : vector<9x1xf32>
    %c2_i32 = arith.constant 2 : i32
    %66 = vector.broadcast %c2_i32 : i32 to vector<9x1xi32>
    %67 = arith.cmpi eq, %22, %66 : vector<9x1xi32>
    %cst_26 = arith.constant 0.000000e+00 : f32
    %68 = vector.broadcast %cst_26 : f32 to vector<9x1xf32>
    %69 = arith.select %67, %65, %68 : vector<9x1xi1>, vector<9x1xf32>
    %70 = vector.shape_cast %69 : vector<9x1xf32> to vector<1x9x1xf32>
    %cst_27 = arith.constant dense<0.000000e+00> : vector<1xf32>
    %71 = vector.multi_reduction <add>, %70, %cst_27 [1, 2] : vector<1x9x1xf32> to vector<1xf32>
    %72 = vector.shape_cast %71 : vector<1xf32> to vector<1x1x1xf32>
    %73 = vector.extract %72[0, 0, 0] : f32 from vector<1x1x1xf32>
    %c2_i32_28 = arith.constant 2 : i32
    %74 = vector.broadcast %c2_i32_28 : i32 to vector<9x8xi32>
    %75 = arith.cmpi eq, %24, %74 : vector<9x8xi32>
    %cst_29 = arith.constant 0.000000e+00 : f32
    %76 = vector.broadcast %cst_29 : f32 to vector<9x8xf32>
    %77 = arith.select %75, %5, %76 : vector<9x8xi1>, vector<9x8xf32>
    %cst_30 = arith.constant dense<0.000000e+00> : vector<9xf32>
    %78 = vector.multi_reduction <add>, %77, %cst_30 [1] : vector<9x8xf32> to vector<9xf32>
    %79 = vector.shape_cast %78 : vector<9xf32> to vector<9x1xf32>
    %80 = vector.broadcast %73 : f32 to vector<9x1xf32>
    %81 = arith.mulf %80, %79 : vector<9x1xf32>
    %82 = arith.addf %65, %81 : vector<9x1xf32>
    %c3_i32 = arith.constant 3 : i32
    %83 = vector.broadcast %c3_i32 : i32 to vector<9x1xi32>
    %84 = arith.cmpi eq, %22, %83 : vector<9x1xi32>
    %cst_31 = arith.constant 0.000000e+00 : f32
    %85 = vector.broadcast %cst_31 : f32 to vector<9x1xf32>
    %86 = arith.select %84, %82, %85 : vector<9x1xi1>, vector<9x1xf32>
    %87 = vector.shape_cast %86 : vector<9x1xf32> to vector<1x9x1xf32>
    %cst_32 = arith.constant dense<0.000000e+00> : vector<1xf32>
    %88 = vector.multi_reduction <add>, %87, %cst_32 [1, 2] : vector<1x9x1xf32> to vector<1xf32>
    %89 = vector.shape_cast %88 : vector<1xf32> to vector<1x1x1xf32>
    %90 = vector.extract %89[0, 0, 0] : f32 from vector<1x1x1xf32>
    %c3_i32_33 = arith.constant 3 : i32
    %91 = vector.broadcast %c3_i32_33 : i32 to vector<9x8xi32>
    %92 = arith.cmpi eq, %24, %91 : vector<9x8xi32>
    %cst_34 = arith.constant 0.000000e+00 : f32
    %93 = vector.broadcast %cst_34 : f32 to vector<9x8xf32>
    %94 = arith.select %92, %5, %93 : vector<9x8xi1>, vector<9x8xf32>
    %cst_35 = arith.constant dense<0.000000e+00> : vector<9xf32>
    %95 = vector.multi_reduction <add>, %94, %cst_35 [1] : vector<9x8xf32> to vector<9xf32>
    %96 = vector.shape_cast %95 : vector<9xf32> to vector<9x1xf32>
    %97 = vector.broadcast %90 : f32 to vector<9x1xf32>
    %98 = arith.mulf %97, %96 : vector<9x1xf32>
    %99 = arith.addf %82, %98 : vector<9x1xf32>
    %c4_i32 = arith.constant 4 : i32
    %100 = vector.broadcast %c4_i32 : i32 to vector<9x1xi32>
    %101 = arith.cmpi eq, %22, %100 : vector<9x1xi32>
    %cst_36 = arith.constant 0.000000e+00 : f32
    %102 = vector.broadcast %cst_36 : f32 to vector<9x1xf32>
    %103 = arith.select %101, %99, %102 : vector<9x1xi1>, vector<9x1xf32>
    %104 = vector.shape_cast %103 : vector<9x1xf32> to vector<1x9x1xf32>
    %cst_37 = arith.constant dense<0.000000e+00> : vector<1xf32>
    %105 = vector.multi_reduction <add>, %104, %cst_37 [1, 2] : vector<1x9x1xf32> to vector<1xf32>
    %106 = vector.shape_cast %105 : vector<1xf32> to vector<1x1x1xf32>
    %107 = vector.extract %106[0, 0, 0] : f32 from vector<1x1x1xf32>
    %c4_i32_38 = arith.constant 4 : i32
    %108 = vector.broadcast %c4_i32_38 : i32 to vector<9x8xi32>
    %109 = arith.cmpi eq, %24, %108 : vector<9x8xi32>
    %cst_39 = arith.constant 0.000000e+00 : f32
    %110 = vector.broadcast %cst_39 : f32 to vector<9x8xf32>
    %111 = arith.select %109, %5, %110 : vector<9x8xi1>, vector<9x8xf32>
    %cst_40 = arith.constant dense<0.000000e+00> : vector<9xf32>
    %112 = vector.multi_reduction <add>, %111, %cst_40 [1] : vector<9x8xf32> to vector<9xf32>
    %113 = vector.shape_cast %112 : vector<9xf32> to vector<9x1xf32>
    %114 = vector.broadcast %107 : f32 to vector<9x1xf32>
    %115 = arith.mulf %114, %113 : vector<9x1xf32>
    %116 = arith.addf %99, %115 : vector<9x1xf32>
    %c5_i32 = arith.constant 5 : i32
    %117 = vector.broadcast %c5_i32 : i32 to vector<9x1xi32>
    %118 = arith.cmpi eq, %22, %117 : vector<9x1xi32>
    %cst_41 = arith.constant 0.000000e+00 : f32
    %119 = vector.broadcast %cst_41 : f32 to vector<9x1xf32>
    %120 = arith.select %118, %116, %119 : vector<9x1xi1>, vector<9x1xf32>
    %121 = vector.shape_cast %120 : vector<9x1xf32> to vector<1x9x1xf32>
    %cst_42 = arith.constant dense<0.000000e+00> : vector<1xf32>
    %122 = vector.multi_reduction <add>, %121, %cst_42 [1, 2] : vector<1x9x1xf32> to vector<1xf32>
    %123 = vector.shape_cast %122 : vector<1xf32> to vector<1x1x1xf32>
    %124 = vector.extract %123[0, 0, 0] : f32 from vector<1x1x1xf32>
    %c5_i32_43 = arith.constant 5 : i32
    %125 = vector.broadcast %c5_i32_43 : i32 to vector<9x8xi32>
    %126 = arith.cmpi eq, %24, %125 : vector<9x8xi32>
    %cst_44 = arith.constant 0.000000e+00 : f32
    %127 = vector.broadcast %cst_44 : f32 to vector<9x8xf32>
    %128 = arith.select %126, %5, %127 : vector<9x8xi1>, vector<9x8xf32>
    %cst_45 = arith.constant dense<0.000000e+00> : vector<9xf32>
    %129 = vector.multi_reduction <add>, %128, %cst_45 [1] : vector<9x8xf32> to vector<9xf32>
    %130 = vector.shape_cast %129 : vector<9xf32> to vector<9x1xf32>
    %131 = vector.broadcast %124 : f32 to vector<9x1xf32>
    %132 = arith.mulf %131, %130 : vector<9x1xf32>
    %133 = arith.addf %116, %132 : vector<9x1xf32>
    %c6_i32 = arith.constant 6 : i32
    %134 = vector.broadcast %c6_i32 : i32 to vector<9x1xi32>
    %135 = arith.cmpi eq, %22, %134 : vector<9x1xi32>
    %cst_46 = arith.constant 0.000000e+00 : f32
    %136 = vector.broadcast %cst_46 : f32 to vector<9x1xf32>
    %137 = arith.select %135, %133, %136 : vector<9x1xi1>, vector<9x1xf32>
    %138 = vector.shape_cast %137 : vector<9x1xf32> to vector<1x9x1xf32>
    %cst_47 = arith.constant dense<0.000000e+00> : vector<1xf32>
    %139 = vector.multi_reduction <add>, %138, %cst_47 [1, 2] : vector<1x9x1xf32> to vector<1xf32>
    %140 = vector.shape_cast %139 : vector<1xf32> to vector<1x1x1xf32>
    %141 = vector.extract %140[0, 0, 0] : f32 from vector<1x1x1xf32>
    %c6_i32_48 = arith.constant 6 : i32
    %142 = vector.broadcast %c6_i32_48 : i32 to vector<9x8xi32>
    %143 = arith.cmpi eq, %24, %142 : vector<9x8xi32>
    %cst_49 = arith.constant 0.000000e+00 : f32
    %144 = vector.broadcast %cst_49 : f32 to vector<9x8xf32>
    %145 = arith.select %143, %5, %144 : vector<9x8xi1>, vector<9x8xf32>
    %cst_50 = arith.constant dense<0.000000e+00> : vector<9xf32>
    %146 = vector.multi_reduction <add>, %145, %cst_50 [1] : vector<9x8xf32> to vector<9xf32>
    %147 = vector.shape_cast %146 : vector<9xf32> to vector<9x1xf32>
    %148 = vector.broadcast %141 : f32 to vector<9x1xf32>
    %149 = arith.mulf %148, %147 : vector<9x1xf32>
    %150 = arith.addf %133, %149 : vector<9x1xf32>
    %c7_i32 = arith.constant 7 : i32
    %151 = vector.broadcast %c7_i32 : i32 to vector<9x1xi32>
    %152 = arith.cmpi eq, %22, %151 : vector<9x1xi32>
    %cst_51 = arith.constant 0.000000e+00 : f32
    %153 = vector.broadcast %cst_51 : f32 to vector<9x1xf32>
    %154 = arith.select %152, %150, %153 : vector<9x1xi1>, vector<9x1xf32>
    %155 = vector.shape_cast %154 : vector<9x1xf32> to vector<1x9x1xf32>
    %cst_52 = arith.constant dense<0.000000e+00> : vector<1xf32>
    %156 = vector.multi_reduction <add>, %155, %cst_52 [1, 2] : vector<1x9x1xf32> to vector<1xf32>
    %157 = vector.shape_cast %156 : vector<1xf32> to vector<1x1x1xf32>
    %158 = vector.extract %157[0, 0, 0] : f32 from vector<1x1x1xf32>
    %c7_i32_53 = arith.constant 7 : i32
    %159 = vector.broadcast %c7_i32_53 : i32 to vector<9x8xi32>
    %160 = arith.cmpi eq, %24, %159 : vector<9x8xi32>
    %cst_54 = arith.constant 0.000000e+00 : f32
    %161 = vector.broadcast %cst_54 : f32 to vector<9x8xf32>
    %162 = arith.select %160, %5, %161 : vector<9x8xi1>, vector<9x8xf32>
    %cst_55 = arith.constant dense<0.000000e+00> : vector<9xf32>
    %163 = vector.multi_reduction <add>, %162, %cst_55 [1] : vector<9x8xf32> to vector<9xf32>
    %164 = vector.shape_cast %163 : vector<9xf32> to vector<9x1xf32>
    %165 = vector.broadcast %158 : f32 to vector<9x1xf32>
    %166 = arith.mulf %165, %164 : vector<9x1xf32>
    %167 = arith.addf %150, %166 : vector<9x1xf32>
    %168 = arith.cmpi eq, %23, %24 : vector<9x8xi32>
    %169 = arith.extui %168 : vector<9x8xi1> to vector<9x8xi32>
    %170 = arith.sitofp %169 : vector<9x8xi32> to vector<9x8xf32>
    %171 = vector.broadcast %167 : vector<9x1xf32> to vector<9x8xf32>
    %172 = arith.mulf %171, %170 : vector<9x8xf32>
    %cst_56 = arith.constant dense<0.000000e+00> : vector<8xf32>
    %173 = vector.multi_reduction <add>, %172, %cst_56 [0] : vector<9x8xf32> to vector<8xf32>
    %174 = vector.shape_cast %173 : vector<8xf32> to vector<1x8xf32>
    %cst_57 = arith.constant 9.99999997E-7 : f32
    %175 = vector.broadcast %cst_57 : f32 to vector<9x1xf32>
    %176 = arith.addf %167, %175 : vector<9x1xf32>
    %177 = tpu.reciprocal %176 : vector<9x1xf32> -> vector<9x1xf32>
    %178 = vector.broadcast %174 : vector<1x8xf32> to vector<9x8xf32>
    %179 = arith.mulf %178, %5 : vector<9x8xf32>
    %180 = vector.broadcast %177 : vector<9x1xf32> to vector<9x8xf32>
    %181 = arith.mulf %179, %180 : vector<9x8xf32>
    %182 = arith.cmpi slt, %24, %23 : vector<9x8xi32>
    %cst_58 = arith.constant 0.000000e+00 : f32
    %183 = vector.broadcast %cst_58 : f32 to vector<9x8xf32>
    %184 = arith.cmpf ogt, %181, %183 : vector<9x8xf32>
    %185 = arith.andi %182, %184 : vector<9x8xi1>
    %cst_59 = arith.constant 0.000000e+00 : f32
    %186 = vector.broadcast %cst_59 : f32 to vector<9x8xf32>
    %187 = arith.select %185, %181, %186 : vector<9x8xi1>, vector<9x8xf32>
    %c1_i32_60 = arith.constant 1 : i32
    %188 = vector.broadcast %c1_i32_60 : i32 to vector<9x8xi32>
    %189 = arith.cmpi eq, %23, %188 : vector<9x8xi32>
    %cst_61 = arith.constant 0.000000e+00 : f32
    %190 = vector.broadcast %cst_61 : f32 to vector<9x8xf32>
    %191 = arith.select %189, %187, %190 : vector<9x8xi1>, vector<9x8xf32>
    %cst_62 = arith.constant dense<0.000000e+00> : vector<8xf32>
    %192 = vector.multi_reduction <add>, %191, %cst_62 [0] : vector<9x8xf32> to vector<8xf32>
    %193 = vector.shape_cast %192 : vector<8xf32> to vector<1x8xf32>
    %c2_i32_63 = arith.constant 2 : i32
    %194 = vector.broadcast %c2_i32_63 : i32 to vector<9x8xi32>
    %195 = arith.cmpi eq, %23, %194 : vector<9x8xi32>
    %cst_64 = arith.constant 0.000000e+00 : f32
    %196 = vector.broadcast %cst_64 : f32 to vector<9x8xf32>
    %197 = arith.select %195, %187, %196 : vector<9x8xi1>, vector<9x8xf32>
    %cst_65 = arith.constant dense<0.000000e+00> : vector<8xf32>
    %198 = vector.multi_reduction <add>, %197, %cst_65 [0] : vector<9x8xf32> to vector<8xf32>
    %199 = vector.shape_cast %198 : vector<8xf32> to vector<1x8xf32>
    %c3_i32_66 = arith.constant 3 : i32
    %200 = vector.broadcast %c3_i32_66 : i32 to vector<9x8xi32>
    %201 = arith.cmpi eq, %23, %200 : vector<9x8xi32>
    %cst_67 = arith.constant 0.000000e+00 : f32
    %202 = vector.broadcast %cst_67 : f32 to vector<9x8xf32>
    %203 = arith.select %201, %187, %202 : vector<9x8xi1>, vector<9x8xf32>
    %cst_68 = arith.constant dense<0.000000e+00> : vector<8xf32>
    %204 = vector.multi_reduction <add>, %203, %cst_68 [0] : vector<9x8xf32> to vector<8xf32>
    %205 = vector.shape_cast %204 : vector<8xf32> to vector<1x8xf32>
    %c4_i32_69 = arith.constant 4 : i32
    %206 = vector.broadcast %c4_i32_69 : i32 to vector<9x8xi32>
    %207 = arith.cmpi eq, %23, %206 : vector<9x8xi32>
    %cst_70 = arith.constant 0.000000e+00 : f32
    %208 = vector.broadcast %cst_70 : f32 to vector<9x8xf32>
    %209 = arith.select %207, %187, %208 : vector<9x8xi1>, vector<9x8xf32>
    %cst_71 = arith.constant dense<0.000000e+00> : vector<8xf32>
    %210 = vector.multi_reduction <add>, %209, %cst_71 [0] : vector<9x8xf32> to vector<8xf32>
    %211 = vector.shape_cast %210 : vector<8xf32> to vector<1x8xf32>
    %c5_i32_72 = arith.constant 5 : i32
    %212 = vector.broadcast %c5_i32_72 : i32 to vector<9x8xi32>
    %213 = arith.cmpi eq, %23, %212 : vector<9x8xi32>
    %cst_73 = arith.constant 0.000000e+00 : f32
    %214 = vector.broadcast %cst_73 : f32 to vector<9x8xf32>
    %215 = arith.select %213, %187, %214 : vector<9x8xi1>, vector<9x8xf32>
    %cst_74 = arith.constant dense<0.000000e+00> : vector<8xf32>
    %216 = vector.multi_reduction <add>, %215, %cst_74 [0] : vector<9x8xf32> to vector<8xf32>
    %217 = vector.shape_cast %216 : vector<8xf32> to vector<1x8xf32>
    %c6_i32_75 = arith.constant 6 : i32
    %218 = vector.broadcast %c6_i32_75 : i32 to vector<9x8xi32>
    %219 = arith.cmpi eq, %23, %218 : vector<9x8xi32>
    %cst_76 = arith.constant 0.000000e+00 : f32
    %220 = vector.broadcast %cst_76 : f32 to vector<9x8xf32>
    %221 = arith.select %219, %187, %220 : vector<9x8xi1>, vector<9x8xf32>
    %cst_77 = arith.constant dense<0.000000e+00> : vector<8xf32>
    %222 = vector.multi_reduction <add>, %221, %cst_77 [0] : vector<9x8xf32> to vector<8xf32>
    %223 = vector.shape_cast %222 : vector<8xf32> to vector<1x8xf32>
    %c7_i32_78 = arith.constant 7 : i32
    %224 = vector.broadcast %c7_i32_78 : i32 to vector<9x8xi32>
    %225 = arith.cmpi eq, %23, %224 : vector<9x8xi32>
    %cst_79 = arith.constant 0.000000e+00 : f32
    %226 = vector.broadcast %cst_79 : f32 to vector<9x8xf32>
    %227 = arith.select %225, %187, %226 : vector<9x8xi1>, vector<9x8xf32>
    %cst_80 = arith.constant dense<0.000000e+00> : vector<8xf32>
    %228 = vector.multi_reduction <add>, %227, %cst_80 [0] : vector<9x8xf32> to vector<8xf32>
    %229 = vector.shape_cast %228 : vector<8xf32> to vector<1x8xf32>
    %c8_i32 = arith.constant 8 : i32
    %230 = vector.broadcast %c8_i32 : i32 to vector<9x8xi32>
    %231 = arith.cmpi eq, %23, %230 : vector<9x8xi32>
    %cst_81 = arith.constant 0.000000e+00 : f32
    %232 = vector.broadcast %cst_81 : f32 to vector<9x8xf32>
    %233 = arith.select %231, %181, %232 : vector<9x8xi1>, vector<9x8xf32>
    %cst_82 = arith.constant dense<0.000000e+00> : vector<8xf32>
    %234 = vector.multi_reduction <add>, %233, %cst_82 [0] : vector<9x8xf32> to vector<8xf32>
    %235 = vector.shape_cast %234 : vector<8xf32> to vector<1x8xf32>
    %c0_i32_83 = arith.constant 0 : i32
    %236 = vector.broadcast %c0_i32_83 : i32 to vector<8x8xi32>
    %237 = arith.cmpi eq, %26, %236 : vector<8x8xi32>
    %cst_84 = arith.constant 0.000000e+00 : f32
    %238 = vector.broadcast %cst_84 : f32 to vector<8x8xf32>
    %239 = arith.select %237, %21, %238 : vector<8x8xi1>, vector<8x8xf32>
    %cst_85 = arith.constant dense<0.000000e+00> : vector<8xf32>
    %240 = vector.multi_reduction <add>, %239, %cst_85 [1] : vector<8x8xf32> to vector<8xf32>
    %241 = vector.shape_cast %240 : vector<8xf32> to vector<8x1xf32>
    %242 = vector.shape_cast %241 : vector<8x1xf32> to vector<8x1xf32>
    %243 = vector.broadcast %242 : vector<8x1xf32> to vector<8x8xf32>
    %c0_86 = arith.constant 0 : index
    %c0_87 = arith.constant 0 : index
    %244 = vector.load %arg5[%c0_86, %c0_87] : memref<8x8xf32, #tpu.memory_space<vmem>>, vector<8x8xf32>
    tpu.vector_store %arg5[%c0_86, %c0_87], %243 {strides = array<i32>} : memref<8x8xf32, #tpu.memory_space<vmem>>, vector<8x8xf32>,
    %c0_88 = arith.constant 0 : index
    %c0_89 = arith.constant 0 : index
    %245 = vector.load %arg5[%c0_88, %c0_89] : memref<8x8xf32, #tpu.memory_space<vmem>>, vector<1x8xf32>
    %c0_i32_90 = arith.constant 0 : i32
    %246 = vector.broadcast %c0_i32_90 : i32 to vector<1x8xi32>
    %247 = arith.cmpi eq, %25, %246 : vector<1x8xi32>
    %cst_91 = arith.constant 0.000000e+00 : f32
    %248 = vector.broadcast %cst_91 : f32 to vector<1x8xf32>
    %249 = arith.select %247, %245, %248 : vector<1x8xi1>, vector<1x8xf32>
    %c1 = arith.constant 1 : index
    %c0_92 = arith.constant 0 : index
    %250 = vector.load %arg5[%c1, %c0_92] : memref<8x8xf32, #tpu.memory_space<vmem>>, vector<1x8xf32>
    %251 = arith.addf %250, %249 : vector<1x8xf32>
    %c1_93 = arith.constant 1 : index
    %c0_94 = arith.constant 0 : index
    %252 = vector.load %arg6[%c1_93, %c0_94] : memref<8x8xf32, #tpu.memory_space<vmem>>, vector<1x8xf32>
    tpu.vector_store %arg6[%c1_93, %c0_94], %251 {strides = array<i32>} : memref<8x8xf32, #tpu.memory_space<vmem>>, vector<1x8xf32>,
    %253 = arith.mulf %193, %251 : vector<1x8xf32>
    %cst_95 = arith.constant dense<0.000000e+00> : vector<1xf32>
    %254 = vector.multi_reduction <add>, %253, %cst_95 [1] : vector<1x8xf32> to vector<1xf32>
    %255 = vector.shape_cast %254 : vector<1xf32> to vector<1x1xf32>
    %c1_i32_96 = arith.constant 1 : i32
    %256 = vector.broadcast %c1_i32_96 : i32 to vector<1x8xi32>
    %257 = arith.cmpi eq, %25, %256 : vector<1x8xi32>
    %258 = vector.shape_cast %255 : vector<1x1xf32> to vector<1x1xf32>
    %259 = vector.broadcast %258 : vector<1x1xf32> to vector<1x8xf32>
    %260 = arith.select %257, %259, %249 : vector<1x8xi1>, vector<1x8xf32>
    %c2 = arith.constant 2 : index
    %c0_97 = arith.constant 0 : index
    %261 = vector.load %arg5[%c2, %c0_97] : memref<8x8xf32, #tpu.memory_space<vmem>>, vector<1x8xf32>
    %262 = arith.addf %261, %260 : vector<1x8xf32>
    %c2_98 = arith.constant 2 : index
    %c0_99 = arith.constant 0 : index
    %263 = vector.load %arg6[%c2_98, %c0_99] : memref<8x8xf32, #tpu.memory_space<vmem>>, vector<1x8xf32>
    tpu.vector_store %arg6[%c2_98, %c0_99], %262 {strides = array<i32>} : memref<8x8xf32, #tpu.memory_space<vmem>>, vector<1x8xf32>,
    %264 = arith.mulf %199, %262 : vector<1x8xf32>
    %cst_100 = arith.constant dense<0.000000e+00> : vector<1xf32>
    %265 = vector.multi_reduction <add>, %264, %cst_100 [1] : vector<1x8xf32> to vector<1xf32>
    %266 = vector.shape_cast %265 : vector<1xf32> to vector<1x1xf32>
    %c2_i32_101 = arith.constant 2 : i32
    %267 = vector.broadcast %c2_i32_101 : i32 to vector<1x8xi32>
    %268 = arith.cmpi eq, %25, %267 : vector<1x8xi32>
    %269 = vector.shape_cast %266 : vector<1x1xf32> to vector<1x1xf32>
    %270 = vector.broadcast %269 : vector<1x1xf32> to vector<1x8xf32>
    %271 = arith.select %268, %270, %260 : vector<1x8xi1>, vector<1x8xf32>
    %c3 = arith.constant 3 : index
    %c0_102 = arith.constant 0 : index
    %272 = vector.load %arg5[%c3, %c0_102] : memref<8x8xf32, #tpu.memory_space<vmem>>, vector<1x8xf32>
    %273 = arith.addf %272, %271 : vector<1x8xf32>
    %c3_103 = arith.constant 3 : index
    %c0_104 = arith.constant 0 : index
    %274 = vector.load %arg6[%c3_103, %c0_104] : memref<8x8xf32, #tpu.memory_space<vmem>>, vector<1x8xf32>
    tpu.vector_store %arg6[%c3_103, %c0_104], %273 {strides = array<i32>} : memref<8x8xf32, #tpu.memory_space<vmem>>, vector<1x8xf32>,
    %275 = arith.mulf %205, %273 : vector<1x8xf32>
    %cst_105 = arith.constant dense<0.000000e+00> : vector<1xf32>
    %276 = vector.multi_reduction <add>, %275, %cst_105 [1] : vector<1x8xf32> to vector<1xf32>
    %277 = vector.shape_cast %276 : vector<1xf32> to vector<1x1xf32>
    %c3_i32_106 = arith.constant 3 : i32
    %278 = vector.broadcast %c3_i32_106 : i32 to vector<1x8xi32>
    %279 = arith.cmpi eq, %25, %278 : vector<1x8xi32>
    %280 = vector.shape_cast %277 : vector<1x1xf32> to vector<1x1xf32>
    %281 = vector.broadcast %280 : vector<1x1xf32> to vector<1x8xf32>
    %282 = arith.select %279, %281, %271 : vector<1x8xi1>, vector<1x8xf32>
    %c4 = arith.constant 4 : index
    %c0_107 = arith.constant 0 : index
    %283 = vector.load %arg5[%c4, %c0_107] : memref<8x8xf32, #tpu.memory_space<vmem>>, vector<1x8xf32>
    %284 = arith.addf %283, %282 : vector<1x8xf32>
    %c4_108 = arith.constant 4 : index
    %c0_109 = arith.constant 0 : index
    %285 = vector.load %arg6[%c4_108, %c0_109] : memref<8x8xf32, #tpu.memory_space<vmem>>, vector<1x8xf32>
    tpu.vector_store %arg6[%c4_108, %c0_109], %284 {strides = array<i32>} : memref<8x8xf32, #tpu.memory_space<vmem>>, vector<1x8xf32>,
    %286 = arith.mulf %211, %284 : vector<1x8xf32>
    %cst_110 = arith.constant dense<0.000000e+00> : vector<1xf32>
    %287 = vector.multi_reduction <add>, %286, %cst_110 [1] : vector<1x8xf32> to vector<1xf32>
    %288 = vector.shape_cast %287 : vector<1xf32> to vector<1x1xf32>
    %c4_i32_111 = arith.constant 4 : i32
    %289 = vector.broadcast %c4_i32_111 : i32 to vector<1x8xi32>
    %290 = arith.cmpi eq, %25, %289 : vector<1x8xi32>
    %291 = vector.shape_cast %288 : vector<1x1xf32> to vector<1x1xf32>
    %292 = vector.broadcast %291 : vector<1x1xf32> to vector<1x8xf32>
    %293 = arith.select %290, %292, %282 : vector<1x8xi1>, vector<1x8xf32>
    %c5 = arith.constant 5 : index
    %c0_112 = arith.constant 0 : index
    %294 = vector.load %arg5[%c5, %c0_112] : memref<8x8xf32, #tpu.memory_space<vmem>>, vector<1x8xf32>
    %295 = arith.addf %294, %293 : vector<1x8xf32>
    %c5_113 = arith.constant 5 : index
    %c0_114 = arith.constant 0 : index
    %296 = vector.load %arg6[%c5_113, %c0_114] : memref<8x8xf32, #tpu.memory_space<vmem>>, vector<1x8xf32>
    tpu.vector_store %arg6[%c5_113, %c0_114], %295 {strides = array<i32>} : memref<8x8xf32, #tpu.memory_space<vmem>>, vector<1x8xf32>,
    %297 = arith.mulf %217, %295 : vector<1x8xf32>
    %cst_115 = arith.constant dense<0.000000e+00> : vector<1xf32>
    %298 = vector.multi_reduction <add>, %297, %cst_115 [1] : vector<1x8xf32> to vector<1xf32>
    %299 = vector.shape_cast %298 : vector<1xf32> to vector<1x1xf32>
    %c5_i32_116 = arith.constant 5 : i32
    %300 = vector.broadcast %c5_i32_116 : i32 to vector<1x8xi32>
    %301 = arith.cmpi eq, %25, %300 : vector<1x8xi32>
    %302 = vector.shape_cast %299 : vector<1x1xf32> to vector<1x1xf32>
    %303 = vector.broadcast %302 : vector<1x1xf32> to vector<1x8xf32>
    %304 = arith.select %301, %303, %293 : vector<1x8xi1>, vector<1x8xf32>
    %c6 = arith.constant 6 : index
    %c0_117 = arith.constant 0 : index
    %305 = vector.load %arg5[%c6, %c0_117] : memref<8x8xf32, #tpu.memory_space<vmem>>, vector<1x8xf32>
    %306 = arith.addf %305, %304 : vector<1x8xf32>
    %c6_118 = arith.constant 6 : index
    %c0_119 = arith.constant 0 : index
    %307 = vector.load %arg6[%c6_118, %c0_119] : memref<8x8xf32, #tpu.memory_space<vmem>>, vector<1x8xf32>
    tpu.vector_store %arg6[%c6_118, %c0_119], %306 {strides = array<i32>} : memref<8x8xf32, #tpu.memory_space<vmem>>, vector<1x8xf32>,
    %308 = arith.mulf %223, %306 : vector<1x8xf32>
    %cst_120 = arith.constant dense<0.000000e+00> : vector<1xf32>
    %309 = vector.multi_reduction <add>, %308, %cst_120 [1] : vector<1x8xf32> to vector<1xf32>
    %310 = vector.shape_cast %309 : vector<1xf32> to vector<1x1xf32>
    %c6_i32_121 = arith.constant 6 : i32
    %311 = vector.broadcast %c6_i32_121 : i32 to vector<1x8xi32>
    %312 = arith.cmpi eq, %25, %311 : vector<1x8xi32>
    %313 = vector.shape_cast %310 : vector<1x1xf32> to vector<1x1xf32>
    %314 = vector.broadcast %313 : vector<1x1xf32> to vector<1x8xf32>
    %315 = arith.select %312, %314, %304 : vector<1x8xi1>, vector<1x8xf32>
    %c7 = arith.constant 7 : index
    %c0_122 = arith.constant 0 : index
    %316 = vector.load %arg5[%c7, %c0_122] : memref<8x8xf32, #tpu.memory_space<vmem>>, vector<1x8xf32>
    %317 = arith.addf %316, %315 : vector<1x8xf32>
    %c7_123 = arith.constant 7 : index
    %c0_124 = arith.constant 0 : index
    %318 = vector.load %arg6[%c7_123, %c0_124] : memref<8x8xf32, #tpu.memory_space<vmem>>, vector<1x8xf32>
    tpu.vector_store %arg6[%c7_123, %c0_124], %317 {strides = array<i32>} : memref<8x8xf32, #tpu.memory_space<vmem>>, vector<1x8xf32>,
    %319 = arith.mulf %229, %317 : vector<1x8xf32>
    %cst_125 = arith.constant dense<0.000000e+00> : vector<1xf32>
    %320 = vector.multi_reduction <add>, %319, %cst_125 [1] : vector<1x8xf32> to vector<1xf32>
    %321 = vector.shape_cast %320 : vector<1xf32> to vector<1x1xf32>
    %c7_i32_126 = arith.constant 7 : i32
    %322 = vector.broadcast %c7_i32_126 : i32 to vector<1x8xi32>
    %323 = arith.cmpi eq, %25, %322 : vector<1x8xi32>
    %324 = vector.shape_cast %321 : vector<1x1xf32> to vector<1x1xf32>
    %325 = vector.broadcast %324 : vector<1x1xf32> to vector<1x8xf32>
    %326 = arith.select %323, %325, %315 : vector<1x8xi1>, vector<1x8xf32>
    %c1_i32_127 = arith.constant 1 : i32
    %327 = vector.broadcast %c1_i32_127 : i32 to vector<8x8xi32>
    %328 = arith.cmpi eq, %26, %327 : vector<8x8xi32>
    %cst_128 = arith.constant 0.000000e+00 : f32
    %329 = vector.broadcast %cst_128 : f32 to vector<8x8xf32>
    %330 = arith.select %328, %21, %329 : vector<8x8xi1>, vector<8x8xf32>
    %cst_129 = arith.constant dense<0.000000e+00> : vector<8xf32>
    %331 = vector.multi_reduction <add>, %330, %cst_129 [1] : vector<8x8xf32> to vector<8xf32>
    %332 = vector.shape_cast %331 : vector<8xf32> to vector<8x1xf32>
    %333 = vector.shape_cast %332 : vector<8x1xf32> to vector<8x1xf32>
    %334 = vector.broadcast %333 : vector<8x1xf32> to vector<8x8xf32>
    %c0_130 = arith.constant 0 : index
    %c0_131 = arith.constant 0 : index
    %335 = vector.load %arg5[%c0_130, %c0_131] : memref<8x8xf32, #tpu.memory_space<vmem>>, vector<8x8xf32>
    tpu.vector_store %arg5[%c0_130, %c0_131], %334 {strides = array<i32>} : memref<8x8xf32, #tpu.memory_space<vmem>>, vector<8x8xf32>,
    %c0_132 = arith.constant 0 : index
    %c0_133 = arith.constant 0 : index
    %336 = vector.load %arg5[%c0_132, %c0_133] : memref<8x8xf32, #tpu.memory_space<vmem>>, vector<1x8xf32>
    %c0_i32_134 = arith.constant 0 : i32
    %337 = vector.broadcast %c0_i32_134 : i32 to vector<1x8xi32>
    %338 = arith.cmpi eq, %25, %337 : vector<1x8xi32>
    %cst_135 = arith.constant 0.000000e+00 : f32
    %339 = vector.broadcast %cst_135 : f32 to vector<1x8xf32>
    %340 = arith.select %338, %326, %339 : vector<1x8xi1>, vector<1x8xf32>
    %cst_136 = arith.constant dense<0.000000e+00> : vector<1xf32>
    %341 = vector.multi_reduction <add>, %340, %cst_136 [1] : vector<1x8xf32> to vector<1xf32>
    %342 = vector.shape_cast %341 : vector<1xf32> to vector<1x1xf32>
    %c0_i32_137 = arith.constant 0 : i32
    %343 = vector.broadcast %c0_i32_137 : i32 to vector<1x8xi32>
    %344 = arith.cmpi eq, %25, %343 : vector<1x8xi32>
    %345 = vector.broadcast %342 : vector<1x1xf32> to vector<1x8xf32>
    %346 = arith.addf %336, %345 : vector<1x8xf32>
    %cst_138 = arith.constant 0.000000e+00 : f32
    %347 = vector.broadcast %cst_138 : f32 to vector<1x8xf32>
    %348 = arith.select %344, %346, %347 : vector<1x8xi1>, vector<1x8xf32>
    %c1_139 = arith.constant 1 : index
    %c0_140 = arith.constant 0 : index
    %349 = vector.load %arg5[%c1_139, %c0_140] : memref<8x8xf32, #tpu.memory_space<vmem>>, vector<1x8xf32>
    %c1_141 = arith.constant 1 : index
    %c0_142 = arith.constant 0 : index
    %350 = vector.load %arg6[%c1_141, %c0_142] : memref<8x8xf32, #tpu.memory_space<vmem>>, vector<1x8xf32>
    %351 = arith.minimumf %348, %326 : vector<1x8xf32>
    %352 = arith.minimumf %351, %350 : vector<1x8xf32>
    %353 = arith.addf %349, %352 : vector<1x8xf32>
    %c1_143 = arith.constant 1 : index
    %c0_144 = arith.constant 0 : index
    %354 = vector.load %arg7[%c1_143, %c0_144] : memref<8x8xf32, #tpu.memory_space<vmem>>, vector<1x8xf32>
    tpu.vector_store %arg7[%c1_143, %c0_144], %353 {strides = array<i32>} : memref<8x8xf32, #tpu.memory_space<vmem>>, vector<1x8xf32>,
    %355 = arith.mulf %193, %353 : vector<1x8xf32>
    %cst_145 = arith.constant dense<0.000000e+00> : vector<1xf32>
    %356 = vector.multi_reduction <add>, %355, %cst_145 [1] : vector<1x8xf32> to vector<1xf32>
    %357 = vector.shape_cast %356 : vector<1xf32> to vector<1x1xf32>
    %c1_i32_146 = arith.constant 1 : i32
    %358 = vector.broadcast %c1_i32_146 : i32 to vector<1x8xi32>
    %359 = arith.cmpi eq, %25, %358 : vector<1x8xi32>
    %360 = vector.shape_cast %357 : vector<1x1xf32> to vector<1x1xf32>
    %361 = vector.broadcast %360 : vector<1x1xf32> to vector<1x8xf32>
    %362 = arith.select %359, %361, %348 : vector<1x8xi1>, vector<1x8xf32>
    %c2_147 = arith.constant 2 : index
    %c0_148 = arith.constant 0 : index
    %363 = vector.load %arg5[%c2_147, %c0_148] : memref<8x8xf32, #tpu.memory_space<vmem>>, vector<1x8xf32>
    %c2_149 = arith.constant 2 : index
    %c0_150 = arith.constant 0 : index
    %364 = vector.load %arg6[%c2_149, %c0_150] : memref<8x8xf32, #tpu.memory_space<vmem>>, vector<1x8xf32>
    %365 = arith.minimumf %362, %326 : vector<1x8xf32>
    %366 = arith.minimumf %365, %364 : vector<1x8xf32>
    %367 = arith.addf %363, %366 : vector<1x8xf32>
    %c2_151 = arith.constant 2 : index
    %c0_152 = arith.constant 0 : index
    %368 = vector.load %arg7[%c2_151, %c0_152] : memref<8x8xf32, #tpu.memory_space<vmem>>, vector<1x8xf32>
    tpu.vector_store %arg7[%c2_151, %c0_152], %367 {strides = array<i32>} : memref<8x8xf32, #tpu.memory_space<vmem>>, vector<1x8xf32>,
    %369 = arith.mulf %199, %367 : vector<1x8xf32>
    %cst_153 = arith.constant dense<0.000000e+00> : vector<1xf32>
    %370 = vector.multi_reduction <add>, %369, %cst_153 [1] : vector<1x8xf32> to vector<1xf32>
    %371 = vector.shape_cast %370 : vector<1xf32> to vector<1x1xf32>
    %c2_i32_154 = arith.constant 2 : i32
    %372 = vector.broadcast %c2_i32_154 : i32 to vector<1x8xi32>
    %373 = arith.cmpi eq, %25, %372 : vector<1x8xi32>
    %374 = vector.shape_cast %371 : vector<1x1xf32> to vector<1x1xf32>
    %375 = vector.broadcast %374 : vector<1x1xf32> to vector<1x8xf32>
    %376 = arith.select %373, %375, %362 : vector<1x8xi1>, vector<1x8xf32>
    %c3_155 = arith.constant 3 : index
    %c0_156 = arith.constant 0 : index
    %377 = vector.load %arg5[%c3_155, %c0_156] : memref<8x8xf32, #tpu.memory_space<vmem>>, vector<1x8xf32>
    %c3_157 = arith.constant 3 : index
    %c0_158 = arith.constant 0 : index
    %378 = vector.load %arg6[%c3_157, %c0_158] : memref<8x8xf32, #tpu.memory_space<vmem>>, vector<1x8xf32>
    %379 = arith.minimumf %376, %326 : vector<1x8xf32>
    %380 = arith.minimumf %379, %378 : vector<1x8xf32>
    %381 = arith.addf %377, %380 : vector<1x8xf32>
    %c3_159 = arith.constant 3 : index
    %c0_160 = arith.constant 0 : index
    %382 = vector.load %arg7[%c3_159, %c0_160] : memref<8x8xf32, #tpu.memory_space<vmem>>, vector<1x8xf32>
    tpu.vector_store %arg7[%c3_159, %c0_160], %381 {strides = array<i32>} : memref<8x8xf32, #tpu.memory_space<vmem>>, vector<1x8xf32>,
    %383 = arith.mulf %205, %381 : vector<1x8xf32>
    %cst_161 = arith.constant dense<0.000000e+00> : vector<1xf32>
    %384 = vector.multi_reduction <add>, %383, %cst_161 [1] : vector<1x8xf32> to vector<1xf32>
    %385 = vector.shape_cast %384 : vector<1xf32> to vector<1x1xf32>
    %c3_i32_162 = arith.constant 3 : i32
    %386 = vector.broadcast %c3_i32_162 : i32 to vector<1x8xi32>
    %387 = arith.cmpi eq, %25, %386 : vector<1x8xi32>
    %388 = vector.shape_cast %385 : vector<1x1xf32> to vector<1x1xf32>
    %389 = vector.broadcast %388 : vector<1x1xf32> to vector<1x8xf32>
    %390 = arith.select %387, %389, %376 : vector<1x8xi1>, vector<1x8xf32>
    %c4_163 = arith.constant 4 : index
    %c0_164 = arith.constant 0 : index
    %391 = vector.load %arg5[%c4_163, %c0_164] : memref<8x8xf32, #tpu.memory_space<vmem>>, vector<1x8xf32>
    %c4_165 = arith.constant 4 : index
    %c0_166 = arith.constant 0 : index
    %392 = vector.load %arg6[%c4_165, %c0_166] : memref<8x8xf32, #tpu.memory_space<vmem>>, vector<1x8xf32>
    %393 = arith.minimumf %390, %326 : vector<1x8xf32>
    %394 = arith.minimumf %393, %392 : vector<1x8xf32>
    %395 = arith.addf %391, %394 : vector<1x8xf32>
    %c4_167 = arith.constant 4 : index
    %c0_168 = arith.constant 0 : index
    %396 = vector.load %arg7[%c4_167, %c0_168] : memref<8x8xf32, #tpu.memory_space<vmem>>, vector<1x8xf32>
    tpu.vector_store %arg7[%c4_167, %c0_168], %395 {strides = array<i32>} : memref<8x8xf32, #tpu.memory_space<vmem>>, vector<1x8xf32>,
    %397 = arith.mulf %211, %395 : vector<1x8xf32>
    %cst_169 = arith.constant dense<0.000000e+00> : vector<1xf32>
    %398 = vector.multi_reduction <add>, %397, %cst_169 [1] : vector<1x8xf32> to vector<1xf32>
    %399 = vector.shape_cast %398 : vector<1xf32> to vector<1x1xf32>
    %c4_i32_170 = arith.constant 4 : i32
    %400 = vector.broadcast %c4_i32_170 : i32 to vector<1x8xi32>
    %401 = arith.cmpi eq, %25, %400 : vector<1x8xi32>
    %402 = vector.shape_cast %399 : vector<1x1xf32> to vector<1x1xf32>
    %403 = vector.broadcast %402 : vector<1x1xf32> to vector<1x8xf32>
    %404 = arith.select %401, %403, %390 : vector<1x8xi1>, vector<1x8xf32>
    %c5_171 = arith.constant 5 : index
    %c0_172 = arith.constant 0 : index
    %405 = vector.load %arg5[%c5_171, %c0_172] : memref<8x8xf32, #tpu.memory_space<vmem>>, vector<1x8xf32>
    %c5_173 = arith.constant 5 : index
    %c0_174 = arith.constant 0 : index
    %406 = vector.load %arg6[%c5_173, %c0_174] : memref<8x8xf32, #tpu.memory_space<vmem>>, vector<1x8xf32>
    %407 = arith.minimumf %404, %326 : vector<1x8xf32>
    %408 = arith.minimumf %407, %406 : vector<1x8xf32>
    %409 = arith.addf %405, %408 : vector<1x8xf32>
    %c5_175 = arith.constant 5 : index
    %c0_176 = arith.constant 0 : index
    %410 = vector.load %arg7[%c5_175, %c0_176] : memref<8x8xf32, #tpu.memory_space<vmem>>, vector<1x8xf32>
    tpu.vector_store %arg7[%c5_175, %c0_176], %409 {strides = array<i32>} : memref<8x8xf32, #tpu.memory_space<vmem>>, vector<1x8xf32>,
    %411 = arith.mulf %217, %409 : vector<1x8xf32>
    %cst_177 = arith.constant dense<0.000000e+00> : vector<1xf32>
    %412 = vector.multi_reduction <add>, %411, %cst_177 [1] : vector<1x8xf32> to vector<1xf32>
    %413 = vector.shape_cast %412 : vector<1xf32> to vector<1x1xf32>
    %c5_i32_178 = arith.constant 5 : i32
    %414 = vector.broadcast %c5_i32_178 : i32 to vector<1x8xi32>
    %415 = arith.cmpi eq, %25, %414 : vector<1x8xi32>
    %416 = vector.shape_cast %413 : vector<1x1xf32> to vector<1x1xf32>
    %417 = vector.broadcast %416 : vector<1x1xf32> to vector<1x8xf32>
    %418 = arith.select %415, %417, %404 : vector<1x8xi1>, vector<1x8xf32>
    %c6_179 = arith.constant 6 : index
    %c0_180 = arith.constant 0 : index
    %419 = vector.load %arg5[%c6_179, %c0_180] : memref<8x8xf32, #tpu.memory_space<vmem>>, vector<1x8xf32>
    %c6_181 = arith.constant 6 : index
    %c0_182 = arith.constant 0 : index
    %420 = vector.load %arg6[%c6_181, %c0_182] : memref<8x8xf32, #tpu.memory_space<vmem>>, vector<1x8xf32>
    %421 = arith.minimumf %418, %326 : vector<1x8xf32>
    %422 = arith.minimumf %421, %420 : vector<1x8xf32>
    %423 = arith.addf %419, %422 : vector<1x8xf32>
    %c6_183 = arith.constant 6 : index
    %c0_184 = arith.constant 0 : index
    %424 = vector.load %arg7[%c6_183, %c0_184] : memref<8x8xf32, #tpu.memory_space<vmem>>, vector<1x8xf32>
    tpu.vector_store %arg7[%c6_183, %c0_184], %423 {strides = array<i32>} : memref<8x8xf32, #tpu.memory_space<vmem>>, vector<1x8xf32>,
    %425 = arith.mulf %223, %423 : vector<1x8xf32>
    %cst_185 = arith.constant dense<0.000000e+00> : vector<1xf32>
    %426 = vector.multi_reduction <add>, %425, %cst_185 [1] : vector<1x8xf32> to vector<1xf32>
    %427 = vector.shape_cast %426 : vector<1xf32> to vector<1x1xf32>
    %c6_i32_186 = arith.constant 6 : i32
    %428 = vector.broadcast %c6_i32_186 : i32 to vector<1x8xi32>
    %429 = arith.cmpi eq, %25, %428 : vector<1x8xi32>
    %430 = vector.shape_cast %427 : vector<1x1xf32> to vector<1x1xf32>
    %431 = vector.broadcast %430 : vector<1x1xf32> to vector<1x8xf32>
    %432 = arith.select %429, %431, %418 : vector<1x8xi1>, vector<1x8xf32>
    %c7_187 = arith.constant 7 : index
    %c0_188 = arith.constant 0 : index
    %433 = vector.load %arg5[%c7_187, %c0_188] : memref<8x8xf32, #tpu.memory_space<vmem>>, vector<1x8xf32>
    %c7_189 = arith.constant 7 : index
    %c0_190 = arith.constant 0 : index
    %434 = vector.load %arg6[%c7_189, %c0_190] : memref<8x8xf32, #tpu.memory_space<vmem>>, vector<1x8xf32>
    %435 = arith.minimumf %432, %326 : vector<1x8xf32>
    %436 = arith.minimumf %435, %434 : vector<1x8xf32>
    %437 = arith.addf %433, %436 : vector<1x8xf32>
    %c7_191 = arith.constant 7 : index
    %c0_192 = arith.constant 0 : index
    %438 = vector.load %arg7[%c7_191, %c0_192] : memref<8x8xf32, #tpu.memory_space<vmem>>, vector<1x8xf32>
    tpu.vector_store %arg7[%c7_191, %c0_192], %437 {strides = array<i32>} : memref<8x8xf32, #tpu.memory_space<vmem>>, vector<1x8xf32>,
    %439 = arith.mulf %229, %437 : vector<1x8xf32>
    %cst_193 = arith.constant dense<0.000000e+00> : vector<1xf32>
    %440 = vector.multi_reduction <add>, %439, %cst_193 [1] : vector<1x8xf32> to vector<1xf32>
    %441 = vector.shape_cast %440 : vector<1xf32> to vector<1x1xf32>
    %c7_i32_194 = arith.constant 7 : i32
    %442 = vector.broadcast %c7_i32_194 : i32 to vector<1x8xi32>
    %443 = arith.cmpi eq, %25, %442 : vector<1x8xi32>
    %444 = vector.shape_cast %441 : vector<1x1xf32> to vector<1x1xf32>
    %445 = vector.broadcast %444 : vector<1x1xf32> to vector<1x8xf32>
    %446 = arith.select %443, %445, %432 : vector<1x8xi1>, vector<1x8xf32>
    %c2_i32_195 = arith.constant 2 : i32
    %447 = vector.broadcast %c2_i32_195 : i32 to vector<8x8xi32>
    %448 = arith.cmpi eq, %26, %447 : vector<8x8xi32>
    %cst_196 = arith.constant 0.000000e+00 : f32
    %449 = vector.broadcast %cst_196 : f32 to vector<8x8xf32>
    %450 = arith.select %448, %21, %449 : vector<8x8xi1>, vector<8x8xf32>
    %cst_197 = arith.constant dense<0.000000e+00> : vector<8xf32>
    %451 = vector.multi_reduction <add>, %450, %cst_197 [1] : vector<8x8xf32> to vector<8xf32>
    %452 = vector.shape_cast %451 : vector<8xf32> to vector<8x1xf32>
    %453 = vector.shape_cast %452 : vector<8x1xf32> to vector<8x1xf32>
    %454 = vector.broadcast %453 : vector<8x1xf32> to vector<8x8xf32>
    %c0_198 = arith.constant 0 : index
    %c0_199 = arith.constant 0 : index
    %455 = vector.load %arg5[%c0_198, %c0_199] : memref<8x8xf32, #tpu.memory_space<vmem>>, vector<8x8xf32>
    tpu.vector_store %arg5[%c0_198, %c0_199], %454 {strides = array<i32>} : memref<8x8xf32, #tpu.memory_space<vmem>>, vector<8x8xf32>,
    %c0_200 = arith.constant 0 : index
    %c0_201 = arith.constant 0 : index
    %456 = vector.load %arg5[%c0_200, %c0_201] : memref<8x8xf32, #tpu.memory_space<vmem>>, vector<1x8xf32>
    %c0_i32_202 = arith.constant 0 : i32
    %457 = vector.broadcast %c0_i32_202 : i32 to vector<1x8xi32>
    %458 = arith.cmpi eq, %25, %457 : vector<1x8xi32>
    %cst_203 = arith.constant 0.000000e+00 : f32
    %459 = vector.broadcast %cst_203 : f32 to vector<1x8xf32>
    %460 = arith.select %458, %446, %459 : vector<1x8xi1>, vector<1x8xf32>
    %cst_204 = arith.constant dense<0.000000e+00> : vector<1xf32>
    %461 = vector.multi_reduction <add>, %460, %cst_204 [1] : vector<1x8xf32> to vector<1xf32>
    %462 = vector.shape_cast %461 : vector<1xf32> to vector<1x1xf32>
    %c0_i32_205 = arith.constant 0 : i32
    %463 = vector.broadcast %c0_i32_205 : i32 to vector<1x8xi32>
    %464 = arith.cmpi eq, %25, %463 : vector<1x8xi32>
    %465 = vector.broadcast %462 : vector<1x1xf32> to vector<1x8xf32>
    %466 = arith.addf %456, %465 : vector<1x8xf32>
    %cst_206 = arith.constant 0.000000e+00 : f32
    %467 = vector.broadcast %cst_206 : f32 to vector<1x8xf32>
    %468 = arith.select %464, %466, %467 : vector<1x8xi1>, vector<1x8xf32>
    %c1_207 = arith.constant 1 : index
    %c0_208 = arith.constant 0 : index
    %469 = vector.load %arg5[%c1_207, %c0_208] : memref<8x8xf32, #tpu.memory_space<vmem>>, vector<1x8xf32>
    %c1_209 = arith.constant 1 : index
    %c0_210 = arith.constant 0 : index
    %470 = vector.load %arg7[%c1_209, %c0_210] : memref<8x8xf32, #tpu.memory_space<vmem>>, vector<1x8xf32>
    %471 = arith.minimumf %468, %446 : vector<1x8xf32>
    %472 = arith.minimumf %471, %470 : vector<1x8xf32>
    %473 = arith.addf %469, %472 : vector<1x8xf32>
    %c1_211 = arith.constant 1 : index
    %c0_212 = arith.constant 0 : index
    %474 = vector.load %arg6[%c1_211, %c0_212] : memref<8x8xf32, #tpu.memory_space<vmem>>, vector<1x8xf32>
    tpu.vector_store %arg6[%c1_211, %c0_212], %473 {strides = array<i32>} : memref<8x8xf32, #tpu.memory_space<vmem>>, vector<1x8xf32>,
    %475 = arith.mulf %193, %473 : vector<1x8xf32>
    %cst_213 = arith.constant dense<0.000000e+00> : vector<1xf32>
    %476 = vector.multi_reduction <add>, %475, %cst_213 [1] : vector<1x8xf32> to vector<1xf32>
    %477 = vector.shape_cast %476 : vector<1xf32> to vector<1x1xf32>
    %c1_i32_214 = arith.constant 1 : i32
    %478 = vector.broadcast %c1_i32_214 : i32 to vector<1x8xi32>
    %479 = arith.cmpi eq, %25, %478 : vector<1x8xi32>
    %480 = vector.shape_cast %477 : vector<1x1xf32> to vector<1x1xf32>
    %481 = vector.broadcast %480 : vector<1x1xf32> to vector<1x8xf32>
    %482 = arith.select %479, %481, %468 : vector<1x8xi1>, vector<1x8xf32>
    %c2_215 = arith.constant 2 : index
    %c0_216 = arith.constant 0 : index
    %483 = vector.load %arg5[%c2_215, %c0_216] : memref<8x8xf32, #tpu.memory_space<vmem>>, vector<1x8xf32>
    %c2_217 = arith.constant 2 : index
    %c0_218 = arith.constant 0 : index
    %484 = vector.load %arg7[%c2_217, %c0_218] : memref<8x8xf32, #tpu.memory_space<vmem>>, vector<1x8xf32>
    %485 = arith.minimumf %482, %446 : vector<1x8xf32>
    %486 = arith.minimumf %485, %484 : vector<1x8xf32>
    %487 = arith.addf %483, %486 : vector<1x8xf32>
    %c2_219 = arith.constant 2 : index
    %c0_220 = arith.constant 0 : index
    %488 = vector.load %arg6[%c2_219, %c0_220] : memref<8x8xf32, #tpu.memory_space<vmem>>, vector<1x8xf32>
    tpu.vector_store %arg6[%c2_219, %c0_220], %487 {strides = array<i32>} : memref<8x8xf32, #tpu.memory_space<vmem>>, vector<1x8xf32>,
    %489 = arith.mulf %199, %487 : vector<1x8xf32>
    %cst_221 = arith.constant dense<0.000000e+00> : vector<1xf32>
    %490 = vector.multi_reduction <add>, %489, %cst_221 [1] : vector<1x8xf32> to vector<1xf32>
    %491 = vector.shape_cast %490 : vector<1xf32> to vector<1x1xf32>
    %c2_i32_222 = arith.constant 2 : i32
    %492 = vector.broadcast %c2_i32_222 : i32 to vector<1x8xi32>
    %493 = arith.cmpi eq, %25, %492 : vector<1x8xi32>
    %494 = vector.shape_cast %491 : vector<1x1xf32> to vector<1x1xf32>
    %495 = vector.broadcast %494 : vector<1x1xf32> to vector<1x8xf32>
    %496 = arith.select %493, %495, %482 : vector<1x8xi1>, vector<1x8xf32>
    %c3_223 = arith.constant 3 : index
    %c0_224 = arith.constant 0 : index
    %497 = vector.load %arg5[%c3_223, %c0_224] : memref<8x8xf32, #tpu.memory_space<vmem>>, vector<1x8xf32>
    %c3_225 = arith.constant 3 : index
    %c0_226 = arith.constant 0 : index
    %498 = vector.load %arg7[%c3_225, %c0_226] : memref<8x8xf32, #tpu.memory_space<vmem>>, vector<1x8xf32>
    %499 = arith.minimumf %496, %446 : vector<1x8xf32>
    %500 = arith.minimumf %499, %498 : vector<1x8xf32>
    %501 = arith.addf %497, %500 : vector<1x8xf32>
    %c3_227 = arith.constant 3 : index
    %c0_228 = arith.constant 0 : index
    %502 = vector.load %arg6[%c3_227, %c0_228] : memref<8x8xf32, #tpu.memory_space<vmem>>, vector<1x8xf32>
    tpu.vector_store %arg6[%c3_227, %c0_228], %501 {strides = array<i32>} : memref<8x8xf32, #tpu.memory_space<vmem>>, vector<1x8xf32>,
    %503 = arith.mulf %205, %501 : vector<1x8xf32>
    %cst_229 = arith.constant dense<0.000000e+00> : vector<1xf32>
    %504 = vector.multi_reduction <add>, %503, %cst_229 [1] : vector<1x8xf32> to vector<1xf32>
    %505 = vector.shape_cast %504 : vector<1xf32> to vector<1x1xf32>
    %c3_i32_230 = arith.constant 3 : i32
    %506 = vector.broadcast %c3_i32_230 : i32 to vector<1x8xi32>
    %507 = arith.cmpi eq, %25, %506 : vector<1x8xi32>
    %508 = vector.shape_cast %505 : vector<1x1xf32> to vector<1x1xf32>
    %509 = vector.broadcast %508 : vector<1x1xf32> to vector<1x8xf32>
    %510 = arith.select %507, %509, %496 : vector<1x8xi1>, vector<1x8xf32>
    %c4_231 = arith.constant 4 : index
    %c0_232 = arith.constant 0 : index
    %511 = vector.load %arg5[%c4_231, %c0_232] : memref<8x8xf32, #tpu.memory_space<vmem>>, vector<1x8xf32>
    %c4_233 = arith.constant 4 : index
    %c0_234 = arith.constant 0 : index
    %512 = vector.load %arg7[%c4_233, %c0_234] : memref<8x8xf32, #tpu.memory_space<vmem>>, vector<1x8xf32>
    %513 = arith.minimumf %510, %446 : vector<1x8xf32>
    %514 = arith.minimumf %513, %512 : vector<1x8xf32>
    %515 = arith.addf %511, %514 : vector<1x8xf32>
    %c4_235 = arith.constant 4 : index
    %c0_236 = arith.constant 0 : index
    %516 = vector.load %arg6[%c4_235, %c0_236] : memref<8x8xf32, #tpu.memory_space<vmem>>, vector<1x8xf32>
    tpu.vector_store %arg6[%c4_235, %c0_236], %515 {strides = array<i32>} : memref<8x8xf32, #tpu.memory_space<vmem>>, vector<1x8xf32>,
    %517 = arith.mulf %211, %515 : vector<1x8xf32>
    %cst_237 = arith.constant dense<0.000000e+00> : vector<1xf32>
    %518 = vector.multi_reduction <add>, %517, %cst_237 [1] : vector<1x8xf32> to vector<1xf32>
    %519 = vector.shape_cast %518 : vector<1xf32> to vector<1x1xf32>
    %c4_i32_238 = arith.constant 4 : i32
    %520 = vector.broadcast %c4_i32_238 : i32 to vector<1x8xi32>
    %521 = arith.cmpi eq, %25, %520 : vector<1x8xi32>
    %522 = vector.shape_cast %519 : vector<1x1xf32> to vector<1x1xf32>
    %523 = vector.broadcast %522 : vector<1x1xf32> to vector<1x8xf32>
    %524 = arith.select %521, %523, %510 : vector<1x8xi1>, vector<1x8xf32>
    %c5_239 = arith.constant 5 : index
    %c0_240 = arith.constant 0 : index
    %525 = vector.load %arg5[%c5_239, %c0_240] : memref<8x8xf32, #tpu.memory_space<vmem>>, vector<1x8xf32>
    %c5_241 = arith.constant 5 : index
    %c0_242 = arith.constant 0 : index
    %526 = vector.load %arg7[%c5_241, %c0_242] : memref<8x8xf32, #tpu.memory_space<vmem>>, vector<1x8xf32>
    %527 = arith.minimumf %524, %446 : vector<1x8xf32>
    %528 = arith.minimumf %527, %526 : vector<1x8xf32>
    %529 = arith.addf %525, %528 : vector<1x8xf32>
    %c5_243 = arith.constant 5 : index
    %c0_244 = arith.constant 0 : index
    %530 = vector.load %arg6[%c5_243, %c0_244] : memref<8x8xf32, #tpu.memory_space<vmem>>, vector<1x8xf32>
    tpu.vector_store %arg6[%c5_243, %c0_244], %529 {strides = array<i32>} : memref<8x8xf32, #tpu.memory_space<vmem>>, vector<1x8xf32>,
    %531 = arith.mulf %217, %529 : vector<1x8xf32>
    %cst_245 = arith.constant dense<0.000000e+00> : vector<1xf32>
    %532 = vector.multi_reduction <add>, %531, %cst_245 [1] : vector<1x8xf32> to vector<1xf32>
    %533 = vector.shape_cast %532 : vector<1xf32> to vector<1x1xf32>
    %c5_i32_246 = arith.constant 5 : i32
    %534 = vector.broadcast %c5_i32_246 : i32 to vector<1x8xi32>
    %535 = arith.cmpi eq, %25, %534 : vector<1x8xi32>
    %536 = vector.shape_cast %533 : vector<1x1xf32> to vector<1x1xf32>
    %537 = vector.broadcast %536 : vector<1x1xf32> to vector<1x8xf32>
    %538 = arith.select %535, %537, %524 : vector<1x8xi1>, vector<1x8xf32>
    %c6_247 = arith.constant 6 : index
    %c0_248 = arith.constant 0 : index
    %539 = vector.load %arg5[%c6_247, %c0_248] : memref<8x8xf32, #tpu.memory_space<vmem>>, vector<1x8xf32>
    %c6_249 = arith.constant 6 : index
    %c0_250 = arith.constant 0 : index
    %540 = vector.load %arg7[%c6_249, %c0_250] : memref<8x8xf32, #tpu.memory_space<vmem>>, vector<1x8xf32>
    %541 = arith.minimumf %538, %446 : vector<1x8xf32>
    %542 = arith.minimumf %541, %540 : vector<1x8xf32>
    %543 = arith.addf %539, %542 : vector<1x8xf32>
    %c6_251 = arith.constant 6 : index
    %c0_252 = arith.constant 0 : index
    %544 = vector.load %arg6[%c6_251, %c0_252] : memref<8x8xf32, #tpu.memory_space<vmem>>, vector<1x8xf32>
    tpu.vector_store %arg6[%c6_251, %c0_252], %543 {strides = array<i32>} : memref<8x8xf32, #tpu.memory_space<vmem>>, vector<1x8xf32>,
    %545 = arith.mulf %223, %543 : vector<1x8xf32>
    %cst_253 = arith.constant dense<0.000000e+00> : vector<1xf32>
    %546 = vector.multi_reduction <add>, %545, %cst_253 [1] : vector<1x8xf32> to vector<1xf32>
    %547 = vector.shape_cast %546 : vector<1xf32> to vector<1x1xf32>
    %c6_i32_254 = arith.constant 6 : i32
    %548 = vector.broadcast %c6_i32_254 : i32 to vector<1x8xi32>
    %549 = arith.cmpi eq, %25, %548 : vector<1x8xi32>
    %550 = vector.shape_cast %547 : vector<1x1xf32> to vector<1x1xf32>
    %551 = vector.broadcast %550 : vector<1x1xf32> to vector<1x8xf32>
    %552 = arith.select %549, %551, %538 : vector<1x8xi1>, vector<1x8xf32>
    %c7_255 = arith.constant 7 : index
    %c0_256 = arith.constant 0 : index
    %553 = vector.load %arg5[%c7_255, %c0_256] : memref<8x8xf32, #tpu.memory_space<vmem>>, vector<1x8xf32>
    %c7_257 = arith.constant 7 : index
    %c0_258 = arith.constant 0 : index
    %554 = vector.load %arg7[%c7_257, %c0_258] : memref<8x8xf32, #tpu.memory_space<vmem>>, vector<1x8xf32>
    %555 = arith.minimumf %552, %446 : vector<1x8xf32>
    %556 = arith.minimumf %555, %554 : vector<1x8xf32>
    %557 = arith.addf %553, %556 : vector<1x8xf32>
    %c7_259 = arith.constant 7 : index
    %c0_260 = arith.constant 0 : index
    %558 = vector.load %arg6[%c7_259, %c0_260] : memref<8x8xf32, #tpu.memory_space<vmem>>, vector<1x8xf32>
    tpu.vector_store %arg6[%c7_259, %c0_260], %557 {strides = array<i32>} : memref<8x8xf32, #tpu.memory_space<vmem>>, vector<1x8xf32>,
    %559 = arith.mulf %229, %557 : vector<1x8xf32>
    %cst_261 = arith.constant dense<0.000000e+00> : vector<1xf32>
    %560 = vector.multi_reduction <add>, %559, %cst_261 [1] : vector<1x8xf32> to vector<1xf32>
    %561 = vector.shape_cast %560 : vector<1xf32> to vector<1x1xf32>
    %c7_i32_262 = arith.constant 7 : i32
    %562 = vector.broadcast %c7_i32_262 : i32 to vector<1x8xi32>
    %563 = arith.cmpi eq, %25, %562 : vector<1x8xi32>
    %564 = vector.shape_cast %561 : vector<1x1xf32> to vector<1x1xf32>
    %565 = vector.broadcast %564 : vector<1x1xf32> to vector<1x8xf32>
    %566 = arith.select %563, %565, %552 : vector<1x8xi1>, vector<1x8xf32>
    %c3_i32_263 = arith.constant 3 : i32
    %567 = vector.broadcast %c3_i32_263 : i32 to vector<8x8xi32>
    %568 = arith.cmpi eq, %26, %567 : vector<8x8xi32>
    %cst_264 = arith.constant 0.000000e+00 : f32
    %569 = vector.broadcast %cst_264 : f32 to vector<8x8xf32>
    %570 = arith.select %568, %21, %569 : vector<8x8xi1>, vector<8x8xf32>
    %cst_265 = arith.constant dense<0.000000e+00> : vector<8xf32>
    %571 = vector.multi_reduction <add>, %570, %cst_265 [1] : vector<8x8xf32> to vector<8xf32>
    %572 = vector.shape_cast %571 : vector<8xf32> to vector<8x1xf32>
    %573 = vector.shape_cast %572 : vector<8x1xf32> to vector<8x1xf32>
    %574 = vector.broadcast %573 : vector<8x1xf32> to vector<8x8xf32>
    %c0_266 = arith.constant 0 : index
    %c0_267 = arith.constant 0 : index
    %575 = vector.load %arg5[%c0_266, %c0_267] : memref<8x8xf32, #tpu.memory_space<vmem>>, vector<8x8xf32>
    tpu.vector_store %arg5[%c0_266, %c0_267], %574 {strides = array<i32>} : memref<8x8xf32, #tpu.memory_space<vmem>>, vector<8x8xf32>,
    %c0_268 = arith.constant 0 : index
    %c0_269 = arith.constant 0 : index
    %576 = vector.load %arg5[%c0_268, %c0_269] : memref<8x8xf32, #tpu.memory_space<vmem>>, vector<1x8xf32>
    %c0_i32_270 = arith.constant 0 : i32
    %577 = vector.broadcast %c0_i32_270 : i32 to vector<1x8xi32>
    %578 = arith.cmpi eq, %25, %577 : vector<1x8xi32>
    %cst_271 = arith.constant 0.000000e+00 : f32
    %579 = vector.broadcast %cst_271 : f32 to vector<1x8xf32>
    %580 = arith.select %578, %566, %579 : vector<1x8xi1>, vector<1x8xf32>
    %cst_272 = arith.constant dense<0.000000e+00> : vector<1xf32>
    %581 = vector.multi_reduction <add>, %580, %cst_272 [1] : vector<1x8xf32> to vector<1xf32>
    %582 = vector.shape_cast %581 : vector<1xf32> to vector<1x1xf32>
    %c0_i32_273 = arith.constant 0 : i32
    %583 = vector.broadcast %c0_i32_273 : i32 to vector<1x8xi32>
    %584 = arith.cmpi eq, %25, %583 : vector<1x8xi32>
    %585 = vector.broadcast %582 : vector<1x1xf32> to vector<1x8xf32>
    %586 = arith.addf %576, %585 : vector<1x8xf32>
    %cst_274 = arith.constant 0.000000e+00 : f32
    %587 = vector.broadcast %cst_274 : f32 to vector<1x8xf32>
    %588 = arith.select %584, %586, %587 : vector<1x8xi1>, vector<1x8xf32>
    %c1_275 = arith.constant 1 : index
    %c0_276 = arith.constant 0 : index
    %589 = vector.load %arg5[%c1_275, %c0_276] : memref<8x8xf32, #tpu.memory_space<vmem>>, vector<1x8xf32>
    %c1_277 = arith.constant 1 : index
    %c0_278 = arith.constant 0 : index
    %590 = vector.load %arg6[%c1_277, %c0_278] : memref<8x8xf32, #tpu.memory_space<vmem>>, vector<1x8xf32>
    %591 = arith.minimumf %588, %566 : vector<1x8xf32>
    %592 = arith.minimumf %591, %590 : vector<1x8xf32>
    %593 = arith.addf %589, %592 : vector<1x8xf32>
    %c1_279 = arith.constant 1 : index
    %c0_280 = arith.constant 0 : index
    %594 = vector.load %arg7[%c1_279, %c0_280] : memref<8x8xf32, #tpu.memory_space<vmem>>, vector<1x8xf32>
    tpu.vector_store %arg7[%c1_279, %c0_280], %593 {strides = array<i32>} : memref<8x8xf32, #tpu.memory_space<vmem>>, vector<1x8xf32>,
    %595 = arith.mulf %193, %593 : vector<1x8xf32>
    %cst_281 = arith.constant dense<0.000000e+00> : vector<1xf32>
    %596 = vector.multi_reduction <add>, %595, %cst_281 [1] : vector<1x8xf32> to vector<1xf32>
    %597 = vector.shape_cast %596 : vector<1xf32> to vector<1x1xf32>
    %c1_i32_282 = arith.constant 1 : i32
    %598 = vector.broadcast %c1_i32_282 : i32 to vector<1x8xi32>
    %599 = arith.cmpi eq, %25, %598 : vector<1x8xi32>
    %600 = vector.shape_cast %597 : vector<1x1xf32> to vector<1x1xf32>
    %601 = vector.broadcast %600 : vector<1x1xf32> to vector<1x8xf32>
    %602 = arith.select %599, %601, %588 : vector<1x8xi1>, vector<1x8xf32>
    %c2_283 = arith.constant 2 : index
    %c0_284 = arith.constant 0 : index
    %603 = vector.load %arg5[%c2_283, %c0_284] : memref<8x8xf32, #tpu.memory_space<vmem>>, vector<1x8xf32>
    %c2_285 = arith.constant 2 : index
    %c0_286 = arith.constant 0 : index
    %604 = vector.load %arg6[%c2_285, %c0_286] : memref<8x8xf32, #tpu.memory_space<vmem>>, vector<1x8xf32>
    %605 = arith.minimumf %602, %566 : vector<1x8xf32>
    %606 = arith.minimumf %605, %604 : vector<1x8xf32>
    %607 = arith.addf %603, %606 : vector<1x8xf32>
    %c2_287 = arith.constant 2 : index
    %c0_288 = arith.constant 0 : index
    %608 = vector.load %arg7[%c2_287, %c0_288] : memref<8x8xf32, #tpu.memory_space<vmem>>, vector<1x8xf32>
    tpu.vector_store %arg7[%c2_287, %c0_288], %607 {strides = array<i32>} : memref<8x8xf32, #tpu.memory_space<vmem>>, vector<1x8xf32>,
    %609 = arith.mulf %199, %607 : vector<1x8xf32>
    %cst_289 = arith.constant dense<0.000000e+00> : vector<1xf32>
    %610 = vector.multi_reduction <add>, %609, %cst_289 [1] : vector<1x8xf32> to vector<1xf32>
    %611 = vector.shape_cast %610 : vector<1xf32> to vector<1x1xf32>
    %c2_i32_290 = arith.constant 2 : i32
    %612 = vector.broadcast %c2_i32_290 : i32 to vector<1x8xi32>
    %613 = arith.cmpi eq, %25, %612 : vector<1x8xi32>
    %614 = vector.shape_cast %611 : vector<1x1xf32> to vector<1x1xf32>
    %615 = vector.broadcast %614 : vector<1x1xf32> to vector<1x8xf32>
    %616 = arith.select %613, %615, %602 : vector<1x8xi1>, vector<1x8xf32>
    %c3_291 = arith.constant 3 : index
    %c0_292 = arith.constant 0 : index
    %617 = vector.load %arg5[%c3_291, %c0_292] : memref<8x8xf32, #tpu.memory_space<vmem>>, vector<1x8xf32>
    %c3_293 = arith.constant 3 : index
    %c0_294 = arith.constant 0 : index
    %618 = vector.load %arg6[%c3_293, %c0_294] : memref<8x8xf32, #tpu.memory_space<vmem>>, vector<1x8xf32>
    %619 = arith.minimumf %616, %566 : vector<1x8xf32>
    %620 = arith.minimumf %619, %618 : vector<1x8xf32>
    %621 = arith.addf %617, %620 : vector<1x8xf32>
    %c3_295 = arith.constant 3 : index
    %c0_296 = arith.constant 0 : index
    %622 = vector.load %arg7[%c3_295, %c0_296] : memref<8x8xf32, #tpu.memory_space<vmem>>, vector<1x8xf32>
    tpu.vector_store %arg7[%c3_295, %c0_296], %621 {strides = array<i32>} : memref<8x8xf32, #tpu.memory_space<vmem>>, vector<1x8xf32>,
    %623 = arith.mulf %205, %621 : vector<1x8xf32>
    %cst_297 = arith.constant dense<0.000000e+00> : vector<1xf32>
    %624 = vector.multi_reduction <add>, %623, %cst_297 [1] : vector<1x8xf32> to vector<1xf32>
    %625 = vector.shape_cast %624 : vector<1xf32> to vector<1x1xf32>
    %c3_i32_298 = arith.constant 3 : i32
    %626 = vector.broadcast %c3_i32_298 : i32 to vector<1x8xi32>
    %627 = arith.cmpi eq, %25, %626 : vector<1x8xi32>
    %628 = vector.shape_cast %625 : vector<1x1xf32> to vector<1x1xf32>
    %629 = vector.broadcast %628 : vector<1x1xf32> to vector<1x8xf32>
    %630 = arith.select %627, %629, %616 : vector<1x8xi1>, vector<1x8xf32>
    %c4_299 = arith.constant 4 : index
    %c0_300 = arith.constant 0 : index
    %631 = vector.load %arg5[%c4_299, %c0_300] : memref<8x8xf32, #tpu.memory_space<vmem>>, vector<1x8xf32>
    %c4_301 = arith.constant 4 : index
    %c0_302 = arith.constant 0 : index
    %632 = vector.load %arg6[%c4_301, %c0_302] : memref<8x8xf32, #tpu.memory_space<vmem>>, vector<1x8xf32>
    %633 = arith.minimumf %630, %566 : vector<1x8xf32>
    %634 = arith.minimumf %633, %632 : vector<1x8xf32>
    %635 = arith.addf %631, %634 : vector<1x8xf32>
    %c4_303 = arith.constant 4 : index
    %c0_304 = arith.constant 0 : index
    %636 = vector.load %arg7[%c4_303, %c0_304] : memref<8x8xf32, #tpu.memory_space<vmem>>, vector<1x8xf32>
    tpu.vector_store %arg7[%c4_303, %c0_304], %635 {strides = array<i32>} : memref<8x8xf32, #tpu.memory_space<vmem>>, vector<1x8xf32>,
    %637 = arith.mulf %211, %635 : vector<1x8xf32>
    %cst_305 = arith.constant dense<0.000000e+00> : vector<1xf32>
    %638 = vector.multi_reduction <add>, %637, %cst_305 [1] : vector<1x8xf32> to vector<1xf32>
    %639 = vector.shape_cast %638 : vector<1xf32> to vector<1x1xf32>
    %c4_i32_306 = arith.constant 4 : i32
    %640 = vector.broadcast %c4_i32_306 : i32 to vector<1x8xi32>
    %641 = arith.cmpi eq, %25, %640 : vector<1x8xi32>
    %642 = vector.shape_cast %639 : vector<1x1xf32> to vector<1x1xf32>
    %643 = vector.broadcast %642 : vector<1x1xf32> to vector<1x8xf32>
    %644 = arith.select %641, %643, %630 : vector<1x8xi1>, vector<1x8xf32>
    %c5_307 = arith.constant 5 : index
    %c0_308 = arith.constant 0 : index
    %645 = vector.load %arg5[%c5_307, %c0_308] : memref<8x8xf32, #tpu.memory_space<vmem>>, vector<1x8xf32>
    %c5_309 = arith.constant 5 : index
    %c0_310 = arith.constant 0 : index
    %646 = vector.load %arg6[%c5_309, %c0_310] : memref<8x8xf32, #tpu.memory_space<vmem>>, vector<1x8xf32>
    %647 = arith.minimumf %644, %566 : vector<1x8xf32>
    %648 = arith.minimumf %647, %646 : vector<1x8xf32>
    %649 = arith.addf %645, %648 : vector<1x8xf32>
    %c5_311 = arith.constant 5 : index
    %c0_312 = arith.constant 0 : index
    %650 = vector.load %arg7[%c5_311, %c0_312] : memref<8x8xf32, #tpu.memory_space<vmem>>, vector<1x8xf32>
    tpu.vector_store %arg7[%c5_311, %c0_312], %649 {strides = array<i32>} : memref<8x8xf32, #tpu.memory_space<vmem>>, vector<1x8xf32>,
    %651 = arith.mulf %217, %649 : vector<1x8xf32>
    %cst_313 = arith.constant dense<0.000000e+00> : vector<1xf32>
    %652 = vector.multi_reduction <add>, %651, %cst_313 [1] : vector<1x8xf32> to vector<1xf32>
    %653 = vector.shape_cast %652 : vector<1xf32> to vector<1x1xf32>
    %c5_i32_314 = arith.constant 5 : i32
    %654 = vector.broadcast %c5_i32_314 : i32 to vector<1x8xi32>
    %655 = arith.cmpi eq, %25, %654 : vector<1x8xi32>
    %656 = vector.shape_cast %653 : vector<1x1xf32> to vector<1x1xf32>
    %657 = vector.broadcast %656 : vector<1x1xf32> to vector<1x8xf32>
    %658 = arith.select %655, %657, %644 : vector<1x8xi1>, vector<1x8xf32>
    %c6_315 = arith.constant 6 : index
    %c0_316 = arith.constant 0 : index
    %659 = vector.load %arg5[%c6_315, %c0_316] : memref<8x8xf32, #tpu.memory_space<vmem>>, vector<1x8xf32>
    %c6_317 = arith.constant 6 : index
    %c0_318 = arith.constant 0 : index
    %660 = vector.load %arg6[%c6_317, %c0_318] : memref<8x8xf32, #tpu.memory_space<vmem>>, vector<1x8xf32>
    %661 = arith.minimumf %658, %566 : vector<1x8xf32>
    %662 = arith.minimumf %661, %660 : vector<1x8xf32>
    %663 = arith.addf %659, %662 : vector<1x8xf32>
    %c6_319 = arith.constant 6 : index
    %c0_320 = arith.constant 0 : index
    %664 = vector.load %arg7[%c6_319, %c0_320] : memref<8x8xf32, #tpu.memory_space<vmem>>, vector<1x8xf32>
    tpu.vector_store %arg7[%c6_319, %c0_320], %663 {strides = array<i32>} : memref<8x8xf32, #tpu.memory_space<vmem>>, vector<1x8xf32>,
    %665 = arith.mulf %223, %663 : vector<1x8xf32>
    %cst_321 = arith.constant dense<0.000000e+00> : vector<1xf32>
    %666 = vector.multi_reduction <add>, %665, %cst_321 [1] : vector<1x8xf32> to vector<1xf32>
    %667 = vector.shape_cast %666 : vector<1xf32> to vector<1x1xf32>
    %c6_i32_322 = arith.constant 6 : i32
    %668 = vector.broadcast %c6_i32_322 : i32 to vector<1x8xi32>
    %669 = arith.cmpi eq, %25, %668 : vector<1x8xi32>
    %670 = vector.shape_cast %667 : vector<1x1xf32> to vector<1x1xf32>
    %671 = vector.broadcast %670 : vector<1x1xf32> to vector<1x8xf32>
    %672 = arith.select %669, %671, %658 : vector<1x8xi1>, vector<1x8xf32>
    %c7_323 = arith.constant 7 : index
    %c0_324 = arith.constant 0 : index
    %673 = vector.load %arg5[%c7_323, %c0_324] : memref<8x8xf32, #tpu.memory_space<vmem>>, vector<1x8xf32>
    %c7_325 = arith.constant 7 : index
    %c0_326 = arith.constant 0 : index
    %674 = vector.load %arg6[%c7_325, %c0_326] : memref<8x8xf32, #tpu.memory_space<vmem>>, vector<1x8xf32>
    %675 = arith.minimumf %672, %566 : vector<1x8xf32>
    %676 = arith.minimumf %675, %674 : vector<1x8xf32>
    %677 = arith.addf %673, %676 : vector<1x8xf32>
    %c7_327 = arith.constant 7 : index
    %c0_328 = arith.constant 0 : index
    %678 = vector.load %arg7[%c7_327, %c0_328] : memref<8x8xf32, #tpu.memory_space<vmem>>, vector<1x8xf32>
    tpu.vector_store %arg7[%c7_327, %c0_328], %677 {strides = array<i32>} : memref<8x8xf32, #tpu.memory_space<vmem>>, vector<1x8xf32>,
    %679 = arith.mulf %229, %677 : vector<1x8xf32>
    %cst_329 = arith.constant dense<0.000000e+00> : vector<1xf32>
    %680 = vector.multi_reduction <add>, %679, %cst_329 [1] : vector<1x8xf32> to vector<1xf32>
    %681 = vector.shape_cast %680 : vector<1xf32> to vector<1x1xf32>
    %c7_i32_330 = arith.constant 7 : i32
    %682 = vector.broadcast %c7_i32_330 : i32 to vector<1x8xi32>
    %683 = arith.cmpi eq, %25, %682 : vector<1x8xi32>
    %684 = vector.shape_cast %681 : vector<1x1xf32> to vector<1x1xf32>
    %685 = vector.broadcast %684 : vector<1x1xf32> to vector<1x8xf32>
    %686 = arith.select %683, %685, %672 : vector<1x8xi1>, vector<1x8xf32>
    %c4_i32_331 = arith.constant 4 : i32
    %687 = vector.broadcast %c4_i32_331 : i32 to vector<8x8xi32>
    %688 = arith.cmpi eq, %26, %687 : vector<8x8xi32>
    %cst_332 = arith.constant 0.000000e+00 : f32
    %689 = vector.broadcast %cst_332 : f32 to vector<8x8xf32>
    %690 = arith.select %688, %21, %689 : vector<8x8xi1>, vector<8x8xf32>
    %cst_333 = arith.constant dense<0.000000e+00> : vector<8xf32>
    %691 = vector.multi_reduction <add>, %690, %cst_333 [1] : vector<8x8xf32> to vector<8xf32>
    %692 = vector.shape_cast %691 : vector<8xf32> to vector<8x1xf32>
    %693 = vector.shape_cast %692 : vector<8x1xf32> to vector<8x1xf32>
    %694 = vector.broadcast %693 : vector<8x1xf32> to vector<8x8xf32>
    %c0_334 = arith.constant 0 : index
    %c0_335 = arith.constant 0 : index
    %695 = vector.load %arg5[%c0_334, %c0_335] : memref<8x8xf32, #tpu.memory_space<vmem>>, vector<8x8xf32>
    tpu.vector_store %arg5[%c0_334, %c0_335], %694 {strides = array<i32>} : memref<8x8xf32, #tpu.memory_space<vmem>>, vector<8x8xf32>,
    %c0_336 = arith.constant 0 : index
    %c0_337 = arith.constant 0 : index
    %696 = vector.load %arg5[%c0_336, %c0_337] : memref<8x8xf32, #tpu.memory_space<vmem>>, vector<1x8xf32>
    %c0_i32_338 = arith.constant 0 : i32
    %697 = vector.broadcast %c0_i32_338 : i32 to vector<1x8xi32>
    %698 = arith.cmpi eq, %25, %697 : vector<1x8xi32>
    %cst_339 = arith.constant 0.000000e+00 : f32
    %699 = vector.broadcast %cst_339 : f32 to vector<1x8xf32>
    %700 = arith.select %698, %686, %699 : vector<1x8xi1>, vector<1x8xf32>
    %cst_340 = arith.constant dense<0.000000e+00> : vector<1xf32>
    %701 = vector.multi_reduction <add>, %700, %cst_340 [1] : vector<1x8xf32> to vector<1xf32>
    %702 = vector.shape_cast %701 : vector<1xf32> to vector<1x1xf32>
    %c0_i32_341 = arith.constant 0 : i32
    %703 = vector.broadcast %c0_i32_341 : i32 to vector<1x8xi32>
    %704 = arith.cmpi eq, %25, %703 : vector<1x8xi32>
    %705 = vector.broadcast %702 : vector<1x1xf32> to vector<1x8xf32>
    %706 = arith.addf %696, %705 : vector<1x8xf32>
    %cst_342 = arith.constant 0.000000e+00 : f32
    %707 = vector.broadcast %cst_342 : f32 to vector<1x8xf32>
    %708 = arith.select %704, %706, %707 : vector<1x8xi1>, vector<1x8xf32>
    %c1_343 = arith.constant 1 : index
    %c0_344 = arith.constant 0 : index
    %709 = vector.load %arg5[%c1_343, %c0_344] : memref<8x8xf32, #tpu.memory_space<vmem>>, vector<1x8xf32>
    %c1_345 = arith.constant 1 : index
    %c0_346 = arith.constant 0 : index
    %710 = vector.load %arg7[%c1_345, %c0_346] : memref<8x8xf32, #tpu.memory_space<vmem>>, vector<1x8xf32>
    %711 = arith.minimumf %708, %686 : vector<1x8xf32>
    %712 = arith.minimumf %711, %710 : vector<1x8xf32>
    %713 = arith.addf %709, %712 : vector<1x8xf32>
    %c1_347 = arith.constant 1 : index
    %c0_348 = arith.constant 0 : index
    %714 = vector.load %arg6[%c1_347, %c0_348] : memref<8x8xf32, #tpu.memory_space<vmem>>, vector<1x8xf32>
    tpu.vector_store %arg6[%c1_347, %c0_348], %713 {strides = array<i32>} : memref<8x8xf32, #tpu.memory_space<vmem>>, vector<1x8xf32>,
    %715 = arith.mulf %193, %713 : vector<1x8xf32>
    %cst_349 = arith.constant dense<0.000000e+00> : vector<1xf32>
    %716 = vector.multi_reduction <add>, %715, %cst_349 [1] : vector<1x8xf32> to vector<1xf32>
    %717 = vector.shape_cast %716 : vector<1xf32> to vector<1x1xf32>
    %c1_i32_350 = arith.constant 1 : i32
    %718 = vector.broadcast %c1_i32_350 : i32 to vector<1x8xi32>
    %719 = arith.cmpi eq, %25, %718 : vector<1x8xi32>
    %720 = vector.shape_cast %717 : vector<1x1xf32> to vector<1x1xf32>
    %721 = vector.broadcast %720 : vector<1x1xf32> to vector<1x8xf32>
    %722 = arith.select %719, %721, %708 : vector<1x8xi1>, vector<1x8xf32>
    %c2_351 = arith.constant 2 : index
    %c0_352 = arith.constant 0 : index
    %723 = vector.load %arg5[%c2_351, %c0_352] : memref<8x8xf32, #tpu.memory_space<vmem>>, vector<1x8xf32>
    %c2_353 = arith.constant 2 : index
    %c0_354 = arith.constant 0 : index
    %724 = vector.load %arg7[%c2_353, %c0_354] : memref<8x8xf32, #tpu.memory_space<vmem>>, vector<1x8xf32>
    %725 = arith.minimumf %722, %686 : vector<1x8xf32>
    %726 = arith.minimumf %725, %724 : vector<1x8xf32>
    %727 = arith.addf %723, %726 : vector<1x8xf32>
    %c2_355 = arith.constant 2 : index
    %c0_356 = arith.constant 0 : index
    %728 = vector.load %arg6[%c2_355, %c0_356] : memref<8x8xf32, #tpu.memory_space<vmem>>, vector<1x8xf32>
    tpu.vector_store %arg6[%c2_355, %c0_356], %727 {strides = array<i32>} : memref<8x8xf32, #tpu.memory_space<vmem>>, vector<1x8xf32>,
    %729 = arith.mulf %199, %727 : vector<1x8xf32>
    %cst_357 = arith.constant dense<0.000000e+00> : vector<1xf32>
    %730 = vector.multi_reduction <add>, %729, %cst_357 [1] : vector<1x8xf32> to vector<1xf32>
    %731 = vector.shape_cast %730 : vector<1xf32> to vector<1x1xf32>
    %c2_i32_358 = arith.constant 2 : i32
    %732 = vector.broadcast %c2_i32_358 : i32 to vector<1x8xi32>
    %733 = arith.cmpi eq, %25, %732 : vector<1x8xi32>
    %734 = vector.shape_cast %731 : vector<1x1xf32> to vector<1x1xf32>
    %735 = vector.broadcast %734 : vector<1x1xf32> to vector<1x8xf32>
    %736 = arith.select %733, %735, %722 : vector<1x8xi1>, vector<1x8xf32>
    %c3_359 = arith.constant 3 : index
    %c0_360 = arith.constant 0 : index
    %737 = vector.load %arg5[%c3_359, %c0_360] : memref<8x8xf32, #tpu.memory_space<vmem>>, vector<1x8xf32>
    %c3_361 = arith.constant 3 : index
    %c0_362 = arith.constant 0 : index
    %738 = vector.load %arg7[%c3_361, %c0_362] : memref<8x8xf32, #tpu.memory_space<vmem>>, vector<1x8xf32>
    %739 = arith.minimumf %736, %686 : vector<1x8xf32>
    %740 = arith.minimumf %739, %738 : vector<1x8xf32>
    %741 = arith.addf %737, %740 : vector<1x8xf32>
    %c3_363 = arith.constant 3 : index
    %c0_364 = arith.constant 0 : index
    %742 = vector.load %arg6[%c3_363, %c0_364] : memref<8x8xf32, #tpu.memory_space<vmem>>, vector<1x8xf32>
    tpu.vector_store %arg6[%c3_363, %c0_364], %741 {strides = array<i32>} : memref<8x8xf32, #tpu.memory_space<vmem>>, vector<1x8xf32>,
    %743 = arith.mulf %205, %741 : vector<1x8xf32>
    %cst_365 = arith.constant dense<0.000000e+00> : vector<1xf32>
    %744 = vector.multi_reduction <add>, %743, %cst_365 [1] : vector<1x8xf32> to vector<1xf32>
    %745 = vector.shape_cast %744 : vector<1xf32> to vector<1x1xf32>
    %c3_i32_366 = arith.constant 3 : i32
    %746 = vector.broadcast %c3_i32_366 : i32 to vector<1x8xi32>
    %747 = arith.cmpi eq, %25, %746 : vector<1x8xi32>
    %748 = vector.shape_cast %745 : vector<1x1xf32> to vector<1x1xf32>
    %749 = vector.broadcast %748 : vector<1x1xf32> to vector<1x8xf32>
    %750 = arith.select %747, %749, %736 : vector<1x8xi1>, vector<1x8xf32>
    %c4_367 = arith.constant 4 : index
    %c0_368 = arith.constant 0 : index
    %751 = vector.load %arg5[%c4_367, %c0_368] : memref<8x8xf32, #tpu.memory_space<vmem>>, vector<1x8xf32>
    %c4_369 = arith.constant 4 : index
    %c0_370 = arith.constant 0 : index
    %752 = vector.load %arg7[%c4_369, %c0_370] : memref<8x8xf32, #tpu.memory_space<vmem>>, vector<1x8xf32>
    %753 = arith.minimumf %750, %686 : vector<1x8xf32>
    %754 = arith.minimumf %753, %752 : vector<1x8xf32>
    %755 = arith.addf %751, %754 : vector<1x8xf32>
    %c4_371 = arith.constant 4 : index
    %c0_372 = arith.constant 0 : index
    %756 = vector.load %arg6[%c4_371, %c0_372] : memref<8x8xf32, #tpu.memory_space<vmem>>, vector<1x8xf32>
    tpu.vector_store %arg6[%c4_371, %c0_372], %755 {strides = array<i32>} : memref<8x8xf32, #tpu.memory_space<vmem>>, vector<1x8xf32>,
    %757 = arith.mulf %211, %755 : vector<1x8xf32>
    %cst_373 = arith.constant dense<0.000000e+00> : vector<1xf32>
    %758 = vector.multi_reduction <add>, %757, %cst_373 [1] : vector<1x8xf32> to vector<1xf32>
    %759 = vector.shape_cast %758 : vector<1xf32> to vector<1x1xf32>
    %c4_i32_374 = arith.constant 4 : i32
    %760 = vector.broadcast %c4_i32_374 : i32 to vector<1x8xi32>
    %761 = arith.cmpi eq, %25, %760 : vector<1x8xi32>
    %762 = vector.shape_cast %759 : vector<1x1xf32> to vector<1x1xf32>
    %763 = vector.broadcast %762 : vector<1x1xf32> to vector<1x8xf32>
    %764 = arith.select %761, %763, %750 : vector<1x8xi1>, vector<1x8xf32>
    %c5_375 = arith.constant 5 : index
    %c0_376 = arith.constant 0 : index
    %765 = vector.load %arg5[%c5_375, %c0_376] : memref<8x8xf32, #tpu.memory_space<vmem>>, vector<1x8xf32>
    %c5_377 = arith.constant 5 : index
    %c0_378 = arith.constant 0 : index
    %766 = vector.load %arg7[%c5_377, %c0_378] : memref<8x8xf32, #tpu.memory_space<vmem>>, vector<1x8xf32>
    %767 = arith.minimumf %764, %686 : vector<1x8xf32>
    %768 = arith.minimumf %767, %766 : vector<1x8xf32>
    %769 = arith.addf %765, %768 : vector<1x8xf32>
    %c5_379 = arith.constant 5 : index
    %c0_380 = arith.constant 0 : index
    %770 = vector.load %arg6[%c5_379, %c0_380] : memref<8x8xf32, #tpu.memory_space<vmem>>, vector<1x8xf32>
    tpu.vector_store %arg6[%c5_379, %c0_380], %769 {strides = array<i32>} : memref<8x8xf32, #tpu.memory_space<vmem>>, vector<1x8xf32>,
    %771 = arith.mulf %217, %769 : vector<1x8xf32>
    %cst_381 = arith.constant dense<0.000000e+00> : vector<1xf32>
    %772 = vector.multi_reduction <add>, %771, %cst_381 [1] : vector<1x8xf32> to vector<1xf32>
    %773 = vector.shape_cast %772 : vector<1xf32> to vector<1x1xf32>
    %c5_i32_382 = arith.constant 5 : i32
    %774 = vector.broadcast %c5_i32_382 : i32 to vector<1x8xi32>
    %775 = arith.cmpi eq, %25, %774 : vector<1x8xi32>
    %776 = vector.shape_cast %773 : vector<1x1xf32> to vector<1x1xf32>
    %777 = vector.broadcast %776 : vector<1x1xf32> to vector<1x8xf32>
    %778 = arith.select %775, %777, %764 : vector<1x8xi1>, vector<1x8xf32>
    %c6_383 = arith.constant 6 : index
    %c0_384 = arith.constant 0 : index
    %779 = vector.load %arg5[%c6_383, %c0_384] : memref<8x8xf32, #tpu.memory_space<vmem>>, vector<1x8xf32>
    %c6_385 = arith.constant 6 : index
    %c0_386 = arith.constant 0 : index
    %780 = vector.load %arg7[%c6_385, %c0_386] : memref<8x8xf32, #tpu.memory_space<vmem>>, vector<1x8xf32>
    %781 = arith.minimumf %778, %686 : vector<1x8xf32>
    %782 = arith.minimumf %781, %780 : vector<1x8xf32>
    %783 = arith.addf %779, %782 : vector<1x8xf32>
    %c6_387 = arith.constant 6 : index
    %c0_388 = arith.constant 0 : index
    %784 = vector.load %arg6[%c6_387, %c0_388] : memref<8x8xf32, #tpu.memory_space<vmem>>, vector<1x8xf32>
    tpu.vector_store %arg6[%c6_387, %c0_388], %783 {strides = array<i32>} : memref<8x8xf32, #tpu.memory_space<vmem>>, vector<1x8xf32>,
    %785 = arith.mulf %223, %783 : vector<1x8xf32>
    %cst_389 = arith.constant dense<0.000000e+00> : vector<1xf32>
    %786 = vector.multi_reduction <add>, %785, %cst_389 [1] : vector<1x8xf32> to vector<1xf32>
    %787 = vector.shape_cast %786 : vector<1xf32> to vector<1x1xf32>
    %c6_i32_390 = arith.constant 6 : i32
    %788 = vector.broadcast %c6_i32_390 : i32 to vector<1x8xi32>
    %789 = arith.cmpi eq, %25, %788 : vector<1x8xi32>
    %790 = vector.shape_cast %787 : vector<1x1xf32> to vector<1x1xf32>
    %791 = vector.broadcast %790 : vector<1x1xf32> to vector<1x8xf32>
    %792 = arith.select %789, %791, %778 : vector<1x8xi1>, vector<1x8xf32>
    %c7_391 = arith.constant 7 : index
    %c0_392 = arith.constant 0 : index
    %793 = vector.load %arg5[%c7_391, %c0_392] : memref<8x8xf32, #tpu.memory_space<vmem>>, vector<1x8xf32>
    %c7_393 = arith.constant 7 : index
    %c0_394 = arith.constant 0 : index
    %794 = vector.load %arg7[%c7_393, %c0_394] : memref<8x8xf32, #tpu.memory_space<vmem>>, vector<1x8xf32>
    %795 = arith.minimumf %792, %686 : vector<1x8xf32>
    %796 = arith.minimumf %795, %794 : vector<1x8xf32>
    %797 = arith.addf %793, %796 : vector<1x8xf32>
    %c7_395 = arith.constant 7 : index
    %c0_396 = arith.constant 0 : index
    %798 = vector.load %arg6[%c7_395, %c0_396] : memref<8x8xf32, #tpu.memory_space<vmem>>, vector<1x8xf32>
    tpu.vector_store %arg6[%c7_395, %c0_396], %797 {strides = array<i32>} : memref<8x8xf32, #tpu.memory_space<vmem>>, vector<1x8xf32>,
    %799 = arith.mulf %229, %797 : vector<1x8xf32>
    %cst_397 = arith.constant dense<0.000000e+00> : vector<1xf32>
    %800 = vector.multi_reduction <add>, %799, %cst_397 [1] : vector<1x8xf32> to vector<1xf32>
    %801 = vector.shape_cast %800 : vector<1xf32> to vector<1x1xf32>
    %c7_i32_398 = arith.constant 7 : i32
    %802 = vector.broadcast %c7_i32_398 : i32 to vector<1x8xi32>
    %803 = arith.cmpi eq, %25, %802 : vector<1x8xi32>
    %804 = vector.shape_cast %801 : vector<1x1xf32> to vector<1x1xf32>
    %805 = vector.broadcast %804 : vector<1x1xf32> to vector<1x8xf32>
    %806 = arith.select %803, %805, %792 : vector<1x8xi1>, vector<1x8xf32>
    %c5_i32_399 = arith.constant 5 : i32
    %807 = vector.broadcast %c5_i32_399 : i32 to vector<8x8xi32>
    %808 = arith.cmpi eq, %26, %807 : vector<8x8xi32>
    %cst_400 = arith.constant 0.000000e+00 : f32
    %809 = vector.broadcast %cst_400 : f32 to vector<8x8xf32>
    %810 = arith.select %808, %21, %809 : vector<8x8xi1>, vector<8x8xf32>
    %cst_401 = arith.constant dense<0.000000e+00> : vector<8xf32>
    %811 = vector.multi_reduction <add>, %810, %cst_401 [1] : vector<8x8xf32> to vector<8xf32>
    %812 = vector.shape_cast %811 : vector<8xf32> to vector<8x1xf32>
    %813 = vector.shape_cast %812 : vector<8x1xf32> to vector<8x1xf32>
    %814 = vector.broadcast %813 : vector<8x1xf32> to vector<8x8xf32>
    %c0_402 = arith.constant 0 : index
    %c0_403 = arith.constant 0 : index
    %815 = vector.load %arg5[%c0_402, %c0_403] : memref<8x8xf32, #tpu.memory_space<vmem>>, vector<8x8xf32>
    tpu.vector_store %arg5[%c0_402, %c0_403], %814 {strides = array<i32>} : memref<8x8xf32, #tpu.memory_space<vmem>>, vector<8x8xf32>,
    %c0_404 = arith.constant 0 : index
    %c0_405 = arith.constant 0 : index
    %816 = vector.load %arg5[%c0_404, %c0_405] : memref<8x8xf32, #tpu.memory_space<vmem>>, vector<1x8xf32>
    %c0_i32_406 = arith.constant 0 : i32
    %817 = vector.broadcast %c0_i32_406 : i32 to vector<1x8xi32>
    %818 = arith.cmpi eq, %25, %817 : vector<1x8xi32>
    %cst_407 = arith.constant 0.000000e+00 : f32
    %819 = vector.broadcast %cst_407 : f32 to vector<1x8xf32>
    %820 = arith.select %818, %806, %819 : vector<1x8xi1>, vector<1x8xf32>
    %cst_408 = arith.constant dense<0.000000e+00> : vector<1xf32>
    %821 = vector.multi_reduction <add>, %820, %cst_408 [1] : vector<1x8xf32> to vector<1xf32>
    %822 = vector.shape_cast %821 : vector<1xf32> to vector<1x1xf32>
    %c0_i32_409 = arith.constant 0 : i32
    %823 = vector.broadcast %c0_i32_409 : i32 to vector<1x8xi32>
    %824 = arith.cmpi eq, %25, %823 : vector<1x8xi32>
    %825 = vector.broadcast %822 : vector<1x1xf32> to vector<1x8xf32>
    %826 = arith.addf %816, %825 : vector<1x8xf32>
    %cst_410 = arith.constant 0.000000e+00 : f32
    %827 = vector.broadcast %cst_410 : f32 to vector<1x8xf32>
    %828 = arith.select %824, %826, %827 : vector<1x8xi1>, vector<1x8xf32>
    %c1_411 = arith.constant 1 : index
    %c0_412 = arith.constant 0 : index
    %829 = vector.load %arg5[%c1_411, %c0_412] : memref<8x8xf32, #tpu.memory_space<vmem>>, vector<1x8xf32>
    %c1_413 = arith.constant 1 : index
    %c0_414 = arith.constant 0 : index
    %830 = vector.load %arg6[%c1_413, %c0_414] : memref<8x8xf32, #tpu.memory_space<vmem>>, vector<1x8xf32>
    %831 = arith.minimumf %828, %806 : vector<1x8xf32>
    %832 = arith.minimumf %831, %830 : vector<1x8xf32>
    %833 = arith.addf %829, %832 : vector<1x8xf32>
    %c1_415 = arith.constant 1 : index
    %c0_416 = arith.constant 0 : index
    %834 = vector.load %arg7[%c1_415, %c0_416] : memref<8x8xf32, #tpu.memory_space<vmem>>, vector<1x8xf32>
    tpu.vector_store %arg7[%c1_415, %c0_416], %833 {strides = array<i32>} : memref<8x8xf32, #tpu.memory_space<vmem>>, vector<1x8xf32>,
    %835 = arith.mulf %193, %833 : vector<1x8xf32>
    %cst_417 = arith.constant dense<0.000000e+00> : vector<1xf32>
    %836 = vector.multi_reduction <add>, %835, %cst_417 [1] : vector<1x8xf32> to vector<1xf32>
    %837 = vector.shape_cast %836 : vector<1xf32> to vector<1x1xf32>
    %c1_i32_418 = arith.constant 1 : i32
    %838 = vector.broadcast %c1_i32_418 : i32 to vector<1x8xi32>
    %839 = arith.cmpi eq, %25, %838 : vector<1x8xi32>
    %840 = vector.shape_cast %837 : vector<1x1xf32> to vector<1x1xf32>
    %841 = vector.broadcast %840 : vector<1x1xf32> to vector<1x8xf32>
    %842 = arith.select %839, %841, %828 : vector<1x8xi1>, vector<1x8xf32>
    %c2_419 = arith.constant 2 : index
    %c0_420 = arith.constant 0 : index
    %843 = vector.load %arg5[%c2_419, %c0_420] : memref<8x8xf32, #tpu.memory_space<vmem>>, vector<1x8xf32>
    %c2_421 = arith.constant 2 : index
    %c0_422 = arith.constant 0 : index
    %844 = vector.load %arg6[%c2_421, %c0_422] : memref<8x8xf32, #tpu.memory_space<vmem>>, vector<1x8xf32>
    %845 = arith.minimumf %842, %806 : vector<1x8xf32>
    %846 = arith.minimumf %845, %844 : vector<1x8xf32>
    %847 = arith.addf %843, %846 : vector<1x8xf32>
    %c2_423 = arith.constant 2 : index
    %c0_424 = arith.constant 0 : index
    %848 = vector.load %arg7[%c2_423, %c0_424] : memref<8x8xf32, #tpu.memory_space<vmem>>, vector<1x8xf32>
    tpu.vector_store %arg7[%c2_423, %c0_424], %847 {strides = array<i32>} : memref<8x8xf32, #tpu.memory_space<vmem>>, vector<1x8xf32>,
    %849 = arith.mulf %199, %847 : vector<1x8xf32>
    %cst_425 = arith.constant dense<0.000000e+00> : vector<1xf32>
    %850 = vector.multi_reduction <add>, %849, %cst_425 [1] : vector<1x8xf32> to vector<1xf32>
    %851 = vector.shape_cast %850 : vector<1xf32> to vector<1x1xf32>
    %c2_i32_426 = arith.constant 2 : i32
    %852 = vector.broadcast %c2_i32_426 : i32 to vector<1x8xi32>
    %853 = arith.cmpi eq, %25, %852 : vector<1x8xi32>
    %854 = vector.shape_cast %851 : vector<1x1xf32> to vector<1x1xf32>
    %855 = vector.broadcast %854 : vector<1x1xf32> to vector<1x8xf32>
    %856 = arith.select %853, %855, %842 : vector<1x8xi1>, vector<1x8xf32>
    %c3_427 = arith.constant 3 : index
    %c0_428 = arith.constant 0 : index
    %857 = vector.load %arg5[%c3_427, %c0_428] : memref<8x8xf32, #tpu.memory_space<vmem>>, vector<1x8xf32>
    %c3_429 = arith.constant 3 : index
    %c0_430 = arith.constant 0 : index
    %858 = vector.load %arg6[%c3_429, %c0_430] : memref<8x8xf32, #tpu.memory_space<vmem>>, vector<1x8xf32>
    %859 = arith.minimumf %856, %806 : vector<1x8xf32>
    %860 = arith.minimumf %859, %858 : vector<1x8xf32>
    %861 = arith.addf %857, %860 : vector<1x8xf32>
    %c3_431 = arith.constant 3 : index
    %c0_432 = arith.constant 0 : index
    %862 = vector.load %arg7[%c3_431, %c0_432] : memref<8x8xf32, #tpu.memory_space<vmem>>, vector<1x8xf32>
    tpu.vector_store %arg7[%c3_431, %c0_432], %861 {strides = array<i32>} : memref<8x8xf32, #tpu.memory_space<vmem>>, vector<1x8xf32>,
    %863 = arith.mulf %205, %861 : vector<1x8xf32>
    %cst_433 = arith.constant dense<0.000000e+00> : vector<1xf32>
    %864 = vector.multi_reduction <add>, %863, %cst_433 [1] : vector<1x8xf32> to vector<1xf32>
    %865 = vector.shape_cast %864 : vector<1xf32> to vector<1x1xf32>
    %c3_i32_434 = arith.constant 3 : i32
    %866 = vector.broadcast %c3_i32_434 : i32 to vector<1x8xi32>
    %867 = arith.cmpi eq, %25, %866 : vector<1x8xi32>
    %868 = vector.shape_cast %865 : vector<1x1xf32> to vector<1x1xf32>
    %869 = vector.broadcast %868 : vector<1x1xf32> to vector<1x8xf32>
    %870 = arith.select %867, %869, %856 : vector<1x8xi1>, vector<1x8xf32>
    %c4_435 = arith.constant 4 : index
    %c0_436 = arith.constant 0 : index
    %871 = vector.load %arg5[%c4_435, %c0_436] : memref<8x8xf32, #tpu.memory_space<vmem>>, vector<1x8xf32>
    %c4_437 = arith.constant 4 : index
    %c0_438 = arith.constant 0 : index
    %872 = vector.load %arg6[%c4_437, %c0_438] : memref<8x8xf32, #tpu.memory_space<vmem>>, vector<1x8xf32>
    %873 = arith.minimumf %870, %806 : vector<1x8xf32>
    %874 = arith.minimumf %873, %872 : vector<1x8xf32>
    %875 = arith.addf %871, %874 : vector<1x8xf32>
    %c4_439 = arith.constant 4 : index
    %c0_440 = arith.constant 0 : index
    %876 = vector.load %arg7[%c4_439, %c0_440] : memref<8x8xf32, #tpu.memory_space<vmem>>, vector<1x8xf32>
    tpu.vector_store %arg7[%c4_439, %c0_440], %875 {strides = array<i32>} : memref<8x8xf32, #tpu.memory_space<vmem>>, vector<1x8xf32>,
    %877 = arith.mulf %211, %875 : vector<1x8xf32>
    %cst_441 = arith.constant dense<0.000000e+00> : vector<1xf32>
    %878 = vector.multi_reduction <add>, %877, %cst_441 [1] : vector<1x8xf32> to vector<1xf32>
    %879 = vector.shape_cast %878 : vector<1xf32> to vector<1x1xf32>
    %c4_i32_442 = arith.constant 4 : i32
    %880 = vector.broadcast %c4_i32_442 : i32 to vector<1x8xi32>
    %881 = arith.cmpi eq, %25, %880 : vector<1x8xi32>
    %882 = vector.shape_cast %879 : vector<1x1xf32> to vector<1x1xf32>
    %883 = vector.broadcast %882 : vector<1x1xf32> to vector<1x8xf32>
    %884 = arith.select %881, %883, %870 : vector<1x8xi1>, vector<1x8xf32>
    %c5_443 = arith.constant 5 : index
    %c0_444 = arith.constant 0 : index
    %885 = vector.load %arg5[%c5_443, %c0_444] : memref<8x8xf32, #tpu.memory_space<vmem>>, vector<1x8xf32>
    %c5_445 = arith.constant 5 : index
    %c0_446 = arith.constant 0 : index
    %886 = vector.load %arg6[%c5_445, %c0_446] : memref<8x8xf32, #tpu.memory_space<vmem>>, vector<1x8xf32>
    %887 = arith.minimumf %884, %806 : vector<1x8xf32>
    %888 = arith.minimumf %887, %886 : vector<1x8xf32>
    %889 = arith.addf %885, %888 : vector<1x8xf32>
    %c5_447 = arith.constant 5 : index
    %c0_448 = arith.constant 0 : index
    %890 = vector.load %arg7[%c5_447, %c0_448] : memref<8x8xf32, #tpu.memory_space<vmem>>, vector<1x8xf32>
    tpu.vector_store %arg7[%c5_447, %c0_448], %889 {strides = array<i32>} : memref<8x8xf32, #tpu.memory_space<vmem>>, vector<1x8xf32>,
    %891 = arith.mulf %217, %889 : vector<1x8xf32>
    %cst_449 = arith.constant dense<0.000000e+00> : vector<1xf32>
    %892 = vector.multi_reduction <add>, %891, %cst_449 [1] : vector<1x8xf32> to vector<1xf32>
    %893 = vector.shape_cast %892 : vector<1xf32> to vector<1x1xf32>
    %c5_i32_450 = arith.constant 5 : i32
    %894 = vector.broadcast %c5_i32_450 : i32 to vector<1x8xi32>
    %895 = arith.cmpi eq, %25, %894 : vector<1x8xi32>
    %896 = vector.shape_cast %893 : vector<1x1xf32> to vector<1x1xf32>
    %897 = vector.broadcast %896 : vector<1x1xf32> to vector<1x8xf32>
    %898 = arith.select %895, %897, %884 : vector<1x8xi1>, vector<1x8xf32>
    %c6_451 = arith.constant 6 : index
    %c0_452 = arith.constant 0 : index
    %899 = vector.load %arg5[%c6_451, %c0_452] : memref<8x8xf32, #tpu.memory_space<vmem>>, vector<1x8xf32>
    %c6_453 = arith.constant 6 : index
    %c0_454 = arith.constant 0 : index
    %900 = vector.load %arg6[%c6_453, %c0_454] : memref<8x8xf32, #tpu.memory_space<vmem>>, vector<1x8xf32>
    %901 = arith.minimumf %898, %806 : vector<1x8xf32>
    %902 = arith.minimumf %901, %900 : vector<1x8xf32>
    %903 = arith.addf %899, %902 : vector<1x8xf32>
    %c6_455 = arith.constant 6 : index
    %c0_456 = arith.constant 0 : index
    %904 = vector.load %arg7[%c6_455, %c0_456] : memref<8x8xf32, #tpu.memory_space<vmem>>, vector<1x8xf32>
    tpu.vector_store %arg7[%c6_455, %c0_456], %903 {strides = array<i32>} : memref<8x8xf32, #tpu.memory_space<vmem>>, vector<1x8xf32>,
    %905 = arith.mulf %223, %903 : vector<1x8xf32>
    %cst_457 = arith.constant dense<0.000000e+00> : vector<1xf32>
    %906 = vector.multi_reduction <add>, %905, %cst_457 [1] : vector<1x8xf32> to vector<1xf32>
    %907 = vector.shape_cast %906 : vector<1xf32> to vector<1x1xf32>
    %c6_i32_458 = arith.constant 6 : i32
    %908 = vector.broadcast %c6_i32_458 : i32 to vector<1x8xi32>
    %909 = arith.cmpi eq, %25, %908 : vector<1x8xi32>
    %910 = vector.shape_cast %907 : vector<1x1xf32> to vector<1x1xf32>
    %911 = vector.broadcast %910 : vector<1x1xf32> to vector<1x8xf32>
    %912 = arith.select %909, %911, %898 : vector<1x8xi1>, vector<1x8xf32>
    %c7_459 = arith.constant 7 : index
    %c0_460 = arith.constant 0 : index
    %913 = vector.load %arg5[%c7_459, %c0_460] : memref<8x8xf32, #tpu.memory_space<vmem>>, vector<1x8xf32>
    %c7_461 = arith.constant 7 : index
    %c0_462 = arith.constant 0 : index
    %914 = vector.load %arg6[%c7_461, %c0_462] : memref<8x8xf32, #tpu.memory_space<vmem>>, vector<1x8xf32>
    %915 = arith.minimumf %912, %806 : vector<1x8xf32>
    %916 = arith.minimumf %915, %914 : vector<1x8xf32>
    %917 = arith.addf %913, %916 : vector<1x8xf32>
    %c7_463 = arith.constant 7 : index
    %c0_464 = arith.constant 0 : index
    %918 = vector.load %arg7[%c7_463, %c0_464] : memref<8x8xf32, #tpu.memory_space<vmem>>, vector<1x8xf32>
    tpu.vector_store %arg7[%c7_463, %c0_464], %917 {strides = array<i32>} : memref<8x8xf32, #tpu.memory_space<vmem>>, vector<1x8xf32>,
    %919 = arith.mulf %229, %917 : vector<1x8xf32>
    %cst_465 = arith.constant dense<0.000000e+00> : vector<1xf32>
    %920 = vector.multi_reduction <add>, %919, %cst_465 [1] : vector<1x8xf32> to vector<1xf32>
    %921 = vector.shape_cast %920 : vector<1xf32> to vector<1x1xf32>
    %c7_i32_466 = arith.constant 7 : i32
    %922 = vector.broadcast %c7_i32_466 : i32 to vector<1x8xi32>
    %923 = arith.cmpi eq, %25, %922 : vector<1x8xi32>
    %924 = vector.shape_cast %921 : vector<1x1xf32> to vector<1x1xf32>
    %925 = vector.broadcast %924 : vector<1x1xf32> to vector<1x8xf32>
    %926 = arith.select %923, %925, %912 : vector<1x8xi1>, vector<1x8xf32>
    %c6_i32_467 = arith.constant 6 : i32
    %927 = vector.broadcast %c6_i32_467 : i32 to vector<8x8xi32>
    %928 = arith.cmpi eq, %26, %927 : vector<8x8xi32>
    %cst_468 = arith.constant 0.000000e+00 : f32
    %929 = vector.broadcast %cst_468 : f32 to vector<8x8xf32>
    %930 = arith.select %928, %21, %929 : vector<8x8xi1>, vector<8x8xf32>
    %cst_469 = arith.constant dense<0.000000e+00> : vector<8xf32>
    %931 = vector.multi_reduction <add>, %930, %cst_469 [1] : vector<8x8xf32> to vector<8xf32>
    %932 = vector.shape_cast %931 : vector<8xf32> to vector<8x1xf32>
    %933 = vector.shape_cast %932 : vector<8x1xf32> to vector<8x1xf32>
    %934 = vector.broadcast %933 : vector<8x1xf32> to vector<8x8xf32>
    %c0_470 = arith.constant 0 : index
    %c0_471 = arith.constant 0 : index
    %935 = vector.load %arg5[%c0_470, %c0_471] : memref<8x8xf32, #tpu.memory_space<vmem>>, vector<8x8xf32>
    tpu.vector_store %arg5[%c0_470, %c0_471], %934 {strides = array<i32>} : memref<8x8xf32, #tpu.memory_space<vmem>>, vector<8x8xf32>,
    %c0_472 = arith.constant 0 : index
    %c0_473 = arith.constant 0 : index
    %936 = vector.load %arg5[%c0_472, %c0_473] : memref<8x8xf32, #tpu.memory_space<vmem>>, vector<1x8xf32>
    %c0_i32_474 = arith.constant 0 : i32
    %937 = vector.broadcast %c0_i32_474 : i32 to vector<1x8xi32>
    %938 = arith.cmpi eq, %25, %937 : vector<1x8xi32>
    %cst_475 = arith.constant 0.000000e+00 : f32
    %939 = vector.broadcast %cst_475 : f32 to vector<1x8xf32>
    %940 = arith.select %938, %926, %939 : vector<1x8xi1>, vector<1x8xf32>
    %cst_476 = arith.constant dense<0.000000e+00> : vector<1xf32>
    %941 = vector.multi_reduction <add>, %940, %cst_476 [1] : vector<1x8xf32> to vector<1xf32>
    %942 = vector.shape_cast %941 : vector<1xf32> to vector<1x1xf32>
    %c0_i32_477 = arith.constant 0 : i32
    %943 = vector.broadcast %c0_i32_477 : i32 to vector<1x8xi32>
    %944 = arith.cmpi eq, %25, %943 : vector<1x8xi32>
    %945 = vector.broadcast %942 : vector<1x1xf32> to vector<1x8xf32>
    %946 = arith.addf %936, %945 : vector<1x8xf32>
    %cst_478 = arith.constant 0.000000e+00 : f32
    %947 = vector.broadcast %cst_478 : f32 to vector<1x8xf32>
    %948 = arith.select %944, %946, %947 : vector<1x8xi1>, vector<1x8xf32>
    %c1_479 = arith.constant 1 : index
    %c0_480 = arith.constant 0 : index
    %949 = vector.load %arg5[%c1_479, %c0_480] : memref<8x8xf32, #tpu.memory_space<vmem>>, vector<1x8xf32>
    %c1_481 = arith.constant 1 : index
    %c0_482 = arith.constant 0 : index
    %950 = vector.load %arg7[%c1_481, %c0_482] : memref<8x8xf32, #tpu.memory_space<vmem>>, vector<1x8xf32>
    %951 = arith.minimumf %948, %926 : vector<1x8xf32>
    %952 = arith.minimumf %951, %950 : vector<1x8xf32>
    %953 = arith.addf %949, %952 : vector<1x8xf32>
    %c1_483 = arith.constant 1 : index
    %c0_484 = arith.constant 0 : index
    %954 = vector.load %arg6[%c1_483, %c0_484] : memref<8x8xf32, #tpu.memory_space<vmem>>, vector<1x8xf32>
    tpu.vector_store %arg6[%c1_483, %c0_484], %953 {strides = array<i32>} : memref<8x8xf32, #tpu.memory_space<vmem>>, vector<1x8xf32>,
    %955 = arith.mulf %193, %953 : vector<1x8xf32>
    %cst_485 = arith.constant dense<0.000000e+00> : vector<1xf32>
    %956 = vector.multi_reduction <add>, %955, %cst_485 [1] : vector<1x8xf32> to vector<1xf32>
    %957 = vector.shape_cast %956 : vector<1xf32> to vector<1x1xf32>
    %c1_i32_486 = arith.constant 1 : i32
    %958 = vector.broadcast %c1_i32_486 : i32 to vector<1x8xi32>
    %959 = arith.cmpi eq, %25, %958 : vector<1x8xi32>
    %960 = vector.shape_cast %957 : vector<1x1xf32> to vector<1x1xf32>
    %961 = vector.broadcast %960 : vector<1x1xf32> to vector<1x8xf32>
    %962 = arith.select %959, %961, %948 : vector<1x8xi1>, vector<1x8xf32>
    %c2_487 = arith.constant 2 : index
    %c0_488 = arith.constant 0 : index
    %963 = vector.load %arg5[%c2_487, %c0_488] : memref<8x8xf32, #tpu.memory_space<vmem>>, vector<1x8xf32>
    %c2_489 = arith.constant 2 : index
    %c0_490 = arith.constant 0 : index
    %964 = vector.load %arg7[%c2_489, %c0_490] : memref<8x8xf32, #tpu.memory_space<vmem>>, vector<1x8xf32>
    %965 = arith.minimumf %962, %926 : vector<1x8xf32>
    %966 = arith.minimumf %965, %964 : vector<1x8xf32>
    %967 = arith.addf %963, %966 : vector<1x8xf32>
    %c2_491 = arith.constant 2 : index
    %c0_492 = arith.constant 0 : index
    %968 = vector.load %arg6[%c2_491, %c0_492] : memref<8x8xf32, #tpu.memory_space<vmem>>, vector<1x8xf32>
    tpu.vector_store %arg6[%c2_491, %c0_492], %967 {strides = array<i32>} : memref<8x8xf32, #tpu.memory_space<vmem>>, vector<1x8xf32>,
    %969 = arith.mulf %199, %967 : vector<1x8xf32>
    %cst_493 = arith.constant dense<0.000000e+00> : vector<1xf32>
    %970 = vector.multi_reduction <add>, %969, %cst_493 [1] : vector<1x8xf32> to vector<1xf32>
    %971 = vector.shape_cast %970 : vector<1xf32> to vector<1x1xf32>
    %c2_i32_494 = arith.constant 2 : i32
    %972 = vector.broadcast %c2_i32_494 : i32 to vector<1x8xi32>
    %973 = arith.cmpi eq, %25, %972 : vector<1x8xi32>
    %974 = vector.shape_cast %971 : vector<1x1xf32> to vector<1x1xf32>
    %975 = vector.broadcast %974 : vector<1x1xf32> to vector<1x8xf32>
    %976 = arith.select %973, %975, %962 : vector<1x8xi1>, vector<1x8xf32>
    %c3_495 = arith.constant 3 : index
    %c0_496 = arith.constant 0 : index
    %977 = vector.load %arg5[%c3_495, %c0_496] : memref<8x8xf32, #tpu.memory_space<vmem>>, vector<1x8xf32>
    %c3_497 = arith.constant 3 : index
    %c0_498 = arith.constant 0 : index
    %978 = vector.load %arg7[%c3_497, %c0_498] : memref<8x8xf32, #tpu.memory_space<vmem>>, vector<1x8xf32>
    %979 = arith.minimumf %976, %926 : vector<1x8xf32>
    %980 = arith.minimumf %979, %978 : vector<1x8xf32>
    %981 = arith.addf %977, %980 : vector<1x8xf32>
    %c3_499 = arith.constant 3 : index
    %c0_500 = arith.constant 0 : index
    %982 = vector.load %arg6[%c3_499, %c0_500] : memref<8x8xf32, #tpu.memory_space<vmem>>, vector<1x8xf32>
    tpu.vector_store %arg6[%c3_499, %c0_500], %981 {strides = array<i32>} : memref<8x8xf32, #tpu.memory_space<vmem>>, vector<1x8xf32>,
    %983 = arith.mulf %205, %981 : vector<1x8xf32>
    %cst_501 = arith.constant dense<0.000000e+00> : vector<1xf32>
    %984 = vector.multi_reduction <add>, %983, %cst_501 [1] : vector<1x8xf32> to vector<1xf32>
    %985 = vector.shape_cast %984 : vector<1xf32> to vector<1x1xf32>
    %c3_i32_502 = arith.constant 3 : i32
    %986 = vector.broadcast %c3_i32_502 : i32 to vector<1x8xi32>
    %987 = arith.cmpi eq, %25, %986 : vector<1x8xi32>
    %988 = vector.shape_cast %985 : vector<1x1xf32> to vector<1x1xf32>
    %989 = vector.broadcast %988 : vector<1x1xf32> to vector<1x8xf32>
    %990 = arith.select %987, %989, %976 : vector<1x8xi1>, vector<1x8xf32>
    %c4_503 = arith.constant 4 : index
    %c0_504 = arith.constant 0 : index
    %991 = vector.load %arg5[%c4_503, %c0_504] : memref<8x8xf32, #tpu.memory_space<vmem>>, vector<1x8xf32>
    %c4_505 = arith.constant 4 : index
    %c0_506 = arith.constant 0 : index
    %992 = vector.load %arg7[%c4_505, %c0_506] : memref<8x8xf32, #tpu.memory_space<vmem>>, vector<1x8xf32>
    %993 = arith.minimumf %990, %926 : vector<1x8xf32>
    %994 = arith.minimumf %993, %992 : vector<1x8xf32>
    %995 = arith.addf %991, %994 : vector<1x8xf32>
    %c4_507 = arith.constant 4 : index
    %c0_508 = arith.constant 0 : index
    %996 = vector.load %arg6[%c4_507, %c0_508] : memref<8x8xf32, #tpu.memory_space<vmem>>, vector<1x8xf32>
    tpu.vector_store %arg6[%c4_507, %c0_508], %995 {strides = array<i32>} : memref<8x8xf32, #tpu.memory_space<vmem>>, vector<1x8xf32>,
    %997 = arith.mulf %211, %995 : vector<1x8xf32>
    %cst_509 = arith.constant dense<0.000000e+00> : vector<1xf32>
    %998 = vector.multi_reduction <add>, %997, %cst_509 [1] : vector<1x8xf32> to vector<1xf32>
    %999 = vector.shape_cast %998 : vector<1xf32> to vector<1x1xf32>
    %c4_i32_510 = arith.constant 4 : i32
    %1000 = vector.broadcast %c4_i32_510 : i32 to vector<1x8xi32>
    %1001 = arith.cmpi eq, %25, %1000 : vector<1x8xi32>
    %1002 = vector.shape_cast %999 : vector<1x1xf32> to vector<1x1xf32>
    %1003 = vector.broadcast %1002 : vector<1x1xf32> to vector<1x8xf32>
    %1004 = arith.select %1001, %1003, %990 : vector<1x8xi1>, vector<1x8xf32>
    %c5_511 = arith.constant 5 : index
    %c0_512 = arith.constant 0 : index
    %1005 = vector.load %arg5[%c5_511, %c0_512] : memref<8x8xf32, #tpu.memory_space<vmem>>, vector<1x8xf32>
    %c5_513 = arith.constant 5 : index
    %c0_514 = arith.constant 0 : index
    %1006 = vector.load %arg7[%c5_513, %c0_514] : memref<8x8xf32, #tpu.memory_space<vmem>>, vector<1x8xf32>
    %1007 = arith.minimumf %1004, %926 : vector<1x8xf32>
    %1008 = arith.minimumf %1007, %1006 : vector<1x8xf32>
    %1009 = arith.addf %1005, %1008 : vector<1x8xf32>
    %c5_515 = arith.constant 5 : index
    %c0_516 = arith.constant 0 : index
    %1010 = vector.load %arg6[%c5_515, %c0_516] : memref<8x8xf32, #tpu.memory_space<vmem>>, vector<1x8xf32>
    tpu.vector_store %arg6[%c5_515, %c0_516], %1009 {strides = array<i32>} : memref<8x8xf32, #tpu.memory_space<vmem>>, vector<1x8xf32>,
    %1011 = arith.mulf %217, %1009 : vector<1x8xf32>
    %cst_517 = arith.constant dense<0.000000e+00> : vector<1xf32>
    %1012 = vector.multi_reduction <add>, %1011, %cst_517 [1] : vector<1x8xf32> to vector<1xf32>
    %1013 = vector.shape_cast %1012 : vector<1xf32> to vector<1x1xf32>
    %c5_i32_518 = arith.constant 5 : i32
    %1014 = vector.broadcast %c5_i32_518 : i32 to vector<1x8xi32>
    %1015 = arith.cmpi eq, %25, %1014 : vector<1x8xi32>
    %1016 = vector.shape_cast %1013 : vector<1x1xf32> to vector<1x1xf32>
    %1017 = vector.broadcast %1016 : vector<1x1xf32> to vector<1x8xf32>
    %1018 = arith.select %1015, %1017, %1004 : vector<1x8xi1>, vector<1x8xf32>
    %c6_519 = arith.constant 6 : index
    %c0_520 = arith.constant 0 : index
    %1019 = vector.load %arg5[%c6_519, %c0_520] : memref<8x8xf32, #tpu.memory_space<vmem>>, vector<1x8xf32>
    %c6_521 = arith.constant 6 : index
    %c0_522 = arith.constant 0 : index
    %1020 = vector.load %arg7[%c6_521, %c0_522] : memref<8x8xf32, #tpu.memory_space<vmem>>, vector<1x8xf32>
    %1021 = arith.minimumf %1018, %926 : vector<1x8xf32>
    %1022 = arith.minimumf %1021, %1020 : vector<1x8xf32>
    %1023 = arith.addf %1019, %1022 : vector<1x8xf32>
    %c6_523 = arith.constant 6 : index
    %c0_524 = arith.constant 0 : index
    %1024 = vector.load %arg6[%c6_523, %c0_524] : memref<8x8xf32, #tpu.memory_space<vmem>>, vector<1x8xf32>
    tpu.vector_store %arg6[%c6_523, %c0_524], %1023 {strides = array<i32>} : memref<8x8xf32, #tpu.memory_space<vmem>>, vector<1x8xf32>,
    %1025 = arith.mulf %223, %1023 : vector<1x8xf32>
    %cst_525 = arith.constant dense<0.000000e+00> : vector<1xf32>
    %1026 = vector.multi_reduction <add>, %1025, %cst_525 [1] : vector<1x8xf32> to vector<1xf32>
    %1027 = vector.shape_cast %1026 : vector<1xf32> to vector<1x1xf32>
    %c6_i32_526 = arith.constant 6 : i32
    %1028 = vector.broadcast %c6_i32_526 : i32 to vector<1x8xi32>
    %1029 = arith.cmpi eq, %25, %1028 : vector<1x8xi32>
    %1030 = vector.shape_cast %1027 : vector<1x1xf32> to vector<1x1xf32>
    %1031 = vector.broadcast %1030 : vector<1x1xf32> to vector<1x8xf32>
    %1032 = arith.select %1029, %1031, %1018 : vector<1x8xi1>, vector<1x8xf32>
    %c7_527 = arith.constant 7 : index
    %c0_528 = arith.constant 0 : index
    %1033 = vector.load %arg5[%c7_527, %c0_528] : memref<8x8xf32, #tpu.memory_space<vmem>>, vector<1x8xf32>
    %c7_529 = arith.constant 7 : index
    %c0_530 = arith.constant 0 : index
    %1034 = vector.load %arg7[%c7_529, %c0_530] : memref<8x8xf32, #tpu.memory_space<vmem>>, vector<1x8xf32>
    %1035 = arith.minimumf %1032, %926 : vector<1x8xf32>
    %1036 = arith.minimumf %1035, %1034 : vector<1x8xf32>
    %1037 = arith.addf %1033, %1036 : vector<1x8xf32>
    %c7_531 = arith.constant 7 : index
    %c0_532 = arith.constant 0 : index
    %1038 = vector.load %arg6[%c7_531, %c0_532] : memref<8x8xf32, #tpu.memory_space<vmem>>, vector<1x8xf32>
    tpu.vector_store %arg6[%c7_531, %c0_532], %1037 {strides = array<i32>} : memref<8x8xf32, #tpu.memory_space<vmem>>, vector<1x8xf32>,
    %1039 = arith.mulf %229, %1037 : vector<1x8xf32>
    %cst_533 = arith.constant dense<0.000000e+00> : vector<1xf32>
    %1040 = vector.multi_reduction <add>, %1039, %cst_533 [1] : vector<1x8xf32> to vector<1xf32>
    %1041 = vector.shape_cast %1040 : vector<1xf32> to vector<1x1xf32>
    %c7_i32_534 = arith.constant 7 : i32
    %1042 = vector.broadcast %c7_i32_534 : i32 to vector<1x8xi32>
    %1043 = arith.cmpi eq, %25, %1042 : vector<1x8xi32>
    %1044 = vector.shape_cast %1041 : vector<1x1xf32> to vector<1x1xf32>
    %1045 = vector.broadcast %1044 : vector<1x1xf32> to vector<1x8xf32>
    %1046 = arith.select %1043, %1045, %1032 : vector<1x8xi1>, vector<1x8xf32>
    %c7_i32_535 = arith.constant 7 : i32
    %1047 = vector.broadcast %c7_i32_535 : i32 to vector<8x8xi32>
    %1048 = arith.cmpi eq, %26, %1047 : vector<8x8xi32>
    %cst_536 = arith.constant 0.000000e+00 : f32
    %1049 = vector.broadcast %cst_536 : f32 to vector<8x8xf32>
    %1050 = arith.select %1048, %21, %1049 : vector<8x8xi1>, vector<8x8xf32>
    %cst_537 = arith.constant dense<0.000000e+00> : vector<8xf32>
    %1051 = vector.multi_reduction <add>, %1050, %cst_537 [1] : vector<8x8xf32> to vector<8xf32>
    %1052 = vector.shape_cast %1051 : vector<8xf32> to vector<8x1xf32>
    %1053 = vector.shape_cast %1052 : vector<8x1xf32> to vector<8x1xf32>
    %1054 = vector.broadcast %1053 : vector<8x1xf32> to vector<8x8xf32>
    %c0_538 = arith.constant 0 : index
    %c0_539 = arith.constant 0 : index
    %1055 = vector.load %arg5[%c0_538, %c0_539] : memref<8x8xf32, #tpu.memory_space<vmem>>, vector<8x8xf32>
    tpu.vector_store %arg5[%c0_538, %c0_539], %1054 {strides = array<i32>} : memref<8x8xf32, #tpu.memory_space<vmem>>, vector<8x8xf32>,
    %c0_540 = arith.constant 0 : index
    %c0_541 = arith.constant 0 : index
    %1056 = vector.load %arg5[%c0_540, %c0_541] : memref<8x8xf32, #tpu.memory_space<vmem>>, vector<1x8xf32>
    %c0_i32_542 = arith.constant 0 : i32
    %1057 = vector.broadcast %c0_i32_542 : i32 to vector<1x8xi32>
    %1058 = arith.cmpi eq, %25, %1057 : vector<1x8xi32>
    %cst_543 = arith.constant 0.000000e+00 : f32
    %1059 = vector.broadcast %cst_543 : f32 to vector<1x8xf32>
    %1060 = arith.select %1058, %1046, %1059 : vector<1x8xi1>, vector<1x8xf32>
    %cst_544 = arith.constant dense<0.000000e+00> : vector<1xf32>
    %1061 = vector.multi_reduction <add>, %1060, %cst_544 [1] : vector<1x8xf32> to vector<1xf32>
    %1062 = vector.shape_cast %1061 : vector<1xf32> to vector<1x1xf32>
    %c0_i32_545 = arith.constant 0 : i32
    %1063 = vector.broadcast %c0_i32_545 : i32 to vector<1x8xi32>
    %1064 = arith.cmpi eq, %25, %1063 : vector<1x8xi32>
    %1065 = vector.broadcast %1062 : vector<1x1xf32> to vector<1x8xf32>
    %1066 = arith.addf %1056, %1065 : vector<1x8xf32>
    %cst_546 = arith.constant 0.000000e+00 : f32
    %1067 = vector.broadcast %cst_546 : f32 to vector<1x8xf32>
    %1068 = arith.select %1064, %1066, %1067 : vector<1x8xi1>, vector<1x8xf32>
    %c1_547 = arith.constant 1 : index
    %c0_548 = arith.constant 0 : index
    %1069 = vector.load %arg5[%c1_547, %c0_548] : memref<8x8xf32, #tpu.memory_space<vmem>>, vector<1x8xf32>
    %c1_549 = arith.constant 1 : index
    %c0_550 = arith.constant 0 : index
    %1070 = vector.load %arg6[%c1_549, %c0_550] : memref<8x8xf32, #tpu.memory_space<vmem>>, vector<1x8xf32>
    %1071 = arith.minimumf %1068, %1046 : vector<1x8xf32>
    %1072 = arith.minimumf %1071, %1070 : vector<1x8xf32>
    %1073 = arith.addf %1069, %1072 : vector<1x8xf32>
    %c1_551 = arith.constant 1 : index
    %c0_552 = arith.constant 0 : index
    %1074 = vector.load %arg7[%c1_551, %c0_552] : memref<8x8xf32, #tpu.memory_space<vmem>>, vector<1x8xf32>
    tpu.vector_store %arg7[%c1_551, %c0_552], %1073 {strides = array<i32>} : memref<8x8xf32, #tpu.memory_space<vmem>>, vector<1x8xf32>,
    %1075 = arith.mulf %193, %1073 : vector<1x8xf32>
    %cst_553 = arith.constant dense<0.000000e+00> : vector<1xf32>
    %1076 = vector.multi_reduction <add>, %1075, %cst_553 [1] : vector<1x8xf32> to vector<1xf32>
    %1077 = vector.shape_cast %1076 : vector<1xf32> to vector<1x1xf32>
    %c1_i32_554 = arith.constant 1 : i32
    %1078 = vector.broadcast %c1_i32_554 : i32 to vector<1x8xi32>
    %1079 = arith.cmpi eq, %25, %1078 : vector<1x8xi32>
    %1080 = vector.shape_cast %1077 : vector<1x1xf32> to vector<1x1xf32>
    %1081 = vector.broadcast %1080 : vector<1x1xf32> to vector<1x8xf32>
    %1082 = arith.select %1079, %1081, %1068 : vector<1x8xi1>, vector<1x8xf32>
    %c2_555 = arith.constant 2 : index
    %c0_556 = arith.constant 0 : index
    %1083 = vector.load %arg5[%c2_555, %c0_556] : memref<8x8xf32, #tpu.memory_space<vmem>>, vector<1x8xf32>
    %c2_557 = arith.constant 2 : index
    %c0_558 = arith.constant 0 : index
    %1084 = vector.load %arg6[%c2_557, %c0_558] : memref<8x8xf32, #tpu.memory_space<vmem>>, vector<1x8xf32>
    %1085 = arith.minimumf %1082, %1046 : vector<1x8xf32>
    %1086 = arith.minimumf %1085, %1084 : vector<1x8xf32>
    %1087 = arith.addf %1083, %1086 : vector<1x8xf32>
    %c2_559 = arith.constant 2 : index
    %c0_560 = arith.constant 0 : index
    %1088 = vector.load %arg7[%c2_559, %c0_560] : memref<8x8xf32, #tpu.memory_space<vmem>>, vector<1x8xf32>
    tpu.vector_store %arg7[%c2_559, %c0_560], %1087 {strides = array<i32>} : memref<8x8xf32, #tpu.memory_space<vmem>>, vector<1x8xf32>,
    %1089 = arith.mulf %199, %1087 : vector<1x8xf32>
    %cst_561 = arith.constant dense<0.000000e+00> : vector<1xf32>
    %1090 = vector.multi_reduction <add>, %1089, %cst_561 [1] : vector<1x8xf32> to vector<1xf32>
    %1091 = vector.shape_cast %1090 : vector<1xf32> to vector<1x1xf32>
    %c2_i32_562 = arith.constant 2 : i32
    %1092 = vector.broadcast %c2_i32_562 : i32 to vector<1x8xi32>
    %1093 = arith.cmpi eq, %25, %1092 : vector<1x8xi32>
    %1094 = vector.shape_cast %1091 : vector<1x1xf32> to vector<1x1xf32>
    %1095 = vector.broadcast %1094 : vector<1x1xf32> to vector<1x8xf32>
    %1096 = arith.select %1093, %1095, %1082 : vector<1x8xi1>, vector<1x8xf32>
    %c3_563 = arith.constant 3 : index
    %c0_564 = arith.constant 0 : index
    %1097 = vector.load %arg5[%c3_563, %c0_564] : memref<8x8xf32, #tpu.memory_space<vmem>>, vector<1x8xf32>
    %c3_565 = arith.constant 3 : index
    %c0_566 = arith.constant 0 : index
    %1098 = vector.load %arg6[%c3_565, %c0_566] : memref<8x8xf32, #tpu.memory_space<vmem>>, vector<1x8xf32>
    %1099 = arith.minimumf %1096, %1046 : vector<1x8xf32>
    %1100 = arith.minimumf %1099, %1098 : vector<1x8xf32>
    %1101 = arith.addf %1097, %1100 : vector<1x8xf32>
    %c3_567 = arith.constant 3 : index
    %c0_568 = arith.constant 0 : index
    %1102 = vector.load %arg7[%c3_567, %c0_568] : memref<8x8xf32, #tpu.memory_space<vmem>>, vector<1x8xf32>
    tpu.vector_store %arg7[%c3_567, %c0_568], %1101 {strides = array<i32>} : memref<8x8xf32, #tpu.memory_space<vmem>>, vector<1x8xf32>,
    %1103 = arith.mulf %205, %1101 : vector<1x8xf32>
    %cst_569 = arith.constant dense<0.000000e+00> : vector<1xf32>
    %1104 = vector.multi_reduction <add>, %1103, %cst_569 [1] : vector<1x8xf32> to vector<1xf32>
    %1105 = vector.shape_cast %1104 : vector<1xf32> to vector<1x1xf32>
    %c3_i32_570 = arith.constant 3 : i32
    %1106 = vector.broadcast %c3_i32_570 : i32 to vector<1x8xi32>
    %1107 = arith.cmpi eq, %25, %1106 : vector<1x8xi32>
    %1108 = vector.shape_cast %1105 : vector<1x1xf32> to vector<1x1xf32>
    %1109 = vector.broadcast %1108 : vector<1x1xf32> to vector<1x8xf32>
    %1110 = arith.select %1107, %1109, %1096 : vector<1x8xi1>, vector<1x8xf32>
    %c4_571 = arith.constant 4 : index
    %c0_572 = arith.constant 0 : index
    %1111 = vector.load %arg5[%c4_571, %c0_572] : memref<8x8xf32, #tpu.memory_space<vmem>>, vector<1x8xf32>
    %c4_573 = arith.constant 4 : index
    %c0_574 = arith.constant 0 : index
    %1112 = vector.load %arg6[%c4_573, %c0_574] : memref<8x8xf32, #tpu.memory_space<vmem>>, vector<1x8xf32>
    %1113 = arith.minimumf %1110, %1046 : vector<1x8xf32>
    %1114 = arith.minimumf %1113, %1112 : vector<1x8xf32>
    %1115 = arith.addf %1111, %1114 : vector<1x8xf32>
    %c4_575 = arith.constant 4 : index
    %c0_576 = arith.constant 0 : index
    %1116 = vector.load %arg7[%c4_575, %c0_576] : memref<8x8xf32, #tpu.memory_space<vmem>>, vector<1x8xf32>
    tpu.vector_store %arg7[%c4_575, %c0_576], %1115 {strides = array<i32>} : memref<8x8xf32, #tpu.memory_space<vmem>>, vector<1x8xf32>,
    %1117 = arith.mulf %211, %1115 : vector<1x8xf32>
    %cst_577 = arith.constant dense<0.000000e+00> : vector<1xf32>
    %1118 = vector.multi_reduction <add>, %1117, %cst_577 [1] : vector<1x8xf32> to vector<1xf32>
    %1119 = vector.shape_cast %1118 : vector<1xf32> to vector<1x1xf32>
    %c4_i32_578 = arith.constant 4 : i32
    %1120 = vector.broadcast %c4_i32_578 : i32 to vector<1x8xi32>
    %1121 = arith.cmpi eq, %25, %1120 : vector<1x8xi32>
    %1122 = vector.shape_cast %1119 : vector<1x1xf32> to vector<1x1xf32>
    %1123 = vector.broadcast %1122 : vector<1x1xf32> to vector<1x8xf32>
    %1124 = arith.select %1121, %1123, %1110 : vector<1x8xi1>, vector<1x8xf32>
    %c5_579 = arith.constant 5 : index
    %c0_580 = arith.constant 0 : index
    %1125 = vector.load %arg5[%c5_579, %c0_580] : memref<8x8xf32, #tpu.memory_space<vmem>>, vector<1x8xf32>
    %c5_581 = arith.constant 5 : index
    %c0_582 = arith.constant 0 : index
    %1126 = vector.load %arg6[%c5_581, %c0_582] : memref<8x8xf32, #tpu.memory_space<vmem>>, vector<1x8xf32>
    %1127 = arith.minimumf %1124, %1046 : vector<1x8xf32>
    %1128 = arith.minimumf %1127, %1126 : vector<1x8xf32>
    %1129 = arith.addf %1125, %1128 : vector<1x8xf32>
    %c5_583 = arith.constant 5 : index
    %c0_584 = arith.constant 0 : index
    %1130 = vector.load %arg7[%c5_583, %c0_584] : memref<8x8xf32, #tpu.memory_space<vmem>>, vector<1x8xf32>
    tpu.vector_store %arg7[%c5_583, %c0_584], %1129 {strides = array<i32>} : memref<8x8xf32, #tpu.memory_space<vmem>>, vector<1x8xf32>,
    %1131 = arith.mulf %217, %1129 : vector<1x8xf32>
    %cst_585 = arith.constant dense<0.000000e+00> : vector<1xf32>
    %1132 = vector.multi_reduction <add>, %1131, %cst_585 [1] : vector<1x8xf32> to vector<1xf32>
    %1133 = vector.shape_cast %1132 : vector<1xf32> to vector<1x1xf32>
    %c5_i32_586 = arith.constant 5 : i32
    %1134 = vector.broadcast %c5_i32_586 : i32 to vector<1x8xi32>
    %1135 = arith.cmpi eq, %25, %1134 : vector<1x8xi32>
    %1136 = vector.shape_cast %1133 : vector<1x1xf32> to vector<1x1xf32>
    %1137 = vector.broadcast %1136 : vector<1x1xf32> to vector<1x8xf32>
    %1138 = arith.select %1135, %1137, %1124 : vector<1x8xi1>, vector<1x8xf32>
    %c6_587 = arith.constant 6 : index
    %c0_588 = arith.constant 0 : index
    %1139 = vector.load %arg5[%c6_587, %c0_588] : memref<8x8xf32, #tpu.memory_space<vmem>>, vector<1x8xf32>
    %c6_589 = arith.constant 6 : index
    %c0_590 = arith.constant 0 : index
    %1140 = vector.load %arg6[%c6_589, %c0_590] : memref<8x8xf32, #tpu.memory_space<vmem>>, vector<1x8xf32>
    %1141 = arith.minimumf %1138, %1046 : vector<1x8xf32>
    %1142 = arith.minimumf %1141, %1140 : vector<1x8xf32>
    %1143 = arith.addf %1139, %1142 : vector<1x8xf32>
    %c6_591 = arith.constant 6 : index
    %c0_592 = arith.constant 0 : index
    %1144 = vector.load %arg7[%c6_591, %c0_592] : memref<8x8xf32, #tpu.memory_space<vmem>>, vector<1x8xf32>
    tpu.vector_store %arg7[%c6_591, %c0_592], %1143 {strides = array<i32>} : memref<8x8xf32, #tpu.memory_space<vmem>>, vector<1x8xf32>,
    %1145 = arith.mulf %223, %1143 : vector<1x8xf32>
    %cst_593 = arith.constant dense<0.000000e+00> : vector<1xf32>
    %1146 = vector.multi_reduction <add>, %1145, %cst_593 [1] : vector<1x8xf32> to vector<1xf32>
    %1147 = vector.shape_cast %1146 : vector<1xf32> to vector<1x1xf32>
    %c6_i32_594 = arith.constant 6 : i32
    %1148 = vector.broadcast %c6_i32_594 : i32 to vector<1x8xi32>
    %1149 = arith.cmpi eq, %25, %1148 : vector<1x8xi32>
    %1150 = vector.shape_cast %1147 : vector<1x1xf32> to vector<1x1xf32>
    %1151 = vector.broadcast %1150 : vector<1x1xf32> to vector<1x8xf32>
    %1152 = arith.select %1149, %1151, %1138 : vector<1x8xi1>, vector<1x8xf32>
    %c7_595 = arith.constant 7 : index
    %c0_596 = arith.constant 0 : index
    %1153 = vector.load %arg5[%c7_595, %c0_596] : memref<8x8xf32, #tpu.memory_space<vmem>>, vector<1x8xf32>
    %c7_597 = arith.constant 7 : index
    %c0_598 = arith.constant 0 : index
    %1154 = vector.load %arg6[%c7_597, %c0_598] : memref<8x8xf32, #tpu.memory_space<vmem>>, vector<1x8xf32>
    %1155 = arith.minimumf %1152, %1046 : vector<1x8xf32>
    %1156 = arith.minimumf %1155, %1154 : vector<1x8xf32>
    %1157 = arith.addf %1153, %1156 : vector<1x8xf32>
    %c7_599 = arith.constant 7 : index
    %c0_600 = arith.constant 0 : index
    %1158 = vector.load %arg7[%c7_599, %c0_600] : memref<8x8xf32, #tpu.memory_space<vmem>>, vector<1x8xf32>
    tpu.vector_store %arg7[%c7_599, %c0_600], %1157 {strides = array<i32>} : memref<8x8xf32, #tpu.memory_space<vmem>>, vector<1x8xf32>,
    %1159 = arith.mulf %229, %1157 : vector<1x8xf32>
    %cst_601 = arith.constant dense<0.000000e+00> : vector<1xf32>
    %1160 = vector.multi_reduction <add>, %1159, %cst_601 [1] : vector<1x8xf32> to vector<1xf32>
    %1161 = vector.shape_cast %1160 : vector<1xf32> to vector<1x1xf32>
    %c7_i32_602 = arith.constant 7 : i32
    %1162 = vector.broadcast %c7_i32_602 : i32 to vector<1x8xi32>
    %1163 = arith.cmpi eq, %25, %1162 : vector<1x8xi32>
    %1164 = vector.shape_cast %1161 : vector<1x1xf32> to vector<1x1xf32>
    %1165 = vector.broadcast %1164 : vector<1x1xf32> to vector<1x8xf32>
    %1166 = arith.select %1163, %1165, %1152 : vector<1x8xi1>, vector<1x8xf32>
    %1167 = arith.mulf %235, %1166 : vector<1x8xf32>
    %1168 = vector.shape_cast %1167 : vector<1x8xf32> to vector<1x1x8xf32>
    %cst_603 = arith.constant dense<0.000000e+00> : vector<1xf32>
    %1169 = vector.multi_reduction <add>, %1168, %cst_603 [1, 2] : vector<1x1x8xf32> to vector<1xf32>
    %1170 = vector.shape_cast %1169 : vector<1xf32> to vector<1x1x1xf32>
    %1171 = vector.extract %1170[0, 0, 0] : f32 from vector<1x1x1xf32>
    %1172 = vector.broadcast %1171 : f32 to vector<1x1xf32>
    %c0_604 = arith.constant 0 : index
    %c0_605 = arith.constant 0 : index
    %c0_606 = arith.constant 0 : index
    %1173 = vector.load %arg4[%c0_604, %c0_605, %c0_606] : memref<1x1x1xf32, #tpu.memory_space<vmem>>, vector<1x1x1xf32>
    %1174 = vector.shape_cast %1173 : vector<1x1x1xf32> to vector<1x1xf32>
    %1175 = vector.shape_cast %1172 : vector<1x1xf32> to vector<1x1x1xf32>
    tpu.vector_store %arg4[%c0_604, %c0_605, %c0_606], %1175 {strides = array<i32>} : memref<1x1x1xf32, #tpu.memory_space<vmem>>, vector<1x1x1xf32>,
    return
  }
  func.func @transform_0(%arg0: i32) -> (i32, i32, i32) {
    %c0_i32 = arith.constant 0 : i32
    %c0_i32_0 = arith.constant 0 : i32
    %c0_i32_1 = arith.constant 0 : i32
    return %arg0, %c0_i32, %c0_i32_0 : i32, i32, i32
  }
  func.func @transform_1(%arg0: i32) -> (i32, i32, i32) {
    %c0_i32 = arith.constant 0 : i32
    %c0_i32_0 = arith.constant 0 : i32
    %c0_i32_1 = arith.constant 0 : i32
    return %arg0, %c0_i32, %c0_i32_0 : i32, i32, i32
  }
  func.func @transform_2(%arg0: i32) -> (i32, i32, i32) {
    %c0_i32 = arith.constant 0 : i32
    %c0_i32_0 = arith.constant 0 : i32
    %c0_i32_1 = arith.constant 0 : i32
    return %arg0, %c0_i32, %c0_i32_0 : i32, i32, i32
  }
  func.func @transform_3(%arg0: i32) -> (i32, i32, i32) {
    %c0_i32 = arith.constant 0 : i32
    %c0_i32_0 = arith.constant 0 : i32
    %c0_i32_1 = arith.constant 0 : i32
    return %arg0, %c0_i32, %c0_i32_0 : i32, i32, i32
  }
}

</mosaic_0001>

<bundles_post_ra>
// kernel: tpu_custom_call.1
= control target key start
LH: loop header
LB: loop body
LE: loop exit
PB: predicated region body
PF: predicated region fallthrough
CT: control target
= control target key end

     0   :  { %v177_v0 = vlaneseq  ;;  %s2069_s0 = inlined_call_operand.vmem [shape: f32[1,8,32], index: 0, kind: input, shape index: {}]   ;;  %s2070_s1 = inlined_call_operand.vmem [shape: f32[1,8,32], index: 1, kind: input, shape index: {}]   ;;  %s2071_s2 = inlined_call_operand.vmem [shape: f32[1,9,8], index: 2, kind: input, shape index: {}]   ;;  %s2072_s3 = inlined_call_operand.hbm [shape: f32[1,1,1], index: 3, kind: output, shape index: {}]  }
   0x1   :  { %8 = vsyncpa [#allocation6], 0  ;;  %v1349_v1 = vmov 0.0   ;;  %v1382_v4 = vld [vmem:[%s2071_s2] sm:$0xff]  ;;  %vm201_vm0 = vcmask 7168   ;;  %vm218_vm3 = vcmask 64512  }
   0x2   :  { %1292 = vmatprep.subr.mxu1 %v1349_v1  ;;  %1287 = vmatprep.subr.mxu0 %v1349_v1  ;;  %v1375_v2 = vshrl.u32 %v177_v0, 7  ;;  %v1377_v3 = vand.u32 127, %v177_v0  ;;  %vm19_vm14 = vcmask 261120   ;;  %s1352_s25 = smov [#allocation5]  }
   0x3   :  { %s1269_s26 = sshll.u32 %s1352_s25, 4  ;;  %s1270_s26 = int_to_ptr.vmem [resolvable:$true] %s1269_s26 }
   0x4   :  { %vm197_vm1 = vcmp.eq.s32.totalorder %v1375_v2, 0  ;;  %vm2076_vm2 = vcmp.eq.s32.totalorder %v1377_v3, 0  ;;  %vm231_vm4 = vcmp.eq.s32.totalorder %v1375_v2, 1  ;;  %vm247_vm5 = vcmp.eq.s32.totalorder %v1377_v3, 1  ;;  %s1325_s28 = scalar_lea.vmem %s1270_s26, 16  ;;  %s1329_s29 = scalar_lea.vmem %s1270_s26, 32 }
   0x5   :  { %v199_v5 = vsel %vm197_vm1, 1.0, %v1349_v1  ;;  %v216_v6 = vsel %vm2076_vm2, %v1382_v4, 0.0  ;;  %v248_v21 = vsel %vm247_vm5, %v1382_v4, 0.0  ;;  %vm277_vm6 = vcmp.eq.s32.totalorder %v1377_v3, 2  ;;  %p1326_p0 = scmp.ne.s32.totalorder %s1270_s26, %s1325_s28  ;;  %p1330_p1 = scmp.lt.s32.totalorder %s1270_s26, %s1270_s26 }
   0x6   :  { %v202_v7 = vsel %vm201_vm0, %v199_v5, 0.0  ;;  %v219_v8 = vsel %vm218_vm3, %v216_v6, 0.0  ;;  %v250_v23 = vsel %vm218_vm3, %v248_v21, 0.0  ;;  %v278_v24 = vsel %vm277_vm6, %v1382_v4, 0.0  ;;  %p1331_p2 = scmp.lt.s32.totalorder %s1329_s29, %s1325_s28 }
   0x7   :  { %206 = vadd.xlane.f32.xlu0 %v202_v7  ;;  %v280_v25 = vsel %vm218_vm3, %v278_v24, 0.0  ;;  %vm261_vm7 = vcmp.eq.s32.totalorder %v1375_v2, 2  ;;  %vm307_vm8 = vcmp.eq.s32.totalorder %v1377_v3, 3  ;;  %vm291_vm9 = vcmp.eq.s32.totalorder %v1375_v2, 3 }
   0x8   :  { %v308_v39 = vsel %vm307_vm8, %v1382_v4, 0.0  ;;  %vm2075_vm10 = vcmp.eq.s32.totalorder %v1377_v3, 4  ;;  %vm321_vm11 = vcmp.eq.s32.totalorder %v1375_v2, 4  ;;  %vm367_vm12 = vcmp.eq.s32.totalorder %v1377_v3, 5  ;;  %p1332_p3 = por %p1331_p2, %p1330_p1 }
   0x9   :  { %v310_v40 = vsel %vm218_vm3, %v308_v39, 0.0  ;;  %v338_v54 = vsel %vm2075_vm10, %v1382_v4, 0.0  ;;  %vm351_vm13 = vcmp.eq.s32.totalorder %v1375_v2, 5  ;;  %vm2074_vm15 = vcmp.eq.s32.totalorder %v1377_v3, 6 }
   0xa   :  { %v340_v55 = vsel %vm218_vm3, %v338_v54, 0.0  ;;  %vm1350_vm1 = vmmov 0   ;;  %p1333_p4 = pnand %p1332_p3, %p1326_p0 }
   0xb   :  { %220 = vadd.xlane.f32.xlu0 %v219_v8  ;;  %1294 = vmatprep.mubr.msk.f32.mxu1 %vm1350_vm1, %v1349_v1 }
   0xc   :  { %1289 = vmatprep.mubr.msk.f32.mxu0 %vm1350_vm1, %v1349_v1  ;;  %vm2073_vm1 = vcmp.eq.s32.totalorder %v1375_v2, 6 }
  0x94   :  { %v207_v9 = vpop.xlane.xlu0 %206 }
  0x95   :  { %v208_v10 = vrot.slane %v207_v9, 4 }
  0x97   :  { %v209_v11 = vadd.f32 %v208_v10, %v207_v9  ;;  %v368_v9 = vsel %vm367_vm12, %v1382_v4, 0.0 }
  0x98   :  { %v221_v16 = vpop.xlane.xlu0 %220  ;;  %v370_v10 = vsel %vm218_vm3, %v368_v9, 0.0 }
  0x99   :  { %v210_v12 = vrot.slane %v209_v11, 2 }
  0x9b   :  { %v211_v13 = vadd.f32 %v210_v12, %v209_v11 }
  0x9d   :  { %v212_v14 = vrot.slane %v211_v13, 1 }
  0x9f   :  { %v213_v15 = vadd.f32 %v212_v14, %v211_v13 }
  0xa1   :  { %1297 = vpush %v213_v15 }
  0xd2   :  { %s1392_s14 = spop %1297 }
  0xd3   :  { %v226_v17 = vstv %s1392_s14 }
  0xd4   :  { %v227_v18 = vmul.f32 %v226_v17, %v221_v16 }
  0xd6   :  { %v229_v19 = vadd.f32 %v227_v18, %v199_v5 }
  0xd8   :  { %v233_v20 = vsel %vm231_vm4, %v229_v19, 0.0 }
  0xd9   :  { %v235_v22 = vsel %vm201_vm0, %v233_v20, 0.0 }
  0xda   :  { %238 = vadd.xlane.f32.xlu1 %v235_v22 }
  0xde   :  { %251 = vadd.xlane.f32.xlu1 %v250_v23 }
  0xe2   :  { %281 = vadd.xlane.f32.xlu1 %v280_v25  ;;  %v16_v25 = vld [vmem:[%s2070_s1] sm:$0xff] }
  0xe6   :  { %311 = vadd.xlane.f32.xlu1 %v310_v40 }
  0xea   :  { %341 = vadd.xlane.f32.xlu1 %v340_v55 }
  0xee   :  { %371 = vadd.xlane.f32.xlu1 %v370_v10 }
 0x167   :  { %v239_v26 = vpop.xlane.xlu1 %238 }
 0x168   :  { %v240_v27 = vrot.slane %v239_v26, 4 }
 0x16a   :  { %v241_v28 = vadd.f32 %v240_v27, %v239_v26  ;;  %v173_v26 = vmul.f32 %v16_v25, %v16_v25 }
 0x16b   :  { %v252_v33 = vpop.xlane.xlu1 %251 }
 0x16c   :  { %v242_v29 = vrot.slane %v241_v28, 2  ;;  %v174_v27 = vsel %vm19_vm14, %v173_v26, 0.0 }
 0x16e   :  { %v243_v30 = vadd.f32 %v242_v29, %v241_v28  ;;  %v15_v28 = vld [vmem:[%s2069_s0] sm:$0xff] }
 0x16f   :  { %v282_v48 = vpop.xlane.xlu1 %281  ;;  %v96_v29 = vmul.f32 %v15_v28, %v15_v28  ;;  %1288 = vmatpush3.xpose.msk.msra.mxu0 %vm19_vm14, %v15_v28 }
 0x170   :  { %v244_v31 = vrot.slane %v243_v30, 1 }
 0x171   :  { %1293 = vmatpush3.xpose.msk.msra.mxu1 %vm19_vm14, %v96_v29 }
 0x172   :  { %v245_v32 = vadd.f32 %v244_v31, %v243_v30  ;;  %v398_v30 = vsel %vm2074_vm15, %v1382_v4, 0.0  ;;  %1290 = vmatmul.mubr.msk.f32.vlgmr.msra.gmra.mrb[0].mxu0 %vm19_vm14, %v16_v25 }
 0x173   :  { %v312_v63 = vpop.xlane.xlu1 %311  ;;  %v400_v31 = vsel %vm218_vm3, %v398_v30, 0.0 }
 0x174   :  { %1299 = vpush %v245_v32  ;;  %401 = vadd.xlane.f32.xlu1 %v400_v31  ;;  %v1351_v32 = vmov 1.0  }
 0x175   :  { %1295 = vmatmul.mubr.msk.f32.vlgmr.msra.gmra.mrb[0].mxu1 %vm19_vm14, %v1351_v32  ;;  %vm222_vm14 = vcmask 57344  }
 0x1a5   :  { %s1411_s15 = spop %1299 }
 0x1a6   :  { %v256_v34 = vstv %s1411_s15 }
 0x1a7   :  { %v257_v35 = vmul.f32 %v256_v34, %v252_v33 }
 0x1a9   :  { %v259_v36 = vadd.f32 %v257_v35, %v229_v19  ;;  %v342_v19 = vpop.xlane.xlu1 %341 }
 0x1ab   :  { %v263_v37 = vsel %vm261_vm7, %v259_v36, 0.0 }
 0x1ac   :  { %v265_v38 = vsel %vm201_vm0, %v263_v37, 0.0 }
 0x1ad   :  { %268 = vadd.xlane.f32.xlu0 %v265_v38 }
 0x23a   :  { %v269_v41 = vpop.xlane.xlu0 %268 }
 0x23b   :  { %v270_v42 = vrot.slane %v269_v41, 4 }
 0x23d   :  { %v271_v43 = vadd.f32 %v270_v42, %v269_v41  ;;  %v372_v41 = vpop.xlane.xlu1 %371 }
 0x23f   :  { %v272_v44 = vrot.slane %v271_v43, 2 }
 0x241   :  { %v273_v45 = vadd.f32 %v272_v44, %v271_v43 }
 0x243   :  { %v274_v46 = vrot.slane %v273_v45, 1 }
 0x245   :  { %v275_v47 = vadd.f32 %v274_v46, %v273_v45 }
 0x247   :  { %1301 = vpush %v275_v47  ;;  %v1492_v47 = vld [vmem:[%s2071_s2 + $0x8] sm:$0x1] }
 0x248   :  { %v399_v55 = vsel %vm2074_vm15, %v1492_v47, 0.0  ;;  %vm411_vm15 = vcmp.eq.s32.totalorder %v1375_v2, 7  ;;  %v249_v25 = vsel %vm247_vm5, %v1492_v47, 0.0  ;;  %v309_v29 = vsel %vm307_vm8, %v1492_v47, 0.0 }
 0x249   :  { %v253_v28 = vsel %vm222_vm14, %v249_v25, 0.0  ;;  %v313_v31 = vsel %vm222_vm14, %v309_v29, 0.0  ;;  %v369_v32 = vsel %vm367_vm12, %v1492_v47, 0.0 }
 0x278   :  { %s1425_s16 = spop %1301 }
 0x279   :  { %v286_v49 = vstv %s1425_s16 }
 0x27a   :  { %v287_v50 = vmul.f32 %v286_v49, %v282_v48  ;;  %v217_v48 = vsel %vm2076_vm2, %v1492_v47, 0.0 }
 0x27c   :  { %v289_v51 = vadd.f32 %v287_v50, %v259_v36  ;;  %v223_v50 = vsel %vm222_vm14, %v217_v48, 0.0 }
 0x27e   :  { %v293_v52 = vsel %vm291_vm9, %v289_v51, 0.0 }
 0x27f   :  { %v295_v53 = vsel %vm201_vm0, %v293_v52, 0.0 }
 0x280   :  { %298 = vadd.xlane.f32.xlu0 %v295_v53  ;;  %v339_v53 = vsel %vm2075_vm10, %v1492_v47, 0.0 }
 0x281   :  { %v343_v54 = vsel %vm222_vm14, %v339_v53, 0.0 }
 0x30d   :  { %v299_v56 = vpop.xlane.xlu0 %298 }
 0x30e   :  { %v300_v57 = vrot.slane %v299_v56, 4 }
 0x310   :  { %v301_v58 = vadd.f32 %v300_v57, %v299_v56  ;;  %v403_v56 = vsel %vm222_vm14, %v399_v55, 0.0 }
 0x312   :  { %v302_v59 = vrot.slane %v301_v58, 2 }
 0x314   :  { %v303_v60 = vadd.f32 %v302_v59, %v301_v58  ;;  %v92_v59 = vpop.f32.mrb[0].mxu0 }
 0x315   :  { %v182_v9 = vmul.f32 2.0, %v92_v59 }
 0x316   :  { %v304_v61 = vrot.slane %v303_v60, 1 }
 0x318   :  { %v305_v62 = vadd.f32 %v304_v61, %v303_v60  ;;  %v1291_v60 = vpop.f32.mrb[1].mxu0  ;;  %v169_v61 = vpop.f32.mrb[0].mxu1 }
 0x31a   :  { %1303 = vpush %v305_v62  ;;  %v1296_v62 = vpop.f32.mrb[1].mxu1 }
 0x34b   :  { %s1439_s17 = spop %1303 }
 0x34c   :  { %v316_v0 = vstv %s1439_s17 }
 0x34d   :  { %v317_v5 = vmul.f32 %v316_v0, %v312_v63  ;;  %v179_v63 = vsub.s32 0, %v1375_v2 }
 0x34f   :  { %v319_v6 = vadd.f32 %v317_v5, %v289_v51  ;;  %v279_v51 = vsel %vm277_vm6, %v1492_v47, 0.0 }
 0x350   :  { %v283_v52 = vsel %vm222_vm14, %v279_v51, 0.0 }
 0x351   :  { %v323_v7 = vsel %vm321_vm11, %v319_v6, 0.0 }
 0x352   :  { %v325_v8 = vsel %vm201_vm0, %v323_v7, 0.0  ;;  %v180_v7 = vrot.slane %v169_v61, %v179_v63 }
 0x353   :  { %328 = vadd.xlane.f32.xlu0 %v325_v8 }
 0x3e0   :  { %v329_v11 = vpop.xlane.xlu0 %328 }
 0x3e1   :  { %v330_v12 = vrot.slane %v329_v11, 4 }
 0x3e3   :  { %v331_v13 = vadd.f32 %v330_v12, %v329_v11 }
 0x3e5   :  { %v332_v14 = vrot.slane %v331_v13, 2 }
 0x3e7   :  { %v333_v15 = vadd.f32 %v332_v14, %v331_v13 }
 0x3e9   :  { %v334_v16 = vrot.slane %v333_v15, 1 }
 0x3eb   :  { %v335_v18 = vadd.f32 %v334_v16, %v333_v15 }
 0x3ed   :  { %1305 = vpush %v335_v18 }
 0x41e   :  { %s1453_s18 = spop %1305 }
 0x41f   :  { %v346_v20 = vstv %s1453_s18 }
 0x420   :  { %v347_v21 = vmul.f32 %v346_v20, %v342_v19  ;;  %v402_v19 = vpop.xlane.xlu1 %401 }
 0x422   :  { %v349_v22 = vadd.f32 %v347_v21, %v319_v6 }
 0x424   :  { %v353_v23 = vsel %vm351_vm13, %v349_v22, 0.0 }
 0x425   :  { %v355_v24 = vsel %vm201_vm0, %v353_v23, 0.0 }
 0x426   :  { %358 = vadd.xlane.f32.xlu0 %v355_v24 }
 0x4b3   :  { %v359_v33 = vpop.xlane.xlu0 %358 }
 0x4b4   :  { %v360_v35 = vrot.slane %v359_v33, 4 }
 0x4b6   :  { %v361_v36 = vadd.f32 %v360_v35, %v359_v33 }
 0x4b8   :  { %v362_v37 = vrot.slane %v361_v36, 2 }
 0x4ba   :  { %v363_v38 = vadd.f32 %v362_v37, %v361_v36  ;;  %v373_v36 = vsel %vm222_vm14, %v369_v32, 0.0 }
 0x4bc   :  { %v364_v39 = vrot.slane %v363_v38, 1 }
 0x4be   :  { %v365_v40 = vadd.f32 %v364_v39, %v363_v38 }
 0x4c0   :  { %1307 = vpush %v365_v40 }
 0x4f1   :  { %s1480_s0 = spop %1307 }
 0x4f2   :  { %v376_v42 = vstv %s1480_s0 }
 0x4f3   :  { %v377_v43 = vmul.f32 %v376_v42, %v372_v41 }
 0x4f5   :  { %v379_v44 = vadd.f32 %v377_v43, %v349_v22 }
 0x4f7   :  { %v383_v45 = vsel %vm2073_vm1, %v379_v44, 0.0  ;;  %vm2077_vm1 = vcmp.eq.s32.totalorder %v1377_v3, 7 }
 0x4f8   :  { %v385_v46 = vsel %vm201_vm0, %v383_v45, 0.0  ;;  %v429_v57 = vsel %vm2077_vm1, %v1492_v47, 0.0  ;;  %v428_v37 = vsel %vm2077_vm1, %v1382_v4, 0.0 }
 0x4f9   :  { %388 = vadd.xlane.f32.xlu0 %v385_v46  ;;  %v433_v58 = vsel %vm222_vm14, %v429_v57, 0.0  ;;  %v430_v39 = vsel %vm218_vm3, %v428_v37, 0.0 }
 0x4fd   :  { %175 = vadd.xlane.f32.xlu0 %v174_v27 }
 0x501   :  { %224 = vadd.xlane.f32.xlu0 %v223_v50 }
 0x505   :  { %284 = vadd.xlane.f32.xlu0 %v283_v52 }
 0x509   :  { %344 = vadd.xlane.f32.xlu0 %v343_v54 }
 0x50d   :  { %404 = vadd.xlane.f32.xlu0 %v403_v56 }
 0x511   :  { %434 = vadd.xlane.f32.xlu0 %v433_v58 }
 0x586   :  { %v389_v5 = vpop.xlane.xlu0 %388 }
 0x587   :  { %v390_v6 = vrot.slane %v389_v5, 4 }
 0x589   :  { %v391_v8 = vadd.f32 %v390_v6, %v389_v5 }
 0x58a   :  { %v176_v10 = vpop.xlane.xlu0 %175 }
 0x58b   :  { %v392_v11 = vrot.slane %v391_v8, 2  ;;  %v181_v12 = vadd.f32 %v180_v7, %v176_v10 }
 0x58d   :  { %v393_v13 = vadd.f32 %v392_v11, %v391_v8  ;;  %v183_v14 = vsub.f32 %v181_v12, %v182_v9 }
 0x58e   :  { %v225_v61 = vpop.xlane.xlu0 %224 }
 0x58f   :  { %v394_v15 = vrot.slane %v393_v13, 1  ;;  %v184_v18 = vmax.f32 %v183_v14, 0.0  ;;  %v228_v63 = vmul.f32 %v226_v17, %v225_v61 }
 0x591   :  { %v395_v16 = vadd.f32 %v394_v15, %v393_v13  ;;  %1319 = vrsqrt.f32 %v184_v18  ;;  %vm187_vm10 = vcmp.eq.f32.partialorder %v184_v18, inf  ;;  %v190_v33 = vand.u32 2147483648, %v184_v18 }
 0x592   :  { %v285_v5 = vpop.xlane.xlu0 %284 }
 0x593   :  { %1309 = vpush %v395_v16  ;;  %v288_v7 = vmul.f32 %v286_v49, %v285_v5 }
 0x596   :  { %v345_v10 = vpop.xlane.xlu0 %344 }
 0x597   :  { %v348_v12 = vmul.f32 %v346_v20, %v345_v10 }
 0x59a   :  { %v405_v15 = vpop.xlane.xlu0 %404 }
 0x59b   :  { %v1320_v27 = vpop.eup %1319 }
 0x59c   :  { %v186_v30 = vmul.f32 %v1320_v27, %v184_v18 }
 0x59e   :  { %v188_v35 = vsel %vm187_vm10, %v184_v18, %v186_v30  ;;  %vm441_vm10 = vcmp.eq.s32.totalorder %v1375_v2, %v1377_v3 }
 0x5c4   :  { %s1516_s2 = spop %1309 }
 0x5c5   :  { %v406_v21 = vstv %s1516_s2 }
 0x5c6   :  { %v407_v22 = vmul.f32 %v406_v21, %v402_v19  ;;  %v408_v17 = vmul.f32 %v406_v21, %v405_v15 }
 0x5c8   :  { %v1522_v23 = vadd.f32 %v407_v22, %v379_v44  ;;  %v1281_v22 = vsel %vm441_vm10, 1.0, %v1349_v1 }
 0x5ca   :  { %v413_v24 = vsel %vm411_vm15, %v1522_v23, 0.0 }
 0x5cb   :  { %v415_v26 = vsel %vm201_vm0, %v413_v24, 0.0  ;;  %vm189_vm0 = vcmp.eq.f32.partialorder %v184_v18, 0.0  ;;  %v435_v18 = vpop.xlane.xlu0 %434 }
 0x5cc   :  { %418 = vadd.xlane.f32.xlu1 %v415_v26  ;;  %v1543_v38 = vsel %vm189_vm0, %v190_v33, %v188_v35 }
 0x5cd   :  { %v564_v40 = vsel %vm2076_vm2, %v1543_v38, 0.0 }
 0x5ce   :  { %v565_v41 = vsel %vm218_vm3, %v564_v40, 0.0 }
 0x5d0   :  { %254 = vadd.xlane.f32.xlu1 %v253_v28 }
 0x5d4   :  { %314 = vadd.xlane.f32.xlu1 %v313_v31 }
 0x5d8   :  { %374 = vadd.xlane.f32.xlu1 %v373_v36 }
 0x5dc   :  { %431 = vadd.xlane.f32.xlu1 %v430_v39 }
 0x5e0   :  { %566 = vadd.xlane.f32.xlu1 %v565_v41 }
 0x659   :  { %v419_v43 = vpop.xlane.xlu1 %418 }
 0x65a   :  { %v420_v44 = vrot.slane %v419_v43, 4 }
 0x65c   :  { %v421_v45 = vadd.f32 %v420_v44, %v419_v43 }
 0x65d   :  { %v255_v46 = vpop.xlane.xlu1 %254 }
 0x65e   :  { %v422_v48 = vrot.slane %v421_v45, 2  ;;  %v258_v62 = vmul.f32 %v256_v34, %v255_v46  ;;  %v194_v34 = vadd.s32 8, %v1375_v2 }
 0x660   :  { %v423_v50 = vadd.f32 %v422_v48, %v421_v45  ;;  %v260_v6 = vadd.f32 %v258_v62, %v228_v63  ;;  %vm442_vm0 = vcmp.eq.s32.totalorder %v194_v34, %v1377_v3  ;;  %vm552_vm10 = vcmp.eq.s32.totalorder %v194_v34, 8 }
 0x661   :  { %v315_v51 = vpop.xlane.xlu1 %314 }
 0x662   :  { %v424_v52 = vrot.slane %v423_v50, 1  ;;  %v290_v8 = vadd.f32 %v288_v7, %v260_v6  ;;  %v318_v9 = vmul.f32 %v316_v0, %v315_v51 }
 0x664   :  { %v425_v53 = vadd.f32 %v424_v52, %v423_v50  ;;  %v320_v11 = vadd.f32 %v318_v9, %v290_v8 }
 0x665   :  { %v375_v54 = vpop.xlane.xlu1 %374 }
 0x666   :  { %1311 = vpush %v425_v53  ;;  %v350_v13 = vadd.f32 %v348_v12, %v320_v11  ;;  %v378_v14 = vmul.f32 %v376_v42, %v375_v54  ;;  %v1282_v42 = vsel %vm442_vm0, 1.0, %v1349_v1  ;;  %vm466_vm0 = vcmp.lt.s32.totalorder %v1377_v3, %v1375_v2 }
 0x668   :  { %v380_v16 = vadd.f32 %v378_v14, %v350_v13 }
 0x669   :  { %v432_v55 = vpop.xlane.xlu1 %431 }
 0x66a   :  { %v410_v19 = vadd.f32 %v408_v17, %v380_v16 }
 0x66d   :  { %v567_v56 = vpop.xlane.xlu1 %566 }
 0x66e   :  { %568 = vst.msk [vmem:[#allocation2] sm:$0xff] %vm218_vm3, %v567_v56 }
 0x675   :  { %v569_v57 = vld [vmem:[#allocation2] sm:$0x1]  ;;  %v571_v58 = vld [vmem:[#allocation2 + $0x1] sm:$0x1]  ;;  %v579_v8 = vld [vmem:[#allocation2 + $0x2] sm:$0x1] }
 0x676   :  { %v1553_v59 = vsel %vm2076_vm2, %v569_v57, 0.0 }
 0x677   :  { %v1556_v60 = vadd.f32 %v571_v58, %v1553_v59 }
 0x679   :  { %573 = vst.msk [vmem:[#allocation3 + $0x1] sm:$0x1] %vm222_vm14, %v1556_v60 }
 0x697   :  { %s1312_s24 = spop %1311 }
 0x698   :  { %v436_v49 = vstv %s1312_s24 }
 0x699   :  { %v437_v0 = vmul.f32 %v436_v49, %v432_v55  ;;  %v438_v20 = vmul.f32 %v436_v49, %v435_v18  ;;  %v587_v49 = vld [vmem:[#allocation2 + $0x3] sm:$0x1] }
 0x69b   :  { %v439_v24 = vadd.f32 %v437_v0, %v1522_v23  ;;  %v440_v25 = vadd.f32 %v438_v20, %v410_v19 }
 0x69d   :  { %v447_v26 = vmul.f32 %v1281_v22, %v439_v24  ;;  %v448_v27 = vmul.f32 %v1282_v42, %v440_v25  ;;  %v458_v29 = vadd.f32 1e-06, %v439_v24  ;;  %v459_v31 = vadd.f32 1e-06, %v440_v25 }
 0x69f   :  { %v449_v21 = vsel %vm218_vm3, %v447_v26, 0.0  ;;  %v450_v28 = vsel %vm222_vm14, %v448_v27, 0.0  ;;  %1321 = vrcp.f32 %v458_v29 }
 0x6a0   :  { %v451_v30 = vadd.f32 %v450_v28, %v449_v21  ;;  %1323 = vrcp.f32 %v459_v31  ;;  %v595_v31 = vld [vmem:[#allocation2 + $0x4] sm:$0x1] }
 0x6a2   :  { %v452_v32 = vrot.slane %v451_v30, 4 }
 0x6a4   :  { %v453_v33 = vadd.f32 %v452_v32, %v451_v30 }
 0x6a6   :  { %v454_v35 = vrot.slane %v453_v33, 2 }
 0x6a8   :  { %v455_v36 = vadd.f32 %v454_v35, %v453_v33 }
 0x6a9   :  { %v1322_v39 = vpop.eup %1321 }
 0x6aa   :  { %v456_v37 = vrot.slane %v455_v36, 1  ;;  %v1324_v41 = vpop.eup %1323 }
 0x6ac   :  { %v457_v1 = vadd.f32 %v456_v37, %v455_v36 }
 0x6ae   :  { %v462_v23 = vmul.f32 %v457_v1, %v1382_v4  ;;  %v463_v40 = vmul.f32 %v457_v1, %v1492_v47 }
 0x6b0   :  { %v464_v43 = vmul.f32 %v1322_v39, %v462_v23  ;;  %v465_v44 = vmul.f32 %v1324_v41, %v463_v40 }
 0x6b2   :  { %vm468_vm2 = vcmp.gt.f32.partialorder %v464_v43, 0.0  ;;  %v1587_v45 = vsel %vm552_vm10, %v465_v44, 0.0 }
 0x6b3   :  { %vm470_vm1 = vmand %vm466_vm0, %vm468_vm2  ;;  %vm2078_vm2 = vcmp.eq.s32.totalorder %v1377_v3, 4 }
 0x6b4   :  { %v1589_v46 = vsel %vm470_vm1, %v464_v43, 0.0 }
 0x6b5   :  { %v474_v48 = vsel %vm231_vm4, %v1589_v46, 0.0  ;;  %v485_v57 = vsel %vm261_vm7, %v1589_v46, 0.0  ;;  %v496_v13 = vsel %vm291_vm9, %v1589_v46, 0.0  ;;  %v507_v24 = vsel %vm321_vm11, %v1589_v46, 0.0 }
 0x6b6   :  { %v476_v4 = vsel %vm218_vm3, %v474_v48, 0.0  ;;  %v487_v58 = vsel %vm218_vm3, %v485_v57, 0.0  ;;  %v498_v14 = vsel %vm218_vm3, %v496_v13, 0.0  ;;  %v509_v25 = vsel %vm218_vm3, %v507_v24, 0.0 }
 0x6b7   :  { %v479_v47 = vrot.slane %v476_v4, 4  ;;  %v490_v61 = vrot.slane %v487_v58, 4  ;;  %v501_v15 = vrot.slane %v498_v14, 4  ;;  %v512_v26 = vrot.slane %v509_v25, 4 }
 0x6b8   :  { %v518_v1 = vsel %vm351_vm13, %v1589_v46, 0.0  ;;  %vm2079_vm4 = vcmp.eq.s32.totalorder %v1375_v2, 6  ;;  %vm2080_vm7 = vcmp.eq.s32.totalorder %v1377_v3, 6  ;;  %vm2081_vm9 = vcmp.eq.s32.totalorder %v1377_v3, 7 }
 0x6b9   :  { %v480_v50 = vadd.f32 %v479_v47, %v476_v4  ;;  %v491_v62 = vadd.f32 %v490_v61, %v487_v58  ;;  %v502_v34 = vadd.f32 %v501_v15, %v498_v14  ;;  %v513_v27 = vadd.f32 %v512_v26, %v509_v25  ;;  %v603_v4 = vld [vmem:[#allocation2 + $0x5] sm:$0x1]  ;;  %vm2085_vm1 = vmmov %vm2080_vm7 }
 0x6ba   :  { %v520_v39 = vsel %vm218_vm3, %v518_v1, 0.0  ;;  %v540_v14 = vsel %vm411_vm15, %v1589_v46, 0.0  ;;  %vm2082_vm11 = vcmp.eq.s32.totalorder %v1377_v3, 0  ;;  %vm2084_vm15 = vmmov %vm2078_vm2 }
 0x6bb   :  { %v481_v51 = vrot.slane %v480_v50, 2  ;;  %v492_v63 = vrot.slane %v491_v62, 2  ;;  %v503_v16 = vrot.slane %v502_v34, 2  ;;  %v514_v21 = vrot.slane %v513_v27, 2  ;;  %vm2083_vm13 = vmmov %vm2082_vm11 }
 0x6bc   :  { %v523_v23 = vrot.slane %v520_v39, 4  ;;  %v542_v15 = vsel %vm218_vm3, %v540_v14, 0.0  ;;  %vm2086_vm10 = vmmov %vm2081_vm9 }
 0x6bd   :  { %v482_v52 = vadd.f32 %v481_v51, %v480_v50  ;;  %v493_v5 = vadd.f32 %v492_v63, %v491_v62  ;;  %v515_v28 = vadd.f32 %v514_v21, %v513_v27  ;;  %vm2087_vm0 = vmmov %vm2082_vm11 }
 0x6be   :  { %v524_v40 = vadd.f32 %v523_v23, %v520_v39 }
 0x6bf   :  { %v483_v53 = vrot.slane %v482_v52, 1  ;;  %v494_v6 = vrot.slane %v493_v5, 1  ;;  %v516_v29 = vrot.slane %v515_v28, 1 }
 0x6c0   :  { %v525_v41 = vrot.slane %v524_v40, 2 }
 0x6c1   :  { %v1595_v54 = vadd.f32 %v483_v53, %v482_v52  ;;  %v1607_v10 = vadd.f32 %v494_v6, %v493_v5  ;;  %v1629_v35 = vadd.f32 %v516_v29, %v515_v28  ;;  %v611_v6 = vld [vmem:[#allocation2 + $0x6] sm:$0x1] }
 0x6c2   :  { %v526_v43 = vadd.f32 %v525_v41, %v524_v40 }
 0x6c3   :  { %v574_v55 = vmul.f32 %v1556_v60, %v1595_v54 }
 0x6c4   :  { %v527_v44 = vrot.slane %v526_v43, 1 }
 0x6c5   :  { %v575_v56 = vsel %vm222_vm14, %v574_v55, 0.0  ;;  %v529_v55 = vsel %vm2079_vm4, %v1589_v46, 0.0  ;;  %vm2089_vm4 = vmmov %vm2084_vm15 }
 0x6c6   :  { %576 = vadd.xlane.f32.xlu0 %v575_v56  ;;  %v1640_v51 = vadd.f32 %v527_v44, %v526_v43  ;;  %v531_v56 = vsel %vm218_vm3, %v529_v55, 0.0 }
 0x6c7   :  { %v534_v57 = vrot.slane %v531_v56, 4 }
 0x6c9   :  { %v535_v58 = vadd.f32 %v534_v57, %v531_v56 }
 0x6cb   :  { %v536_v61 = vrot.slane %v535_v58, 2 }
 0x6cd   :  { %v537_v62 = vadd.f32 %v536_v61, %v535_v58 }
 0x6cf   :  { %v538_v63 = vrot.slane %v537_v62, 1 }
 0x753   :  { %v577_v7 = vpop.xlane.xlu0 %576 }
 0x754   :  { %v578_v60 = vsel %vm247_vm5, %v577_v7, %v1553_v59  ;;  %v504_v59 = vadd.f32 %v503_v16, %v502_v34  ;;  %v545_v34 = vrot.slane %v542_v15, 4 }
 0x755   :  { %v580_v9 = vadd.f32 %v579_v8, %v578_v60 }
 0x756   :  { %v505_v18 = vrot.slane %v504_v59, 1  ;;  %v546_v16 = vadd.f32 %v545_v34, %v542_v15 }
 0x757   :  { %581 = vst.msk [vmem:[#allocation3 + $0x2] sm:$0x1] %vm222_vm14, %v580_v9  ;;  %v582_v11 = vmul.f32 %v580_v9, %v1607_v10 }
 0x758   :  { %v1618_v20 = vadd.f32 %v505_v18, %v504_v59  ;;  %v547_v59 = vrot.slane %v546_v16, 2 }
 0x759   :  { %v583_v12 = vsel %vm222_vm14, %v582_v11, 0.0 }
 0x75a   :  { %584 = vadd.xlane.f32.xlu1 %v583_v12  ;;  %v627_v12 = vsel %vm247_vm5, %v1543_v38, 0.0  ;;  %v548_v18 = vadd.f32 %v547_v59, %v546_v16 }
 0x75b   :  { %v628_v13 = vsel %vm218_vm3, %v627_v12, 0.0 }
 0x75e   :  { %v651_v44 = vld [vmem:[#allocation3 + $0x2] sm:$0x1] }
 0x7e7   :  { %v585_v17 = vpop.xlane.xlu1 %584 }
 0x7e8   :  { %v586_v0 = vsel %vm277_vm6, %v585_v17, %v578_v60  ;;  %v1651_v60 = vadd.f32 %v538_v63, %v537_v62  ;;  %v549_v17 = vrot.slane %v548_v18, 1 }
 0x7e9   :  { %v588_v19 = vadd.f32 %v587_v49, %v586_v0 }
 0x7eb   :  { %589 = vst.msk [vmem:[#allocation3 + $0x3] sm:$0x1] %vm222_vm14, %v588_v19  ;;  %v590_v22 = vmul.f32 %v588_v19, %v1618_v20 }
 0x7ed   :  { %v591_v42 = vsel %vm222_vm14, %v590_v22, 0.0 }
 0x7ee   :  { %592 = vadd.xlane.f32.xlu0 %v591_v42  ;;  %v1666_v42 = vadd.f32 %v549_v17, %v548_v18 }
 0x7f2   :  { %v662_v57 = vld [vmem:[#allocation3 + $0x3] sm:$0x1] }
 0x87b   :  { %v593_v30 = vpop.xlane.xlu0 %592 }
 0x87c   :  { %v594_v32 = vsel %vm307_vm8, %v593_v30, %v586_v0  ;;  %v619_v0 = vld [vmem:[#allocation2 + $0x7] sm:$0x1] }
 0x87d   :  { %v596_v33 = vadd.f32 %v595_v31, %v594_v32 }
 0x87f   :  { %597 = vst.msk [vmem:[#allocation3 + $0x4] sm:$0x1] %vm222_vm14, %v596_v33  ;;  %v598_v36 = vmul.f32 %v596_v33, %v1629_v35  ;;  %v640_v33 = vld [vmem:[#allocation3 + $0x1] sm:$0x1] }
 0x881   :  { %v599_v37 = vsel %vm222_vm14, %v598_v36, 0.0 }
 0x882   :  { %600 = vadd.xlane.f32.xlu1 %v599_v37 }
 0x90f   :  { %v601_v48 = vpop.xlane.xlu1 %600 }
 0x910   :  { %v602_v47 = vsel %vm2078_vm2, %v601_v48, %v594_v32  ;;  %vm2088_vm2 = vmmov %vm2087_vm0 }
 0x911   :  { %v604_v50 = vadd.f32 %v603_v4, %v602_v47 }
 0x913   :  { %605 = vst.msk [vmem:[#allocation3 + $0x5] sm:$0x1] %vm222_vm14, %v604_v50  ;;  %v606_v52 = vmul.f32 %v604_v50, %v1640_v51 }
 0x915   :  { %v607_v53 = vsel %vm222_vm14, %v606_v52, 0.0 }
 0x916   :  { %608 = vadd.xlane.f32.xlu0 %v607_v53 }
 0x91a   :  { %v684_v18 = vld [vmem:[#allocation3 + $0x5] sm:$0x1] }
 0x9a3   :  { %v609_v5 = vpop.xlane.xlu0 %608 }
 0x9a4   :  { %v610_v7 = vsel %vm367_vm12, %v609_v5, %v602_v47 }
 0x9a5   :  { %v612_v8 = vadd.f32 %v611_v6, %v610_v7 }
 0x9a7   :  { %613 = vst.msk [vmem:[#allocation3 + $0x6] sm:$0x1] %vm222_vm14, %v612_v8  ;;  %v614_v9 = vmul.f32 %v612_v8, %v1651_v60 }
 0x9a9   :  { %v615_v11 = vsel %vm222_vm14, %v614_v9, 0.0  ;;  %v673_v9 = vld [vmem:[#allocation3 + $0x4] sm:$0x1] }
 0x9aa   :  { %616 = vadd.xlane.f32.xlu1 %v615_v11 }
 0x9ae   :  { %629 = vadd.xlane.f32.xlu1 %v628_v13 }
 0xa37   :  { %v617_v49 = vpop.xlane.xlu1 %616 }
 0xa38   :  { %v618_v19 = vsel %vm2080_vm7, %v617_v49, %v610_v7  ;;  %vm2090_vm7 = vmmov %vm2085_vm1 }
 0xa39   :  { %v620_v22 = vadd.f32 %v619_v0, %v618_v19 }
 0xa3b   :  { %621 = vst.msk [vmem:[#allocation3 + $0x7] sm:$0x1] %vm222_vm14, %v620_v22  ;;  %v630_v24 = vpop.xlane.xlu1 %629  ;;  %v622_v2 = vmul.f32 %v620_v22, %v1666_v42 }
 0xa3c   :  { %631 = vst.msk [vmem:[#allocation2] sm:$0xff] %vm218_vm3, %v630_v24 }
 0xa3d   :  { %v623_v46 = vsel %vm222_vm14, %v622_v2, 0.0 }
 0xa3e   :  { %624 = vadd.xlane.f32.xlu0 %v623_v46 }
 0xa43   :  { %v632_v29 = vld [vmem:[#allocation2] sm:$0x1]  ;;  %v639_v37 = vld [vmem:[#allocation2 + $0x1] sm:$0x1]  ;;  %v650_v4 = vld [vmem:[#allocation2 + $0x2] sm:$0x1] }
 0xa44   :  { %v661_v61 = vld [vmem:[#allocation2 + $0x3] sm:$0x1]  ;;  %v672_v12 = vld [vmem:[#allocation2 + $0x4] sm:$0x1]  ;;  %v683_v49 = vld [vmem:[#allocation2 + $0x5] sm:$0x1] }
 0xacb   :  { %v625_v25 = vpop.xlane.xlu0 %624 }
 0xacc   :  { %v1674_v26 = vsel %vm2081_vm9, %v625_v25, %v618_v19  ;;  %v695_v25 = vld [vmem:[#allocation3 + $0x6] sm:$0x1] }
 0xacd   :  { %v633_v27 = vsel %vm2082_vm11, %v1674_v26, 0.0  ;;  %vm2091_vm11 = vmmov %vm2087_vm0 }
 0xace   :  { %v634_v21 = vsel %vm222_vm14, %v633_v27, 0.0 }
 0xacf   :  { %635 = vadd.xlane.f32.xlu0 %v634_v21  ;;  %v694_v21 = vld [vmem:[#allocation2 + $0x6] sm:$0x1] }
 0xb5c   :  { %v636_v28 = vpop.xlane.xlu0 %635 }
 0xb5d   :  { %v637_v30 = vadd.f32 %v636_v28, %v632_v29 }
 0xb5f   :  { %v638_v31 = vsel %vm2083_vm13, %v637_v30, 0.0  ;;  %vm2092_vm13 = vmmov %vm2087_vm0 }
 0xb60   :  { %v641_v32 = vmin.f32 %v638_v31, %v1674_v26 }
 0xb62   :  { %v642_v36 = vmin.f32 %v641_v32, %v640_v33 }
 0xb64   :  { %v643_v1 = vadd.f32 %v642_v36, %v639_v37 }
 0xb66   :  { %v645_v39 = vmul.f32 %v643_v1, %v1595_v54  ;;  %644 = vst.msk [vmem:[#allocation4 + $0x1] sm:$0x1] %vm222_vm14, %v643_v1  ;;  %v706_v1 = vld [vmem:[#allocation3 + $0x7] sm:$0x1] }
 0xb68   :  { %v646_v23 = vsel %vm222_vm14, %v645_v39, 0.0 }
 0xb69   :  { %647 = vadd.xlane.f32.xlu1 %v646_v23 }
 0xbf6   :  { %v648_v40 = vpop.xlane.xlu1 %647 }
 0xbf7   :  { %v649_v41 = vsel %vm247_vm5, %v648_v40, %v638_v31  ;;  %v716_v31 = vsel %vm277_vm6, %v1543_v38, 0.0  ;;  %v705_v40 = vld [vmem:[#allocation2 + $0x7] sm:$0x1] }
 0xbf8   :  { %v652_v43 = vmin.f32 %v649_v41, %v1674_v26  ;;  %v717_v32 = vsel %vm218_vm3, %v716_v31, 0.0 }
 0xbfa   :  { %v653_v48 = vmin.f32 %v652_v43, %v651_v44 }
 0xbfc   :  { %v654_v47 = vadd.f32 %v653_v48, %v650_v4 }
 0xbfe   :  { %v656_v50 = vmul.f32 %v654_v47, %v1607_v10  ;;  %655 = vst.msk [vmem:[#allocation4 + $0x2] sm:$0x1] %vm222_vm14, %v654_v47 }
 0xc00   :  { %v657_v52 = vsel %vm222_vm14, %v656_v50, 0.0 }
 0xc01   :  { %658 = vadd.xlane.f32.xlu0 %v657_v52 }
 0xc8e   :  { %v659_v53 = vpop.xlane.xlu0 %658 }
 0xc8f   :  { %v660_v55 = vsel %vm277_vm6, %v659_v53, %v649_v41 }
 0xc90   :  { %v663_v56 = vmin.f32 %v660_v55, %v1674_v26 }
 0xc92   :  { %v664_v58 = vmin.f32 %v663_v56, %v662_v57  ;;  %v729_v57 = vld [vmem:[#allocation4 + $0x1] sm:$0x1] }
 0xc94   :  { %v665_v62 = vadd.f32 %v664_v58, %v661_v61 }
 0xc96   :  { %v667_v63 = vmul.f32 %v665_v62, %v1618_v20  ;;  %666 = vst.msk [vmem:[#allocation4 + $0x3] sm:$0x1] %vm222_vm14, %v665_v62 }
 0xc98   :  { %v668_v5 = vsel %vm222_vm14, %v667_v63, 0.0 }
 0xc99   :  { %669 = vadd.xlane.f32.xlu1 %v668_v5 }
 0xd26   :  { %v670_v6 = vpop.xlane.xlu1 %669 }
 0xd27   :  { %v671_v7 = vsel %vm307_vm8, %v670_v6, %v660_v55 }
 0xd28   :  { %v674_v8 = vmin.f32 %v671_v7, %v1674_v26 }
 0xd2a   :  { %v675_v11 = vmin.f32 %v674_v8, %v673_v9  ;;  %v740_v9 = vld [vmem:[#allocation4 + $0x2] sm:$0x1] }
 0xd2c   :  { %v676_v13 = vadd.f32 %v675_v11, %v672_v12 }
 0xd2e   :  { %v678_v14 = vmul.f32 %v676_v13, %v1629_v35  ;;  %677 = vst.msk [vmem:[#allocation4 + $0x4] sm:$0x1] %vm222_vm14, %v676_v13 }
 0xd30   :  { %v679_v15 = vsel %vm222_vm14, %v678_v14, 0.0 }
 0xd31   :  { %680 = vadd.xlane.f32.xlu0 %v679_v15 }
 0xdbe   :  { %v681_v34 = vpop.xlane.xlu0 %680 }
 0xdbf   :  { %v682_v16 = vsel %vm2084_vm15, %v681_v34, %v671_v7  ;;  %vm2093_vm15 = vmmov %vm2089_vm4 }
 0xdc0   :  { %v685_v59 = vmin.f32 %v682_v16, %v1674_v26 }
 0xdc2   :  { %v686_v17 = vmin.f32 %v685_v59, %v684_v18  ;;  %v751_v18 = vld [vmem:[#allocation4 + $0x3] sm:$0x1] }
 0xdc4   :  { %v687_v0 = vadd.f32 %v686_v17, %v683_v49 }
 0xdc6   :  { %v689_v19 = vmul.f32 %v687_v0, %v1640_v51  ;;  %688 = vst.msk [vmem:[#allocation4 + $0x5] sm:$0x1] %vm222_vm14, %v687_v0 }
 0xdc8   :  { %v690_v22 = vsel %vm222_vm14, %v689_v19, 0.0 }
 0xdc9   :  { %691 = vadd.xlane.f32.xlu1 %v690_v22 }
 0xe56   :  { %v692_v24 = vpop.xlane.xlu1 %691 }
 0xe57   :  { %v693_v2 = vsel %vm367_vm12, %v692_v24, %v682_v16 }
 0xe58   :  { %v696_v46 = vmin.f32 %v693_v2, %v1674_v26 }
 0xe5a   :  { %v697_v27 = vmin.f32 %v696_v46, %v695_v25  ;;  %v762_v25 = vld [vmem:[#allocation4 + $0x4] sm:$0x1] }
 0xe5c   :  { %v698_v28 = vadd.f32 %v697_v27, %v694_v21 }
 0xe5e   :  { %v700_v29 = vmul.f32 %v698_v28, %v1651_v60  ;;  %699 = vst.msk [vmem:[#allocation4 + $0x6] sm:$0x1] %vm222_vm14, %v698_v28 }
 0xe60   :  { %v701_v30 = vsel %vm222_vm14, %v700_v29, 0.0 }
 0xe61   :  { %702 = vadd.xlane.f32.xlu0 %v701_v30 }
 0xe65   :  { %718 = vadd.xlane.f32.xlu0 %v717_v32 }
 0xeee   :  { %v703_v33 = vpop.xlane.xlu0 %702 }
 0xeef   :  { %v704_v36 = vsel %vm2085_vm1, %v703_v33, %v693_v2  ;;  %vm2094_vm1 = vmmov %vm2089_vm4 }
 0xef0   :  { %v707_v37 = vmin.f32 %v704_v36, %v1674_v26 }
 0xef2   :  { %v708_v39 = vmin.f32 %v707_v37, %v706_v1  ;;  %v719_v23 = vpop.xlane.xlu0 %718 }
 0xef3   :  { %720 = vst.msk [vmem:[#allocation2] sm:$0xff] %vm218_vm3, %v719_v23 }
 0xef4   :  { %v709_v41 = vadd.f32 %v708_v39, %v705_v40 }
 0xef6   :  { %v711_v43 = vmul.f32 %v709_v41, %v1666_v42  ;;  %710 = vst.msk [vmem:[#allocation4 + $0x7] sm:$0x1] %vm222_vm14, %v709_v41 }
 0xef8   :  { %v712_v44 = vsel %vm222_vm14, %v711_v43, 0.0 }
 0xef9   :  { %713 = vadd.xlane.f32.xlu1 %v712_v44 }
 0xefa   :  { %v721_v52 = vld [vmem:[#allocation2] sm:$0x1]  ;;  %v728_v61 = vld [vmem:[#allocation2 + $0x1] sm:$0x1]  ;;  %v739_v12 = vld [vmem:[#allocation2 + $0x2] sm:$0x1] }
 0xefb   :  { %v750_v49 = vld [vmem:[#allocation2 + $0x3] sm:$0x1]  ;;  %v761_v21 = vld [vmem:[#allocation2 + $0x4] sm:$0x1]  ;;  %v772_v1 = vld [vmem:[#allocation2 + $0x5] sm:$0x1] }
 0xf86   :  { %v714_v48 = vpop.xlane.xlu1 %713 }
 0xf87   :  { %v1729_v4 = vsel %vm2086_vm10, %v714_v48, %v704_v36  ;;  %v773_v36 = vld [vmem:[#allocation4 + $0x5] sm:$0x1]  ;;  %v784_v48 = vld [vmem:[#allocation4 + $0x6] sm:$0x1]  ;;  %vm2095_vm10 = vmmov %vm2090_vm7 }
 0xf88   :  { %v722_v26 = vsel %vm2087_vm0, %v1729_v4, 0.0  ;;  %vm2096_vm0 = vmmov %vm2081_vm9 }
 0xf89   :  { %v723_v47 = vsel %vm222_vm14, %v722_v26, 0.0 }
 0xf8a   :  { %724 = vadd.xlane.f32.xlu1 %v723_v47  ;;  %v783_v47 = vld [vmem:[#allocation2 + $0x6] sm:$0x1] }
0x1017   :  { %v725_v50 = vpop.xlane.xlu1 %724 }
0x1018   :  { %v726_v53 = vadd.f32 %v725_v50, %v721_v52 }
0x101a   :  { %v727_v55 = vsel %vm2088_vm2, %v726_v53, 0.0 }
0x101b   :  { %v730_v56 = vmin.f32 %v727_v55, %v1729_v4 }
0x101d   :  { %v731_v58 = vmin.f32 %v730_v56, %v729_v57 }
0x101f   :  { %v732_v62 = vadd.f32 %v731_v58, %v728_v61 }
0x1021   :  { %v734_v63 = vmul.f32 %v732_v62, %v1595_v54  ;;  %733 = vst.msk [vmem:[#allocation3 + $0x1] sm:$0x1] %vm222_vm14, %v732_v62  ;;  %v795_v62 = vld [vmem:[#allocation4 + $0x7] sm:$0x1] }
0x1023   :  { %v735_v5 = vsel %vm222_vm14, %v734_v63, 0.0 }
0x1024   :  { %736 = vadd.xlane.f32.xlu0 %v735_v5 }
0x10b1   :  { %v737_v6 = vpop.xlane.xlu0 %736 }
0x10b2   :  { %v738_v7 = vsel %vm247_vm5, %v737_v6, %v727_v55  ;;  %v805_v55 = vsel %vm307_vm8, %v1543_v38, 0.0  ;;  %v794_v6 = vld [vmem:[#allocation2 + $0x7] sm:$0x1] }
0x10b3   :  { %v741_v8 = vmin.f32 %v738_v7, %v1729_v4  ;;  %v806_v56 = vsel %vm218_vm3, %v805_v55, 0.0 }
0x10b5   :  { %v742_v11 = vmin.f32 %v741_v8, %v740_v9 }
0x10b7   :  { %v743_v13 = vadd.f32 %v742_v11, %v739_v12 }
0x10b9   :  { %v745_v14 = vmul.f32 %v743_v13, %v1607_v10  ;;  %744 = vst.msk [vmem:[#allocation3 + $0x2] sm:$0x1] %vm222_vm14, %v743_v13 }
0x10bb   :  { %v746_v15 = vsel %vm222_vm14, %v745_v14, 0.0 }
0x10bc   :  { %747 = vadd.xlane.f32.xlu1 %v746_v15 }
0x1149   :  { %v748_v34 = vpop.xlane.xlu1 %747 }
0x114a   :  { %v749_v16 = vsel %vm277_vm6, %v748_v34, %v738_v7 }
0x114b   :  { %v752_v59 = vmin.f32 %v749_v16, %v1729_v4 }
0x114d   :  { %v753_v17 = vmin.f32 %v752_v59, %v751_v18  ;;  %v818_v18 = vld [vmem:[#allocation3 + $0x1] sm:$0x1] }
0x114f   :  { %v754_v0 = vadd.f32 %v753_v17, %v750_v49 }
0x1151   :  { %v756_v19 = vmul.f32 %v754_v0, %v1618_v20  ;;  %755 = vst.msk [vmem:[#allocation3 + $0x3] sm:$0x1] %vm222_vm14, %v754_v0 }
0x1153   :  { %v757_v22 = vsel %vm222_vm14, %v756_v19, 0.0 }
0x1154   :  { %758 = vadd.xlane.f32.xlu0 %v757_v22 }
0x11e1   :  { %v759_v24 = vpop.xlane.xlu0 %758 }
0x11e2   :  { %v760_v2 = vsel %vm307_vm8, %v759_v24, %v749_v16 }
0x11e3   :  { %v763_v46 = vmin.f32 %v760_v2, %v1729_v4 }
0x11e5   :  { %v764_v27 = vmin.f32 %v763_v46, %v762_v25  ;;  %v829_v25 = vld [vmem:[#allocation3 + $0x2] sm:$0x1] }
0x11e7   :  { %v765_v28 = vadd.f32 %v764_v27, %v761_v21 }
0x11e9   :  { %v767_v29 = vmul.f32 %v765_v28, %v1629_v35  ;;  %766 = vst.msk [vmem:[#allocation3 + $0x4] sm:$0x1] %vm222_vm14, %v765_v28 }
0x11eb   :  { %v768_v30 = vsel %vm222_vm14, %v767_v29, 0.0 }
0x11ec   :  { %769 = vadd.xlane.f32.xlu1 %v768_v30 }
0x1279   :  { %v770_v31 = vpop.xlane.xlu1 %769 }
0x127a   :  { %v771_v32 = vsel %vm2089_vm4, %v770_v31, %v760_v2  ;;  %vm2097_vm4 = vmmov %vm2088_vm2 }
0x127b   :  { %v774_v33 = vmin.f32 %v771_v32, %v1729_v4 }
0x127d   :  { %v775_v37 = vmin.f32 %v774_v33, %v773_v36  ;;  %v840_v36 = vld [vmem:[#allocation3 + $0x3] sm:$0x1] }
0x127f   :  { %v776_v39 = vadd.f32 %v775_v37, %v772_v1 }
0x1281   :  { %v778_v23 = vmul.f32 %v776_v39, %v1640_v51  ;;  %777 = vst.msk [vmem:[#allocation3 + $0x5] sm:$0x1] %vm222_vm14, %v776_v39 }
0x1283   :  { %v779_v40 = vsel %vm222_vm14, %v778_v23, 0.0 }
0x1284   :  { %780 = vadd.xlane.f32.xlu0 %v779_v40 }
0x1311   :  { %v781_v41 = vpop.xlane.xlu0 %780 }
0x1312   :  { %v782_v43 = vsel %vm367_vm12, %v781_v41, %v771_v32 }
0x1313   :  { %v785_v44 = vmin.f32 %v782_v43, %v1729_v4 }
0x1315   :  { %v786_v26 = vmin.f32 %v785_v44, %v784_v48  ;;  %v851_v48 = vld [vmem:[#allocation3 + $0x4] sm:$0x1] }
0x1317   :  { %v787_v50 = vadd.f32 %v786_v26, %v783_v47 }
0x1319   :  { %v789_v52 = vmul.f32 %v787_v50, %v1651_v60  ;;  %788 = vst.msk [vmem:[#allocation3 + $0x6] sm:$0x1] %vm222_vm14, %v787_v50 }
0x131b   :  { %v790_v53 = vsel %vm222_vm14, %v789_v52, 0.0 }
0x131c   :  { %791 = vadd.xlane.f32.xlu1 %v790_v53 }
0x1320   :  { %807 = vadd.xlane.f32.xlu1 %v806_v56 }
0x13a9   :  { %v792_v57 = vpop.xlane.xlu1 %791 }
0x13aa   :  { %v793_v58 = vsel %vm2090_vm7, %v792_v57, %v782_v43  ;;  %vm2098_vm7 = vmmov %vm2094_vm1 }
0x13ab   :  { %v796_v61 = vmin.f32 %v793_v58, %v1729_v4 }
0x13ad   :  { %v797_v63 = vmin.f32 %v796_v61, %v795_v62  ;;  %v808_v5 = vpop.xlane.xlu1 %807 }
0x13ae   :  { %809 = vst.msk [vmem:[#allocation2] sm:$0xff] %vm218_vm3, %v808_v5 }
0x13af   :  { %v798_v7 = vadd.f32 %v797_v63, %v794_v6 }
0x13b1   :  { %v800_v8 = vmul.f32 %v798_v7, %v1666_v42  ;;  %799 = vst.msk [vmem:[#allocation3 + $0x7] sm:$0x1] %vm222_vm14, %v798_v7 }
0x13b3   :  { %v801_v9 = vsel %vm222_vm14, %v800_v8, 0.0 }
0x13b4   :  { %802 = vadd.xlane.f32.xlu0 %v801_v9 }
0x13b5   :  { %v810_v15 = vld [vmem:[#allocation2] sm:$0x1]  ;;  %v817_v49 = vld [vmem:[#allocation2 + $0x1] sm:$0x1]  ;;  %v828_v21 = vld [vmem:[#allocation2 + $0x2] sm:$0x1] }
0x13b6   :  { %v839_v1 = vld [vmem:[#allocation2 + $0x3] sm:$0x1]  ;;  %v850_v47 = vld [vmem:[#allocation2 + $0x4] sm:$0x1]  ;;  %v861_v62 = vld [vmem:[#allocation2 + $0x5] sm:$0x1] }
0x1441   :  { %v803_v11 = vpop.xlane.xlu0 %802 }
0x1442   :  { %v1784_v12 = vsel %vm2081_vm9, %v803_v11, %v793_v58  ;;  %v862_v58 = vld [vmem:[#allocation3 + $0x5] sm:$0x1]  ;;  %v873_v11 = vld [vmem:[#allocation3 + $0x6] sm:$0x1]  ;;  %vm2099_vm9 = vmmov %vm2095_vm10 }
0x1443   :  { %v811_v4 = vsel %vm2091_vm11, %v1784_v12, 0.0  ;;  %vm2100_vm11 = vmmov %vm2096_vm0 }
0x1444   :  { %v812_v13 = vsel %vm222_vm14, %v811_v4, 0.0 }
0x1445   :  { %813 = vadd.xlane.f32.xlu0 %v812_v13  ;;  %v872_v13 = vld [vmem:[#allocation2 + $0x6] sm:$0x1] }
0x14d2   :  { %v814_v14 = vpop.xlane.xlu0 %813 }
0x14d3   :  { %v815_v34 = vadd.f32 %v814_v14, %v810_v15 }
0x14d5   :  { %v816_v16 = vsel %vm2092_vm13, %v815_v34, 0.0  ;;  %vm2101_vm13 = vmmov %vm2088_vm2 }
0x14d6   :  { %v819_v59 = vmin.f32 %v816_v16, %v1784_v12 }
0x14d8   :  { %v820_v17 = vmin.f32 %v819_v59, %v818_v18 }
0x14da   :  { %v821_v0 = vadd.f32 %v820_v17, %v817_v49 }
0x14dc   :  { %v823_v19 = vmul.f32 %v821_v0, %v1595_v54  ;;  %822 = vst.msk [vmem:[#allocation4 + $0x1] sm:$0x1] %vm222_vm14, %v821_v0  ;;  %v884_v0 = vld [vmem:[#allocation3 + $0x7] sm:$0x1] }
0x14de   :  { %v824_v22 = vsel %vm222_vm14, %v823_v19, 0.0 }
0x14df   :  { %825 = vadd.xlane.f32.xlu1 %v824_v22 }
0x156c   :  { %v826_v24 = vpop.xlane.xlu1 %825 }
0x156d   :  { %v827_v2 = vsel %vm247_vm5, %v826_v24, %v816_v16  ;;  %v894_v16 = vsel %vm2094_vm1, %v1543_v38, 0.0  ;;  %v883_v24 = vld [vmem:[#allocation2 + $0x7] sm:$0x1] }
0x156e   :  { %v830_v46 = vmin.f32 %v827_v2, %v1784_v12  ;;  %v895_v59 = vsel %vm218_vm3, %v894_v16, 0.0 }
0x1570   :  { %v831_v27 = vmin.f32 %v830_v46, %v829_v25 }
0x1572   :  { %v832_v28 = vadd.f32 %v831_v27, %v828_v21 }
0x1574   :  { %v834_v29 = vmul.f32 %v832_v28, %v1607_v10  ;;  %833 = vst.msk [vmem:[#allocation4 + $0x2] sm:$0x1] %vm222_vm14, %v832_v28 }
0x1576   :  { %v835_v30 = vsel %vm222_vm14, %v834_v29, 0.0 }
0x1577   :  { %836 = vadd.xlane.f32.xlu0 %v835_v30 }
0x1604   :  { %v837_v31 = vpop.xlane.xlu0 %836 }
0x1605   :  { %v838_v32 = vsel %vm277_vm6, %v837_v31, %v827_v2 }
0x1606   :  { %v841_v33 = vmin.f32 %v838_v32, %v1784_v12 }
0x1608   :  { %v842_v37 = vmin.f32 %v841_v33, %v840_v36  ;;  %v907_v36 = vld [vmem:[#allocation4 + $0x1] sm:$0x1] }
0x160a   :  { %v843_v39 = vadd.f32 %v842_v37, %v839_v1 }
0x160c   :  { %v845_v23 = vmul.f32 %v843_v39, %v1618_v20  ;;  %844 = vst.msk [vmem:[#allocation4 + $0x3] sm:$0x1] %vm222_vm14, %v843_v39 }
0x160e   :  { %v846_v40 = vsel %vm222_vm14, %v845_v23, 0.0 }
0x160f   :  { %847 = vadd.xlane.f32.xlu1 %v846_v40 }
0x169c   :  { %v848_v41 = vpop.xlane.xlu1 %847 }
0x169d   :  { %v849_v43 = vsel %vm307_vm8, %v848_v41, %v838_v32 }
0x169e   :  { %v852_v44 = vmin.f32 %v849_v43, %v1784_v12 }
0x16a0   :  { %v853_v26 = vmin.f32 %v852_v44, %v851_v48  ;;  %v918_v48 = vld [vmem:[#allocation4 + $0x2] sm:$0x1] }
0x16a2   :  { %v854_v50 = vadd.f32 %v853_v26, %v850_v47 }
0x16a4   :  { %v856_v52 = vmul.f32 %v854_v50, %v1629_v35  ;;  %855 = vst.msk [vmem:[#allocation4 + $0x4] sm:$0x1] %vm222_vm14, %v854_v50 }
0x16a6   :  { %v857_v53 = vsel %vm222_vm14, %v856_v52, 0.0 }
0x16a7   :  { %858 = vadd.xlane.f32.xlu0 %v857_v53 }
0x1734   :  { %v859_v55 = vpop.xlane.xlu0 %858 }
0x1735   :  { %v860_v56 = vsel %vm2093_vm15, %v859_v55, %v849_v43  ;;  %vm2102_vm15 = vmmov %vm2088_vm2 }
0x1736   :  { %v863_v57 = vmin.f32 %v860_v56, %v1784_v12 }
0x1738   :  { %v864_v61 = vmin.f32 %v863_v57, %v862_v58  ;;  %v929_v58 = vld [vmem:[#allocation4 + $0x3] sm:$0x1] }
0x173a   :  { %v865_v63 = vadd.f32 %v864_v61, %v861_v62 }
0x173c   :  { %v867_v5 = vmul.f32 %v865_v63, %v1640_v51  ;;  %866 = vst.msk [vmem:[#allocation4 + $0x5] sm:$0x1] %vm222_vm14, %v865_v63 }
0x173e   :  { %v868_v6 = vsel %vm222_vm14, %v867_v5, 0.0 }
0x173f   :  { %869 = vadd.xlane.f32.xlu1 %v868_v6 }
0x17cc   :  { %v870_v7 = vpop.xlane.xlu1 %869 }
0x17cd   :  { %v871_v8 = vsel %vm367_vm12, %v870_v7, %v860_v56 }
0x17ce   :  { %v874_v9 = vmin.f32 %v871_v8, %v1784_v12 }
0x17d0   :  { %v875_v4 = vmin.f32 %v874_v9, %v873_v11  ;;  %v940_v11 = vld [vmem:[#allocation4 + $0x4] sm:$0x1] }
0x17d2   :  { %v876_v14 = vadd.f32 %v875_v4, %v872_v13 }
0x17d4   :  { %v878_v15 = vmul.f32 %v876_v14, %v1651_v60  ;;  %877 = vst.msk [vmem:[#allocation4 + $0x6] sm:$0x1] %vm222_vm14, %v876_v14 }
0x17d6   :  { %v879_v34 = vsel %vm222_vm14, %v878_v15, 0.0 }
0x17d7   :  { %880 = vadd.xlane.f32.xlu0 %v879_v34 }
0x17db   :  { %896 = vadd.xlane.f32.xlu0 %v895_v59 }
0x1864   :  { %v881_v18 = vpop.xlane.xlu0 %880 }
0x1865   :  { %v882_v17 = vsel %vm2095_vm10, %v881_v18, %v871_v8  ;;  %vm2103_vm10 = vmmov %vm2099_vm9 }
0x1866   :  { %v885_v49 = vmin.f32 %v882_v17, %v1784_v12 }
0x1868   :  { %v886_v19 = vmin.f32 %v885_v49, %v884_v0  ;;  %v897_v22 = vpop.xlane.xlu0 %896 }
0x1869   :  { %898 = vst.msk [vmem:[#allocation2] sm:$0xff] %vm218_vm3, %v897_v22 }
0x186a   :  { %v887_v2 = vadd.f32 %v886_v19, %v883_v24 }
0x186c   :  { %v889_v46 = vmul.f32 %v887_v2, %v1666_v42  ;;  %888 = vst.msk [vmem:[#allocation4 + $0x7] sm:$0x1] %vm222_vm14, %v887_v2 }
0x186e   :  { %v890_v25 = vsel %vm222_vm14, %v889_v46, 0.0 }
0x186f   :  { %891 = vadd.xlane.f32.xlu1 %v890_v25 }
0x1870   :  { %v899_v30 = vld [vmem:[#allocation2] sm:$0x1]  ;;  %v906_v1 = vld [vmem:[#allocation2 + $0x1] sm:$0x1]  ;;  %v917_v47 = vld [vmem:[#allocation2 + $0x2] sm:$0x1] }
0x1871   :  { %v928_v62 = vld [vmem:[#allocation2 + $0x3] sm:$0x1]  ;;  %v939_v13 = vld [vmem:[#allocation2 + $0x4] sm:$0x1]  ;;  %v950_v0 = vld [vmem:[#allocation2 + $0x5] sm:$0x1] }
0x18fc   :  { %v892_v27 = vpop.xlane.xlu1 %891 }
0x18fd   :  { %v1839_v21 = vsel %vm2096_vm0, %v892_v27, %v882_v17  ;;  %v951_v17 = vld [vmem:[#allocation4 + $0x5] sm:$0x1]  ;;  %v962_v27 = vld [vmem:[#allocation4 + $0x6] sm:$0x1]  ;;  %vm2104_vm0 = vmmov %vm2099_vm9 }
0x18fe   :  { %v900_v12 = vsel %vm2088_vm2, %v1839_v21, 0.0  ;;  %vm2105_vm2 = vmmov %vm2100_vm11 }
0x18ff   :  { %v901_v28 = vsel %vm222_vm14, %v900_v12, 0.0 }
0x1900   :  { %902 = vadd.xlane.f32.xlu1 %v901_v28  ;;  %v961_v28 = vld [vmem:[#allocation2 + $0x6] sm:$0x1] }
0x198d   :  { %v903_v29 = vpop.xlane.xlu1 %902 }
0x198e   :  { %v904_v31 = vadd.f32 %v903_v29, %v899_v30 }
0x1990   :  { %v905_v32 = vsel %vm2097_vm4, %v904_v31, 0.0 }
0x1991   :  { %v908_v33 = vmin.f32 %v905_v32, %v1839_v21 }
0x1993   :  { %v909_v37 = vmin.f32 %v908_v33, %v907_v36 }
0x1995   :  { %v910_v39 = vadd.f32 %v909_v37, %v906_v1 }
0x1997   :  { %v912_v23 = vmul.f32 %v910_v39, %v1595_v54  ;;  %911 = vst.msk [vmem:[#allocation3 + $0x1] sm:$0x1] %vm222_vm14, %v910_v39  ;;  %v973_v39 = vld [vmem:[#allocation4 + $0x7] sm:$0x1] }
0x1999   :  { %v913_v40 = vsel %vm222_vm14, %v912_v23, 0.0 }
0x199a   :  { %914 = vadd.xlane.f32.xlu0 %v913_v40 }
0x1a27   :  { %v915_v41 = vpop.xlane.xlu0 %914 }
0x1a28   :  { %v916_v43 = vsel %vm247_vm5, %v915_v41, %v905_v32  ;;  %v983_v32 = vsel %vm367_vm12, %v1543_v38, 0.0  ;;  %v972_v41 = vld [vmem:[#allocation2 + $0x7] sm:$0x1] }
0x1a29   :  { %v919_v44 = vmin.f32 %v916_v43, %v1839_v21  ;;  %v984_v33 = vsel %vm218_vm3, %v983_v32, 0.0 }
0x1a2b   :  { %v920_v26 = vmin.f32 %v919_v44, %v918_v48 }
0x1a2d   :  { %v921_v50 = vadd.f32 %v920_v26, %v917_v47 }
0x1a2f   :  { %v923_v52 = vmul.f32 %v921_v50, %v1607_v10  ;;  %922 = vst.msk [vmem:[#allocation3 + $0x2] sm:$0x1] %vm222_vm14, %v921_v50 }
0x1a31   :  { %v924_v53 = vsel %vm222_vm14, %v923_v52, 0.0 }
0x1a32   :  { %925 = vadd.xlane.f32.xlu1 %v924_v53 }
0x1abf   :  { %v926_v55 = vpop.xlane.xlu1 %925 }
0x1ac0   :  { %v927_v56 = vsel %vm277_vm6, %v926_v55, %v916_v43 }
0x1ac1   :  { %v930_v57 = vmin.f32 %v927_v56, %v1839_v21 }
0x1ac3   :  { %v931_v61 = vmin.f32 %v930_v57, %v929_v58  ;;  %v996_v58 = vld [vmem:[#allocation3 + $0x1] sm:$0x1] }
0x1ac5   :  { %v932_v63 = vadd.f32 %v931_v61, %v928_v62 }
0x1ac7   :  { %v934_v5 = vmul.f32 %v932_v63, %v1618_v20  ;;  %933 = vst.msk [vmem:[#allocation3 + $0x3] sm:$0x1] %vm222_vm14, %v932_v63 }
0x1ac9   :  { %v935_v6 = vsel %vm222_vm14, %v934_v5, 0.0 }
0x1aca   :  { %936 = vadd.xlane.f32.xlu0 %v935_v6 }
0x1b57   :  { %v937_v7 = vpop.xlane.xlu0 %936 }
0x1b58   :  { %v938_v8 = vsel %vm307_vm8, %v937_v7, %v927_v56 }
0x1b59   :  { %v941_v9 = vmin.f32 %v938_v8, %v1839_v21 }
0x1b5b   :  { %v942_v4 = vmin.f32 %v941_v9, %v940_v11  ;;  %v1007_v11 = vld [vmem:[#allocation3 + $0x2] sm:$0x1] }
0x1b5d   :  { %v943_v14 = vadd.f32 %v942_v4, %v939_v13 }
0x1b5f   :  { %v945_v15 = vmul.f32 %v943_v14, %v1629_v35  ;;  %944 = vst.msk [vmem:[#allocation3 + $0x4] sm:$0x1] %vm222_vm14, %v943_v14 }
0x1b61   :  { %v946_v34 = vsel %vm222_vm14, %v945_v15, 0.0 }
0x1b62   :  { %947 = vadd.xlane.f32.xlu1 %v946_v34 }
0x1bef   :  { %v948_v16 = vpop.xlane.xlu1 %947 }
0x1bf0   :  { %v949_v59 = vsel %vm2098_vm7, %v948_v16, %v938_v8  ;;  %vm2106_vm7 = vmmov %vm2097_vm4 }
0x1bf1   :  { %v952_v18 = vmin.f32 %v949_v59, %v1839_v21 }
0x1bf3   :  { %v953_v49 = vmin.f32 %v952_v18, %v951_v17  ;;  %v1018_v17 = vld [vmem:[#allocation3 + $0x3] sm:$0x1] }
0x1bf5   :  { %v954_v19 = vadd.f32 %v953_v49, %v950_v0 }
0x1bf7   :  { %v956_v22 = vmul.f32 %v954_v19, %v1640_v51  ;;  %955 = vst.msk [vmem:[#allocation3 + $0x5] sm:$0x1] %vm222_vm14, %v954_v19 }
0x1bf9   :  { %v957_v24 = vsel %vm222_vm14, %v956_v22, 0.0 }
0x1bfa   :  { %958 = vadd.xlane.f32.xlu0 %v957_v24 }
0x1c87   :  { %v959_v2 = vpop.xlane.xlu0 %958 }
0x1c88   :  { %v960_v46 = vsel %vm367_vm12, %v959_v2, %v949_v59 }
0x1c89   :  { %v963_v25 = vmin.f32 %v960_v46, %v1839_v21 }
0x1c8b   :  { %v964_v12 = vmin.f32 %v963_v25, %v962_v27  ;;  %v1029_v27 = vld [vmem:[#allocation3 + $0x4] sm:$0x1] }
0x1c8d   :  { %v965_v29 = vadd.f32 %v964_v12, %v961_v28 }
0x1c8f   :  { %v967_v30 = vmul.f32 %v965_v29, %v1651_v60  ;;  %966 = vst.msk [vmem:[#allocation3 + $0x6] sm:$0x1] %vm222_vm14, %v965_v29 }
0x1c91   :  { %v968_v31 = vsel %vm222_vm14, %v967_v30, 0.0 }
0x1c92   :  { %969 = vadd.xlane.f32.xlu1 %v968_v31 }
0x1c96   :  { %985 = vadd.xlane.f32.xlu1 %v984_v33 }
0x1d1f   :  { %v970_v36 = vpop.xlane.xlu1 %969 }
0x1d20   :  { %v971_v37 = vsel %vm2099_vm9, %v970_v36, %v960_v46  ;;  %vm2107_vm9 = vmmov %vm2094_vm1 }
0x1d21   :  { %v974_v1 = vmin.f32 %v971_v37, %v1839_v21 }
0x1d23   :  { %v975_v23 = vmin.f32 %v974_v1, %v973_v39  ;;  %v986_v40 = vpop.xlane.xlu1 %985 }
0x1d24   :  { %987 = vst.msk [vmem:[#allocation2] sm:$0xff] %vm218_vm3, %v986_v40 }
0x1d25   :  { %v976_v43 = vadd.f32 %v975_v23, %v972_v41 }
0x1d27   :  { %v978_v44 = vmul.f32 %v976_v43, %v1666_v42  ;;  %977 = vst.msk [vmem:[#allocation3 + $0x7] sm:$0x1] %vm222_vm14, %v976_v43 }
0x1d29   :  { %v979_v48 = vsel %vm222_vm14, %v978_v44, 0.0 }
0x1d2a   :  { %980 = vadd.xlane.f32.xlu0 %v979_v48 }
0x1d2b   :  { %v988_v53 = vld [vmem:[#allocation2] sm:$0x1]  ;;  %v995_v62 = vld [vmem:[#allocation2 + $0x1] sm:$0x1]  ;;  %v1006_v13 = vld [vmem:[#allocation2 + $0x2] sm:$0x1] }
0x1d2c   :  { %v1017_v0 = vld [vmem:[#allocation2 + $0x3] sm:$0x1]  ;;  %v1028_v28 = vld [vmem:[#allocation2 + $0x4] sm:$0x1]  ;;  %v1039_v39 = vld [vmem:[#allocation2 + $0x5] sm:$0x1] }
0x1db7   :  { %v981_v26 = vpop.xlane.xlu0 %980 }
0x1db8   :  { %v1894_v47 = vsel %vm2100_vm11, %v981_v26, %v971_v37  ;;  %v1040_v37 = vld [vmem:[#allocation3 + $0x5] sm:$0x1]  ;;  %v1051_v26 = vld [vmem:[#allocation3 + $0x6] sm:$0x1]  ;;  %vm2108_vm11 = vmmov %vm2105_vm2 }
0x1db9   :  { %v989_v21 = vsel %vm2101_vm13, %v1894_v47, 0.0  ;;  %vm2109_vm13 = vmmov %vm2104_vm0 }
0x1dba   :  { %v990_v50 = vsel %vm222_vm14, %v989_v21, 0.0 }
0x1dbb   :  { %991 = vadd.xlane.f32.xlu0 %v990_v50  ;;  %v1050_v50 = vld [vmem:[#allocation2 + $0x6] sm:$0x1] }
0x1e48   :  { %v992_v52 = vpop.xlane.xlu0 %991 }
0x1e49   :  { %v993_v55 = vadd.f32 %v992_v52, %v988_v53 }
0x1e4b   :  { %v994_v56 = vsel %vm2102_vm15, %v993_v55, 0.0  ;;  %vm2110_vm15 = vmmov %vm2105_vm2 }
0x1e4c   :  { %v997_v57 = vmin.f32 %v994_v56, %v1894_v47 }
0x1e4e   :  { %v998_v61 = vmin.f32 %v997_v57, %v996_v58 }
0x1e50   :  { %v999_v63 = vadd.f32 %v998_v61, %v995_v62 }
0x1e52   :  { %v1001_v5 = vmul.f32 %v999_v63, %v1595_v54  ;;  %1000 = vst.msk [vmem:[#allocation4 + $0x1] sm:$0x1] %vm222_vm14, %v999_v63  ;;  %v1062_v63 = vld [vmem:[#allocation3 + $0x7] sm:$0x1] }
0x1e54   :  { %v1002_v6 = vsel %vm222_vm14, %v1001_v5, 0.0 }
0x1e55   :  { %1003 = vadd.xlane.f32.xlu1 %v1002_v6 }
0x1ee2   :  { %v1004_v7 = vpop.xlane.xlu1 %1003 }
0x1ee3   :  { %v1005_v8 = vsel %vm247_vm5, %v1004_v7, %v994_v56  ;;  %v1072_v56 = vsel %vm2103_vm10, %v1543_v38, 0.0  ;;  %v1061_v7 = vld [vmem:[#allocation2 + $0x7] sm:$0x1] }
0x1ee4   :  { %v1008_v9 = vmin.f32 %v1005_v8, %v1894_v47  ;;  %v1073_v57 = vsel %vm218_vm3, %v1072_v56, 0.0 }
0x1ee6   :  { %v1009_v4 = vmin.f32 %v1008_v9, %v1007_v11 }
0x1ee8   :  { %v1010_v14 = vadd.f32 %v1009_v4, %v1006_v13 }
0x1eea   :  { %v1012_v15 = vmul.f32 %v1010_v14, %v1607_v10  ;;  %1011 = vst.msk [vmem:[#allocation4 + $0x2] sm:$0x1] %vm222_vm14, %v1010_v14 }
0x1eec   :  { %v1013_v34 = vsel %vm222_vm14, %v1012_v15, 0.0 }
0x1eed   :  { %1014 = vadd.xlane.f32.xlu0 %v1013_v34 }
0x1f7a   :  { %v1015_v16 = vpop.xlane.xlu0 %1014 }
0x1f7b   :  { %v1016_v59 = vsel %vm277_vm6, %v1015_v16, %v1005_v8 }
0x1f7c   :  { %v1019_v18 = vmin.f32 %v1016_v59, %v1894_v47 }
0x1f7e   :  { %v1020_v49 = vmin.f32 %v1019_v18, %v1018_v17  ;;  %v1085_v17 = vld [vmem:[#allocation4 + $0x1] sm:$0x1] }
0x1f80   :  { %v1021_v19 = vadd.f32 %v1020_v49, %v1017_v0 }
0x1f82   :  { %v1023_v22 = vmul.f32 %v1021_v19, %v1618_v20  ;;  %1022 = vst.msk [vmem:[#allocation4 + $0x3] sm:$0x1] %vm222_vm14, %v1021_v19 }
0x1f84   :  { %v1024_v24 = vsel %vm222_vm14, %v1023_v22, 0.0 }
0x1f85   :  { %1025 = vadd.xlane.f32.xlu1 %v1024_v24 }
0x2012   :  { %v1026_v2 = vpop.xlane.xlu1 %1025 }
0x2013   :  { %v1027_v46 = vsel %vm307_vm8, %v1026_v2, %v1016_v59 }
0x2014   :  { %v1030_v25 = vmin.f32 %v1027_v46, %v1894_v47 }
0x2016   :  { %v1031_v12 = vmin.f32 %v1030_v25, %v1029_v27  ;;  %v1096_v27 = vld [vmem:[#allocation4 + $0x2] sm:$0x1] }
0x2018   :  { %v1032_v29 = vadd.f32 %v1031_v12, %v1028_v28 }
0x201a   :  { %v1034_v30 = vmul.f32 %v1032_v29, %v1629_v35  ;;  %1033 = vst.msk [vmem:[#allocation4 + $0x4] sm:$0x1] %vm222_vm14, %v1032_v29 }
0x201c   :  { %v1035_v31 = vsel %vm222_vm14, %v1034_v30, 0.0 }
0x201d   :  { %1036 = vadd.xlane.f32.xlu0 %v1035_v31 }
0x20aa   :  { %v1037_v32 = vpop.xlane.xlu0 %1036 }
0x20ab   :  { %v1038_v33 = vsel %vm2094_vm1, %v1037_v32, %v1027_v46  ;;  %vm2111_vm1 = vmmov %vm2097_vm4 }
0x20ac   :  { %v1041_v36 = vmin.f32 %v1038_v33, %v1894_v47 }
0x20ae   :  { %v1042_v1 = vmin.f32 %v1041_v36, %v1040_v37  ;;  %v1107_v37 = vld [vmem:[#allocation4 + $0x3] sm:$0x1] }
0x20b0   :  { %v1043_v23 = vadd.f32 %v1042_v1, %v1039_v39 }
0x20b2   :  { %v1045_v40 = vmul.f32 %v1043_v23, %v1640_v51  ;;  %1044 = vst.msk [vmem:[#allocation4 + $0x5] sm:$0x1] %vm222_vm14, %v1043_v23 }
0x20b4   :  { %v1046_v41 = vsel %vm222_vm14, %v1045_v40, 0.0 }
0x20b5   :  { %1047 = vadd.xlane.f32.xlu1 %v1046_v41 }
0x2142   :  { %v1048_v43 = vpop.xlane.xlu1 %1047 }
0x2143   :  { %v1049_v44 = vsel %vm367_vm12, %v1048_v43, %v1038_v33 }
0x2144   :  { %v1052_v48 = vmin.f32 %v1049_v44, %v1894_v47 }
0x2146   :  { %v1053_v21 = vmin.f32 %v1052_v48, %v1051_v26  ;;  %v1118_v26 = vld [vmem:[#allocation4 + $0x4] sm:$0x1] }
0x2148   :  { %v1054_v52 = vadd.f32 %v1053_v21, %v1050_v50 }
0x214a   :  { %v1056_v53 = vmul.f32 %v1054_v52, %v1651_v60  ;;  %1055 = vst.msk [vmem:[#allocation4 + $0x6] sm:$0x1] %vm222_vm14, %v1054_v52 }
0x214c   :  { %v1057_v55 = vsel %vm222_vm14, %v1056_v53, 0.0 }
0x214d   :  { %1058 = vadd.xlane.f32.xlu0 %v1057_v55 }
0x2151   :  { %1074 = vadd.xlane.f32.xlu0 %v1073_v57 }
0x21da   :  { %v1059_v58 = vpop.xlane.xlu0 %1058 }
0x21db   :  { %v1060_v61 = vsel %vm2104_vm0, %v1059_v58, %v1049_v44 }
0x21dc   :  { %v1063_v62 = vmin.f32 %v1060_v61, %v1894_v47 }
0x21de   :  { %v1064_v5 = vmin.f32 %v1063_v62, %v1062_v63  ;;  %v1075_v6 = vpop.xlane.xlu0 %1074 }
0x21df   :  { %1076 = vst.msk [vmem:[#allocation2] sm:$0xff] %vm218_vm3, %v1075_v6 }
0x21e0   :  { %v1065_v8 = vadd.f32 %v1064_v5, %v1061_v7 }
0x21e2   :  { %v1067_v9 = vmul.f32 %v1065_v8, %v1666_v42  ;;  %1066 = vst.msk [vmem:[#allocation4 + $0x7] sm:$0x1] %vm222_vm14, %v1065_v8 }
0x21e4   :  { %v1068_v11 = vsel %vm222_vm14, %v1067_v9, 0.0 }
0x21e5   :  { %1069 = vadd.xlane.f32.xlu1 %v1068_v11 }
0x21e6   :  { %v1077_v34 = vld [vmem:[#allocation2] sm:$0x1]  ;;  %v1084_v0 = vld [vmem:[#allocation2 + $0x1] sm:$0x1]  ;;  %v1095_v28 = vld [vmem:[#allocation2 + $0x2] sm:$0x1] }
0x21e7   :  { %v1106_v39 = vld [vmem:[#allocation2 + $0x3] sm:$0x1]  ;;  %v1117_v50 = vld [vmem:[#allocation2 + $0x4] sm:$0x1]  ;;  %v1128_v63 = vld [vmem:[#allocation2 + $0x5] sm:$0x1] }
0x2272   :  { %v1070_v4 = vpop.xlane.xlu1 %1069 }
0x2273   :  { %v1949_v13 = vsel %vm2105_vm2, %v1070_v4, %v1060_v61  ;;  %v1129_v61 = vld [vmem:[#allocation4 + $0x5] sm:$0x1]  ;;  %v1140_v4 = vld [vmem:[#allocation4 + $0x6] sm:$0x1] }
0x2274   :  { %v1078_v47 = vsel %vm2097_vm4, %v1949_v13, 0.0 }
0x2275   :  { %v1079_v14 = vsel %vm222_vm14, %v1078_v47, 0.0 }
0x2276   :  { %1080 = vadd.xlane.f32.xlu1 %v1079_v14  ;;  %v1139_v14 = vld [vmem:[#allocation2 + $0x6] sm:$0x1] }
0x2303   :  { %v1081_v15 = vpop.xlane.xlu1 %1080 }
0x2304   :  { %v1082_v16 = vadd.f32 %v1081_v15, %v1077_v34 }
0x2306   :  { %v1083_v59 = vsel %vm2106_vm7, %v1082_v16, 0.0 }
0x2307   :  { %v1086_v18 = vmin.f32 %v1083_v59, %v1949_v13 }
0x2309   :  { %v1087_v49 = vmin.f32 %v1086_v18, %v1085_v17 }
0x230b   :  { %v1088_v19 = vadd.f32 %v1087_v49, %v1084_v0 }
0x230d   :  { %v1090_v22 = vmul.f32 %v1088_v19, %v1595_v54  ;;  %1089 = vst.msk [vmem:[#allocation3 + $0x1] sm:$0x1] %vm222_vm14, %v1088_v19  ;;  %v1151_v19 = vld [vmem:[#allocation4 + $0x7] sm:$0x1] }
0x230f   :  { %v1091_v24 = vsel %vm222_vm14, %v1090_v22, 0.0 }
0x2310   :  { %1092 = vadd.xlane.f32.xlu0 %v1091_v24 }
0x239d   :  { %v1093_v2 = vpop.xlane.xlu0 %1092 }
0x239e   :  { %v1094_v46 = vsel %vm247_vm5, %v1093_v2, %v1083_v59  ;;  %v1161_v59 = vsel %vm2108_vm11, %v1543_v38, 0.0  ;;  %v1150_v2 = vld [vmem:[#allocation2 + $0x7] sm:$0x1] }
0x239f   :  { %v1097_v25 = vmin.f32 %v1094_v46, %v1949_v13  ;;  %v1162_v18 = vsel %vm218_vm3, %v1161_v59, 0.0 }
0x23a1   :  { %v1098_v12 = vmin.f32 %v1097_v25, %v1096_v27 }
0x23a3   :  { %v1099_v29 = vadd.f32 %v1098_v12, %v1095_v28 }
0x23a5   :  { %v1101_v30 = vmul.f32 %v1099_v29, %v1607_v10  ;;  %1100 = vst.msk [vmem:[#allocation3 + $0x2] sm:$0x1] %vm222_vm14, %v1099_v29 }
0x23a7   :  { %v1102_v31 = vsel %vm222_vm14, %v1101_v30, 0.0 }
0x23a8   :  { %1103 = vadd.xlane.f32.xlu1 %v1102_v31 }
0x2435   :  { %v1104_v32 = vpop.xlane.xlu1 %1103 }
0x2436   :  { %v1105_v33 = vsel %vm277_vm6, %v1104_v32, %v1094_v46 }
0x2437   :  { %v1108_v36 = vmin.f32 %v1105_v33, %v1949_v13 }
0x2439   :  { %v1109_v1 = vmin.f32 %v1108_v36, %v1107_v37  ;;  %v1174_v36 = vld [vmem:[#allocation3 + $0x1] sm:$0x1] }
0x243b   :  { %v1110_v23 = vadd.f32 %v1109_v1, %v1106_v39 }
0x243d   :  { %v1112_v40 = vmul.f32 %v1110_v23, %v1618_v20  ;;  %1111 = vst.msk [vmem:[#allocation3 + $0x3] sm:$0x1] %vm222_vm14, %v1110_v23 }
0x243f   :  { %v1113_v41 = vsel %vm222_vm14, %v1112_v40, 0.0 }
0x2440   :  { %1114 = vadd.xlane.f32.xlu0 %v1113_v41 }
0x24cd   :  { %v1115_v43 = vpop.xlane.xlu0 %1114 }
0x24ce   :  { %v1116_v44 = vsel %vm307_vm8, %v1115_v43, %v1105_v33 }
0x24cf   :  { %v1119_v48 = vmin.f32 %v1116_v44, %v1949_v13 }
0x24d1   :  { %v1120_v21 = vmin.f32 %v1119_v48, %v1118_v26  ;;  %v1185_v48 = vld [vmem:[#allocation3 + $0x2] sm:$0x1] }
0x24d3   :  { %v1121_v52 = vadd.f32 %v1120_v21, %v1117_v50 }
0x24d5   :  { %v1123_v53 = vmul.f32 %v1121_v52, %v1629_v35  ;;  %1122 = vst.msk [vmem:[#allocation3 + $0x4] sm:$0x1] %vm222_vm14, %v1121_v52 }
0x24d7   :  { %v1124_v55 = vsel %vm222_vm14, %v1123_v53, 0.0 }
0x24d8   :  { %1125 = vadd.xlane.f32.xlu1 %v1124_v55 }
0x2565   :  { %v1126_v56 = vpop.xlane.xlu1 %1125 }
0x2566   :  { %v1127_v57 = vsel %vm2107_vm9, %v1126_v56, %v1116_v44 }
0x2567   :  { %v1130_v58 = vmin.f32 %v1127_v57, %v1949_v13 }
0x2569   :  { %v1131_v62 = vmin.f32 %v1130_v58, %v1129_v61 }
0x256b   :  { %v1132_v5 = vadd.f32 %v1131_v62, %v1128_v63 }
0x256d   :  { %v1134_v6 = vmul.f32 %v1132_v5, %v1640_v51  ;;  %1133 = vst.msk [vmem:[#allocation3 + $0x5] sm:$0x1] %vm222_vm14, %v1132_v5 }
0x256f   :  { %v1135_v7 = vsel %vm222_vm14, %v1134_v6, 0.0 }
0x2570   :  { %1136 = vadd.xlane.f32.xlu0 %v1135_v7 }
0x25fd   :  { %v1137_v8 = vpop.xlane.xlu0 %1136 }
0x25fe   :  { %v1138_v9 = vsel %vm367_vm12, %v1137_v8, %v1127_v57  ;;  %v1196_v57 = vld [vmem:[#allocation3 + $0x3] sm:$0x1]  ;;  %v1207_v8 = vld [vmem:[#allocation3 + $0x4] sm:$0x1] }
0x25ff   :  { %v1141_v11 = vmin.f32 %v1138_v9, %v1949_v13 }
0x2601   :  { %v1142_v47 = vmin.f32 %v1141_v11, %v1140_v4 }
0x2603   :  { %v1143_v15 = vadd.f32 %v1142_v47, %v1139_v14 }
0x2605   :  { %v1145_v34 = vmul.f32 %v1143_v15, %v1651_v60  ;;  %1144 = vst.msk [vmem:[#allocation3 + $0x6] sm:$0x1] %vm222_vm14, %v1143_v15 }
0x2607   :  { %v1146_v16 = vsel %vm222_vm14, %v1145_v34, 0.0 }
0x2608   :  { %1147 = vadd.xlane.f32.xlu1 %v1146_v16  ;;  %v1218_v16 = vld [vmem:[#allocation3 + $0x5] sm:$0x1] }
0x260c   :  { %1163 = vadd.xlane.f32.xlu1 %v1162_v18 }
0x2695   :  { %v1148_v17 = vpop.xlane.xlu1 %1147 }
0x2696   :  { %v1149_v49 = vsel %vm2109_vm13, %v1148_v17, %v1138_v9 }
0x2697   :  { %v1152_v0 = vmin.f32 %v1149_v49, %v1949_v13 }
0x2699   :  { %v1153_v22 = vmin.f32 %v1152_v0, %v1151_v19  ;;  %v1164_v24 = vpop.xlane.xlu1 %1163 }
0x269a   :  { %1165 = vst.msk [vmem:[#allocation2] sm:$0xff] %vm218_vm3, %v1164_v24  ;;  %vm2112_vm3 = vmmov %vm2111_vm1  ;;  %v1229_v24 = vld [vmem:[#allocation3 + $0x6] sm:$0x1] }
0x269b   :  { %v1154_v46 = vadd.f32 %v1153_v22, %v1150_v2 }
0x269d   :  { %v1156_v25 = vmul.f32 %v1154_v46, %v1666_v42  ;;  %1155 = vst.msk [vmem:[#allocation3 + $0x7] sm:$0x1] %vm222_vm14, %v1154_v46 }
0x269f   :  { %v1157_v38 = vsel %vm222_vm14, %v1156_v25, 0.0 }
0x26a0   :  { %1158 = vadd.xlane.f32.xlu0 %v1157_v38 }
0x26a1   :  { %v1166_v30 = vld [vmem:[#allocation2] sm:$0x1]  ;;  %v1173_v1 = vld [vmem:[#allocation2 + $0x1] sm:$0x1]  ;;  %v1184_v21 = vld [vmem:[#allocation2 + $0x2] sm:$0x1] }
0x26a2   :  { %v1195_v61 = vld [vmem:[#allocation2 + $0x3] sm:$0x1]  ;;  %v1206_v11 = vld [vmem:[#allocation2 + $0x4] sm:$0x1]  ;;  %v1217_v18 = vld [vmem:[#allocation2 + $0x5] sm:$0x1] }
0x26a3   :  { %v1228_v46 = vld [vmem:[#allocation2 + $0x6] sm:$0x1] }
0x272d   :  { %v1159_v27 = vpop.xlane.xlu0 %1158 }
0x272e   :  { %v2004_v12 = vsel %vm2110_vm15, %v1159_v27, %v1149_v49 }
0x272f   :  { %v1167_v13 = vsel %vm2111_vm1, %v2004_v12, 0.0 }
0x2730   :  { %v1168_v28 = vsel %vm222_vm14, %v1167_v13, 0.0 }
0x2731   :  { %1169 = vadd.xlane.f32.xlu0 %v1168_v28 }
0x27be   :  { %v1170_v29 = vpop.xlane.xlu0 %1169 }
0x27bf   :  { %v1171_v31 = vadd.f32 %v1170_v29, %v1166_v30  ;;  %v1240_v29 = vld [vmem:[#allocation3 + $0x7] sm:$0x1] }
0x27c1   :  { %v1172_v32 = vsel %vm2112_vm3, %v1171_v31, 0.0  ;;  %v1239_v31 = vld [vmem:[#allocation2 + $0x7] sm:$0x1] }
0x27c2   :  { %v1175_v33 = vmin.f32 %v1172_v32, %v2004_v12 }
0x27c4   :  { %v1176_v37 = vmin.f32 %v1175_v33, %v1174_v36  ;;  %v556_v36 = vsel %vm222_vm14, %v1587_v45, 0.0 }
0x27c6   :  { %v1177_v39 = vadd.f32 %v1176_v37, %v1173_v1  ;;  %v558_v37 = vrot.slane %v556_v36, 4 }
0x27c8   :  { %v1179_v23 = vmul.f32 %v1177_v39, %v1595_v54  ;;  %1178 = vst.msk [vmem:[#allocation4 + $0x1] sm:$0x1] %vm222_vm14, %v1177_v39  ;;  %v559_v1 = vadd.f32 %v558_v37, %v556_v36 }
0x27ca   :  { %v1180_v40 = vsel %vm222_vm14, %v1179_v23, 0.0  ;;  %v560_v39 = vrot.slane %v559_v1, 2 }
0x27cb   :  { %1181 = vadd.xlane.f32.xlu1 %v1180_v40 }
0x27cc   :  { %v561_v23 = vadd.f32 %v560_v39, %v559_v1 }
0x27ce   :  { %v562_v40 = vrot.slane %v561_v23, 1 }
0x2858   :  { %v1182_v41 = vpop.xlane.xlu1 %1181 }
0x2859   :  { %v1183_v43 = vsel %vm247_vm5, %v1182_v41, %v1172_v32  ;;  %vm2113_vm5 = vmmov %vm2107_vm9  ;;  %v563_v41 = vadd.f32 %v562_v40, %v561_v23 }
0x285a   :  { %v1186_v44 = vmin.f32 %v1183_v43, %v2004_v12 }
0x285c   :  { %v1187_v26 = vmin.f32 %v1186_v44, %v1185_v48 }
0x285e   :  { %v1188_v50 = vadd.f32 %v1187_v26, %v1184_v21 }
0x2860   :  { %v1190_v52 = vmul.f32 %v1188_v50, %v1607_v10  ;;  %1189 = vst.msk [vmem:[#allocation4 + $0x2] sm:$0x1] %vm222_vm14, %v1188_v50 }
0x2862   :  { %v1191_v54 = vsel %vm222_vm14, %v1190_v52, 0.0 }
0x2863   :  { %1192 = vadd.xlane.f32.xlu0 %v1191_v54 }
0x28f0   :  { %v1193_v53 = vpop.xlane.xlu0 %1192 }
0x28f1   :  { %v1194_v55 = vsel %vm277_vm6, %v1193_v53, %v1183_v43  ;;  %vm2114_vm6 = vmmov %vm2104_vm0 }
0x28f2   :  { %v1197_v56 = vmin.f32 %v1194_v55, %v2004_v12 }
0x28f4   :  { %v1198_v58 = vmin.f32 %v1197_v56, %v1196_v57 }
0x28f6   :  { %v1199_v62 = vadd.f32 %v1198_v58, %v1195_v61 }
0x28f8   :  { %v1201_v63 = vmul.f32 %v1199_v62, %v1618_v20  ;;  %1200 = vst.msk [vmem:[#allocation4 + $0x3] sm:$0x1] %vm222_vm14, %v1199_v62 }
0x28fa   :  { %v1202_v10 = vsel %vm222_vm14, %v1201_v63, 0.0 }
0x28fb   :  { %1203 = vadd.xlane.f32.xlu1 %v1202_v10 }
0x2988   :  { %v1204_v5 = vpop.xlane.xlu1 %1203 }
0x2989   :  { %v1205_v6 = vsel %vm307_vm8, %v1204_v5, %v1194_v55  ;;  %vm2115_vm8 = vmmov %vm2105_vm2 }
0x298a   :  { %v1208_v7 = vmin.f32 %v1205_v6, %v2004_v12 }
0x298c   :  { %v1209_v9 = vmin.f32 %v1208_v7, %v1207_v8 }
0x298e   :  { %v1210_v4 = vadd.f32 %v1209_v9, %v1206_v11 }
0x2990   :  { %v1212_v47 = vmul.f32 %v1210_v4, %v1629_v35  ;;  %1211 = vst.msk [vmem:[#allocation4 + $0x4] sm:$0x1] %vm222_vm14, %v1210_v4 }
0x2992   :  { %v1213_v20 = vsel %vm222_vm14, %v1212_v47, 0.0 }
0x2993   :  { %1214 = vadd.xlane.f32.xlu0 %v1213_v20 }
0x2a20   :  { %v1215_v14 = vpop.xlane.xlu0 %1214 }
0x2a21   :  { %v1216_v15 = vsel %vm2113_vm5, %v1215_v14, %v1205_v6 }
0x2a22   :  { %v1219_v34 = vmin.f32 %v1216_v15, %v2004_v12 }
0x2a24   :  { %v1220_v59 = vmin.f32 %v1219_v34, %v1218_v16 }
0x2a26   :  { %v1221_v17 = vadd.f32 %v1220_v59, %v1217_v18 }
0x2a28   :  { %v1223_v49 = vmul.f32 %v1221_v17, %v1640_v51  ;;  %1222 = vst.msk [vmem:[#allocation4 + $0x5] sm:$0x1] %vm222_vm14, %v1221_v17 }
0x2a2a   :  { %v1224_v35 = vsel %vm222_vm14, %v1223_v49, 0.0 }
0x2a2b   :  { %1225 = vadd.xlane.f32.xlu1 %v1224_v35 }
0x2ab8   :  { %v1226_v0 = vpop.xlane.xlu1 %1225 }
0x2ab9   :  { %v1227_v19 = vsel %vm367_vm12, %v1226_v0, %v1216_v15  ;;  %vm203_vm12 = vcmask 0  }
0x2aba   :  { %v1230_v22 = vmin.f32 %v1227_v19, %v2004_v12 }
0x2abc   :  { %v1231_v2 = vmin.f32 %v1230_v22, %v1229_v24 }
0x2abe   :  { %v1232_v25 = vadd.f32 %v1231_v2, %v1228_v46 }
0x2ac0   :  { %v1234_v38 = vmul.f32 %v1232_v25, %v1651_v60  ;;  %1233 = vst.msk [vmem:[#allocation4 + $0x6] sm:$0x1] %vm222_vm14, %v1232_v25 }
0x2ac2   :  { %v1235_v51 = vsel %vm222_vm14, %v1234_v38, 0.0 }
0x2ac3   :  { %1236 = vadd.xlane.f32.xlu0 %v1235_v51 }
0x2b50   :  { %v1237_v27 = vpop.xlane.xlu0 %1236 }
0x2b51   :  { %v1238_v13 = vsel %vm2114_vm6, %v1237_v27, %v1227_v19 }
0x2b52   :  { %v1241_v28 = vmin.f32 %v1238_v13, %v2004_v12 }
0x2b54   :  { %v1242_v30 = vmin.f32 %v1241_v28, %v1240_v29 }
0x2b56   :  { %v1243_v32 = vadd.f32 %v1242_v30, %v1239_v31 }
0x2b58   :  { %v1245_v33 = vmul.f32 %v1243_v32, %v1666_v42  ;;  %1244 = vst.msk [vmem:[#allocation4 + $0x7] sm:$0x1] %vm222_vm14, %v1243_v32 }
0x2b5a   :  { %v1246_v60 = vsel %vm222_vm14, %v1245_v33, 0.0 }
0x2b5b   :  { %1247 = vadd.xlane.f32.xlu1 %v1246_v60 }
0x2be8   :  { %v1248_v12 = vpop.xlane.xlu1 %1247 }
0x2be9   :  { %v1249_v43 = vsel %vm2115_vm8, %v1248_v12, %v1238_v13 }
0x2bea   :  { %v1250_v44 = vmul.f32 %v1249_v43, %v563_v41 }
0x2bec   :  { %v1251_v42 = vsel %vm222_vm14, %v1250_v44, 0.0 }
0x2bed   :  { %1252 = vadd.xlane.f32.xlu0 %v1251_v42 }
0x2c7a   :  { %v1253_v48 = vpop.xlane.xlu0 %1252 }
0x2c7b   :  { %v1254_v26 = vrot.slane %v1253_v48, 4 }
0x2c7d   :  { %v1255_v21 = vadd.f32 %v1254_v26, %v1253_v48 }
0x2c7f   :  { %v1256_v50 = vrot.slane %v1255_v21, 2 }
0x2c81   :  { %v1257_v52 = vadd.f32 %v1256_v50, %v1255_v21 }
0x2c83   :  { %v1258_v45 = vrot.slane %v1257_v52, 1 }
0x2c85   :  { %v1259_v54 = vadd.f32 %v1258_v45, %v1257_v52 }
0x2c87   :  { %1313 = vpush %v1259_v54 }
0x2cb8   :  { %s1314_s27 = spop %1313 }
0x2cb9   :  { %v1261_v53 = vstv %s1314_s27 }
0x2cba   :  { %1262 = vst.msk [vmem:[#allocation5] sm:$0x1] %vm203_vm12, %v1261_v53 }
0x2cbb   :  { %1336 = shalt.err (!%p1333_p4)
}
0x2cbc   :  { %s1337_s5 = scalar_lea.hbm %s2072_s3, 16 }
0x2cbd   :  { %p1338_p5 = scmp.ne.s32.totalorder %s2072_s3, %s1337_s5  ;;  %p1341_p6 = scmp.lt.u32.totalorder %s1337_s5, %s2072_s3 }
0x2cbf   :  { %p1343_p7 = pnand %p1341_p6, %p1338_p5 }
0x2cc1   :  { %1346 = shalt.err (!%p1343_p7)
}
0x2cc2   :  { %1272 = dma.vmem_to_hbm [thread:$0]  %s1270_s26, 16, %s2072_s3, [#allocation6]  }
0x2cc3   :  { %1347 = dma.done.wait [#allocation6], 16  }
0x2cc4   :  { %1348 = vsyncadd [#allocation6], 4294967280 }
0x2cc5   :  { %1276 = vsyncpa [#allocation6], 1 }

</bundles_post_ra>
